<compile_context>
chip_gen: v7x
topology: tpu7x:2x2x1
jax: 0.10.0
libtpu: 0.0.40
codegen_flags: <defaults>
</compile_context>

<pallas_src>
import math
from functools import partial

import jax
import jax.numpy as jnp
from jax import lax
from jax.experimental import pallas as pl
from jax.experimental.pallas import tpu as pltpu


_VMEM_LIMIT_BYTES = 32 * 1024 * 1024   # explicit; safe on v5e/v6e/v7x
_FUSED_VMEM_BUDGET = 24 * 1024 * 1024  # headroom below the scoped limit


# ---------------------------------------------------------------------------
# Tiled linear (matmul + bias) with K-reduction accumulator (fallback path).
# ---------------------------------------------------------------------------
def _linear_kernel(x_ref, w_ref, b_ref, o_ref, acc_ref):
    k = pl.program_id(2)

    @pl.when(k == 0)
    def _():
        acc_ref[...] = jnp.zeros_like(acc_ref)

    acc_ref[...] += jnp.dot(
        x_ref[...], w_ref[...], preferred_element_type=jnp.float32
    )

    @pl.when(k == pl.num_programs(2) - 1)
    def _():
        o_ref[...] = (acc_ref[...] + b_ref[...]).astype(o_ref.dtype)


def _pick_tile(dim, target, granule):
    """Largest tile <= target that divides `dim` and is a multiple of `granule`
    (falls back to the full dim when the dim is small / not a granule multiple)."""
    if dim <= target or dim % granule != 0:
        return dim
    t = (target // granule) * granule
    while t >= granule:
        if dim % t == 0:
            return t
        t -= granule
    return dim


def linear(x2d, w, b, *, tm=256, tn=512, tk=512, mxu_dtype=None, out_dtype=None):
    """out = x2d @ w + b, tiled for the MXU with pipelined HBM<->VMEM DMA."""
    M, K = x2d.shape
    Kw, N = w.shape
    assert K == Kw

    if out_dtype is None:
        out_dtype = x2d.dtype if mxu_dtype is None else mxu_dtype
    if mxu_dtype is not None:
        x2d = x2d.astype(mxu_dtype)
        w = w.astype(mxu_dtype)

    tm = _pick_tile(M, tm, 8)      # sublane axis of x / acc
    tn = _pick_tile(N, tn, 128)    # lane axis of w / acc / out
    tk = _pick_tile(K, tk, 128)    # lane axis of x, sublane axis of w

    grid_spec = pltpu.PrefetchScalarGridSpec(
        num_scalar_prefetch=0,
        grid=(M // tm, N // tn, K // tk),
        in_specs=[
            pl.BlockSpec((tm, tk), lambda i, j, k: (i, k)),
            pl.BlockSpec((tk, tn), lambda i, j, k: (k, j)),
            pl.BlockSpec((1, tn), lambda i, j, k: (0, j)),
        ],
        out_specs=pl.BlockSpec((tm, tn), lambda i, j, k: (i, j)),
        scratch_shapes=[pltpu.VMEM((tm, tn), jnp.float32)],
    )
    return pl.pallas_call(
        _linear_kernel,
        out_shape=jax.ShapeDtypeStruct((M, N), out_dtype),
        grid_spec=grid_spec,
        compiler_params=pltpu.CompilerParams(
            dimension_semantics=("parallel", "parallel", "arbitrary"),
            vmem_limit_bytes=_VMEM_LIMIT_BYTES,
        ),
    )(x2d, w, b.reshape(1, N).astype(jnp.float32))


# ---------------------------------------------------------------------------
# Causal attention on a fused (B, T, 3C) qkv tensor (fallback path).
# One grid step per batch; head split/merge is static lane slicing in-kernel.
# ---------------------------------------------------------------------------
def _attention_kernel(qkv_ref, o_ref, *, n_head):
    qkv = qkv_ref[0]                       # (T, 3C)
    T = qkv.shape[0]
    C = qkv.shape[1] // 3
    hd = C // n_head
    scale = 1.0 / math.sqrt(hd)

    # Additive causal mask, shared across heads (f32; scores stay f32).
    row = lax.broadcasted_iota(jnp.int32, (T, T), 0)
    col = lax.broadcasted_iota(jnp.int32, (T, T), 1)
    neg = jnp.where(col <= row, 0.0, -1e30).astype(jnp.float32)

    outs = []
    for h in range(n_head):                # static unroll over heads
        qh = qkv[:, h * hd:(h + 1) * hd] * scale          # scale small operand
        kh = qkv[:, C + h * hd: C + (h + 1) * hd]
        vh = qkv[:, 2 * C + h * hd: 2 * C + (h + 1) * hd]

        # q @ k^T via contraction on the shared last dim (no transposed K copy).
        s = lax.dot_general(
            qh, kh, (((1,), (1,)), ((), ())),
            preferred_element_type=jnp.float32,
        ) + neg

        m = jnp.max(s, axis=-1, keepdims=True)
        p = jnp.exp(s - m)
        l = jnp.sum(p, axis=-1, keepdims=True)

        oh = jnp.dot(p.astype(vh.dtype), vh, preferred_element_type=jnp.float32)
        oh = oh * pl.reciprocal(l, approx=True)           # EUP slot
        outs.append(oh)

    # Lane-dense writeback: heads concatenated along the lane axis -> (T, C).
    o_ref[0] = jnp.concatenate(outs, axis=-1).astype(o_ref.dtype)


def attention(qkv, n_head):
    B, T, C3 = qkv.shape
    C = C3 // 3
    return pl.pallas_call(
        partial(_attention_kernel, n_head=n_head),
        out_shape=jax.ShapeDtypeStruct((B, T, C), qkv.dtype),
        grid=(B,),
        in_specs=[pl.BlockSpec((1, T, C3), lambda b: (b, 0, 0))],
        out_specs=pl.BlockSpec((1, T, C), lambda b: (b, 0, 0)),
        compiler_params=pltpu.CompilerParams(
            dimension_semantics=("parallel",),
            vmem_limit_bytes=_VMEM_LIMIT_BYTES,
        ),
    )(qkv)


# ---------------------------------------------------------------------------
# Fully-fused CausalSelfAttention kernel: qkv proj + attention + out proj,
# one grid step per batch element, no intermediate HBM traffic.
# ---------------------------------------------------------------------------
def _fused_csa_kernel(x_ref, wqkv_ref, bqkv_ref, wproj_ref, bproj_ref, o_ref,
                      *, n_head):
    op_dtype = wqkv_ref.dtype              # MXU operand dtype (f32 or bf16)

    x = x_ref[0]                           # (T, C)
    T, C = x.shape
    hd = C // n_head
    scale = 1.0 / math.sqrt(hd)

    # qkv projection: f32 accumulation, f32 bias.
    qkv = jnp.dot(x, wqkv_ref[...], preferred_element_type=jnp.float32)
    qkv = qkv + bqkv_ref[...]              # (T, 3C) f32

    # Additive causal mask shared across heads.
    row = lax.broadcasted_iota(jnp.int32, (T, T), 0)
    col = lax.broadcasted_iota(jnp.int32, (T, T), 1)
    neg = jnp.where(col <= row, 0.0, -1e30).astype(jnp.float32)

    outs = []
    for h in range(n_head):                # static unroll over heads
        qh = (qkv[:, h * hd:(h + 1) * hd] * scale).astype(op_dtype)
        kh = qkv[:, C + h * hd: C + (h + 1) * hd].astype(op_dtype)
        vh = qkv[:, 2 * C + h * hd: 2 * C + (h + 1) * hd].astype(op_dtype)

        s = lax.dot_general(
            qh, kh, (((1,), (1,)), ((), ())),
            preferred_element_type=jnp.float32,
        ) + neg

        m = jnp.max(s, axis=-1, keepdims=True)
        p = jnp.exp(s - m)
        l = jnp.sum(p, axis=-1, keepdims=True)

        oh = jnp.dot(p.astype(op_dtype), vh, preferred_element_type=jnp.float32)
        oh = oh * pl.reciprocal(l, approx=True)
        outs.append(oh)

    y = jnp.concatenate(outs, axis=-1)     # (T, C) f32, lane-dense

    # Output projection fused in-kernel; weights stay resident across grid steps.
    out = jnp.dot(y.astype(op_dtype), wproj_ref[...],
                  preferred_element_type=jnp.float32)
    out = out + bproj_ref[...]
    o_ref[0] = out.astype(o_ref.dtype)


def _fused_forward(x, params, n_head, *, mxu_dtype=None):
    B, T, C = x.shape
    out_dtype = x.dtype

    w_attn, w_proj = params["w_attn"], params["w_proj"]
    if mxu_dtype is not None:
        x = x.astype(mxu_dtype)
        w_attn = w_attn.astype(mxu_dtype)
        w_proj = w_proj.astype(mxu_dtype)

    b_attn = params["b_attn"].reshape(1, 3 * C).astype(jnp.float32)
    b_proj = params["b_proj"].reshape(1, C).astype(jnp.float32)

    grid_spec = pltpu.PrefetchScalarGridSpec(
        num_scalar_prefetch=0,
        grid=(B,),
        in_specs=[
            pl.BlockSpec((1, T, C), lambda b: (b, 0, 0)),
            pl.BlockSpec((C, 3 * C), lambda b: (0, 0)),   # resident across grid
            pl.BlockSpec((1, 3 * C), lambda b: (0, 0)),
            pl.BlockSpec((C, C), lambda b: (0, 0)),
            pl.BlockSpec((1, C), lambda b: (0, 0)),
        ],
        out_specs=pl.BlockSpec((1, T, C), lambda b: (b, 0, 0)),
    )
    return pl.pallas_call(
        partial(_fused_csa_kernel, n_head=n_head),
        out_shape=jax.ShapeDtypeStruct((B, T, C), out_dtype),
        grid_spec=grid_spec,
        compiler_params=pltpu.CompilerParams(
            dimension_semantics=("parallel",),
            vmem_limit_bytes=_VMEM_LIMIT_BYTES,
        ),
    )(x, w_attn, b_attn, w_proj, b_proj)


def _fused_fits_vmem(T, C, mxu_dtype):
    """Rough per-grid-step VMEM estimate for the fused kernel."""
    opb = 4 if mxu_dtype is None else jnp.dtype(mxu_dtype).itemsize
    weights = C * 3 * C * opb + C * C * opb + 4 * C * 4   # w_attn, w_proj, biases
    io = 2 * (T * C * opb) + 2 * (T * C * 4)              # x / out (double-buffered)
    work = T * 3 * C * 4 + 2 * T * T * 4 + 2 * T * C * 4  # qkv, scores/probs, y
    return (2 * weights + io + work) < _FUSED_VMEM_BUDGET


# ---------------------------------------------------------------------------
# Module forward: fused single-kernel path when it fits VMEM, otherwise the
# modular (tiled linear -> attention -> tiled linear) path.
# ---------------------------------------------------------------------------
def causal_self_attention(x, params, n_head, *, mxu_dtype=None,
                          force_modular=False):
    B, T, C = x.shape
    assert C % n_head == 0
    out_dtype = x.dtype

    if (not force_modular) and _fused_fits_vmem(T, C, mxu_dtype):
        return _fused_forward(x, params, n_head, mxu_dtype=mxu_dtype)

    # Fallback: tiled qkv projection -> attention -> tiled output projection.
    qkv = linear(x.reshape(B * T, C), params["w_attn"], params["b_attn"],
                 mxu_dtype=mxu_dtype)
    qkv = qkv.reshape(B, T, 3 * C)
    y = attention(qkv, n_head)
    y = linear(y.reshape(B * T, C), params["w_proj"], params["b_proj"],
               mxu_dtype=mxu_dtype, out_dtype=out_dtype)
    return y.reshape(B, T, C)


# ---------------------------------------------------------------------------
# Pure-JAX reference for correctness checking
# ---------------------------------------------------------------------------
def reference(x, params, n_head):
    B, T, C = x.shape
    hd = C // n_head
    qkv = x @ params["w_attn"] + params["b_attn"]
    q, k, v = jnp.split(qkv, 3, axis=2)
    q = q.reshape(B, T, n_head, hd).transpose(0, 2, 1, 3)
    k = k.reshape(B, T, n_head, hd).transpose(0, 2, 1, 3)
    v = v.reshape(B, T, n_head, hd).transpose(0, 2, 1, 3)
    s = (q @ jnp.swapaxes(k, -1, -2)) / math.sqrt(hd)
    mask = jnp.tril(jnp.ones((T, T), dtype=bool))
    s = jnp.where(mask[None, None], s, -jnp.inf)
    p = jax.nn.softmax(s, axis=-1)
    y = p @ v
    y = y.transpose(0, 2, 1, 3).reshape(B, T, C)
    return y @ params["w_proj"] + params["b_proj"]


if __name__ == "__main__":
    # Small GPT-like config (T=128 matches the module spec)
    B, T, C, n_head = 2, 128, 32, 4

    key = jax.random.PRNGKey(0)
    kx, k1, k2, k3, k4 = jax.random.split(key, 5)

    x = jax.random.normal(kx, (B, T, C), dtype=jnp.float32)
    params = {
        "w_attn": 0.02 * jax.random.normal(k1, (C, 3 * C), dtype=jnp.float32),
        "b_attn": 0.02 * jax.random.normal(k2, (3 * C,), dtype=jnp.float32),
        "w_proj": 0.02 * jax.random.normal(k3, (C, C), dtype=jnp.float32),
        "b_proj": 0.02 * jax.random.normal(k4, (C,), dtype=jnp.float32),
    }

    y_ref = reference(x, params, n_head)

    # Fused single-kernel path (default for this config); f32 end-to-end.
    y_fused = jax.block_until_ready(causal_self_attention(x, params, n_head))
    assert jnp.allclose(y_fused, y_ref, atol=2e-4, rtol=2e-4), "fused mismatch"

    # Modular fallback path (tiled linear -> attention -> tiled linear).
    y_mod = jax.block_until_ready(
        causal_self_attention(x, params, n_head, force_modular=True))
    assert jnp.allclose(y_mod, y_ref, atol=2e-4, rtol=2e-4), "modular mismatch"

    print("KERNEL_OK")
</pallas_src>

<mosaic_0001>
module attributes {stable_mosaic.version = 11 : i64} {
  func.func @_fused_csa_kernel(%arg0: i32, %arg1: memref<1x128x32xf32, #tpu.memory_space<vmem>>, %arg2: memref<32x96xf32, #tpu.memory_space<vmem>>, %arg3: memref<1x96xf32, #tpu.memory_space<vmem>>, %arg4: memref<32x32xf32, #tpu.memory_space<vmem>>, %arg5: memref<1x32xf32, #tpu.memory_space<vmem>>, %arg6: memref<1x128x32xf32, #tpu.memory_space<vmem>>) attributes {dimension_semantics = [#tpu.dimension_semantics<parallel>], iteration_bounds = array<i64: 2>, scalar_prefetch = 0 : i64, scratch_operands = 0 : i64, tpu.core_type = #tpu.core_type<tc>, window_params = [{transform_indices = @transform_0, window_bounds = array<i64: 1, 128, 32>}, {pipeline_mode = #tpu.pipeline_mode<synchronous>, transform_indices = @transform_1, window_bounds = array<i64: 32, 96>}, {pipeline_mode = #tpu.pipeline_mode<synchronous>, transform_indices = @transform_2, window_bounds = array<i64: 1, 96>}, {pipeline_mode = #tpu.pipeline_mode<synchronous>, transform_indices = @transform_3, window_bounds = array<i64: 32, 32>}, {pipeline_mode = #tpu.pipeline_mode<synchronous>, transform_indices = @transform_4, window_bounds = array<i64: 1, 32>}, {transform_indices = @transform_5, window_bounds = array<i64: 1, 128, 32>}]} {
    %c0 = arith.constant 0 : index
    %c0_0 = arith.constant 0 : index
    %c0_1 = arith.constant 0 : index
    %0 = vector.load %arg1[%c0, %c0_0, %c0_1] : memref<1x128x32xf32, #tpu.memory_space<vmem>>, vector<1x128x32xf32>
    %1 = vector.shape_cast %0 : vector<1x128x32xf32> to vector<128x32xf32>
    %c0_2 = arith.constant 0 : index
    %c0_3 = arith.constant 0 : index
    %2 = vector.load %arg2[%c0_2, %c0_3] : memref<32x96xf32, #tpu.memory_space<vmem>>, vector<32x96xf32>
    %cst = arith.constant dense<0.000000e+00> : vector<128x96xf32>
    %3 = tpu.matmul %1, %2, %cst {dimension_numbers = #tpu.dot_dimension_numbers<[1], [0], [0], [1], [0, 0, 1, 1], [], []>} : vector<128x32xf32>, vector<32x96xf32>, vector<128x96xf32> -> vector<128x96xf32>
    %c0_4 = arith.constant 0 : index
    %c0_5 = arith.constant 0 : index
    %4 = vector.load %arg3[%c0_4, %c0_5] : memref<1x96xf32, #tpu.memory_space<vmem>>, vector<1x96xf32>
    %5 = vector.broadcast %4 : vector<1x96xf32> to vector<128x96xf32>
    %6 = arith.addf %3, %5 : vector<128x96xf32>
    %7 = tpu.iota {dimensions = array<i32: 0>} : vector<128x128xi32>
    %8 = tpu.iota {dimensions = array<i32: 1>} : vector<128x128xi32>
    %9 = arith.cmpi sle, %8, %7 : vector<128x128xi32>
    %cst_6 = arith.constant 0.000000e+00 : f32
    %cst_7 = arith.constant -1.000000e+30 : f32
    %10 = vector.broadcast %cst_6 : f32 to vector<128x128xf32>
    %11 = vector.broadcast %cst_7 : f32 to vector<128x128xf32>
    %12 = arith.select %9, %10, %11 : vector<128x128xi1>, vector<128x128xf32>
    %13 = vector.extract_strided_slice %6 {offsets = [0, 0], sizes = [128, 8], strides = [1, 1]} : vector<128x96xf32> to vector<128x8xf32>
    %cst_8 = arith.constant 0.353553385 : f32
    %14 = vector.broadcast %cst_8 : f32 to vector<128x8xf32>
    %15 = arith.mulf %13, %14 : vector<128x8xf32>
    %16 = vector.extract_strided_slice %6 {offsets = [0, 32], sizes = [128, 8], strides = [1, 1]} : vector<128x96xf32> to vector<128x8xf32>
    %17 = vector.extract_strided_slice %6 {offsets = [0, 64], sizes = [128, 8], strides = [1, 1]} : vector<128x96xf32> to vector<128x8xf32>
    %cst_9 = arith.constant dense<0.000000e+00> : vector<128x128xf32>
    %18 = tpu.matmul %15, %16, %cst_9 {dimension_numbers = #tpu.dot_dimension_numbers<[1], [1], [0], [0], [0, 0, 1, 0], [], []>} : vector<128x8xf32>, vector<128x8xf32>, vector<128x128xf32> -> vector<128x128xf32>
    %19 = arith.addf %18, %12 : vector<128x128xf32>
    %cst_10 = arith.constant dense<0xFF800000> : vector<128xf32>
    %20 = vector.multi_reduction <maximumf>, %19, %cst_10 [1] : vector<128x128xf32> to vector<128xf32>
    %21 = vector.shape_cast %20 : vector<128xf32> to vector<128x1xf32>
    %22 = vector.broadcast %21 : vector<128x1xf32> to vector<128x128xf32>
    %23 = arith.subf %19, %22 : vector<128x128xf32>
    %24 = math.exp %23 : vector<128x128xf32>
    %cst_11 = arith.constant dense<0.000000e+00> : vector<128xf32>
    %25 = vector.multi_reduction <add>, %24, %cst_11 [1] : vector<128x128xf32> to vector<128xf32>
    %26 = vector.shape_cast %25 : vector<128xf32> to vector<128x1xf32>
    %cst_12 = arith.constant dense<0.000000e+00> : vector<128x8xf32>
    %27 = tpu.matmul %24, %17, %cst_12 {dimension_numbers = #tpu.dot_dimension_numbers<[1], [0], [0], [1], [0, 0, 1, 1], [], []>} : vector<128x128xf32>, vector<128x8xf32>, vector<128x8xf32> -> vector<128x8xf32>
    %28 = tpu.reciprocal %26 {approx = true} : vector<128x1xf32> -> vector<128x1xf32>
    %29 = vector.broadcast %28 : vector<128x1xf32> to vector<128x8xf32>
    %30 = arith.mulf %27, %29 : vector<128x8xf32>
    %31 = vector.extract_strided_slice %6 {offsets = [0, 8], sizes = [128, 8], strides = [1, 1]} : vector<128x96xf32> to vector<128x8xf32>
    %cst_13 = arith.constant 0.353553385 : f32
    %32 = vector.broadcast %cst_13 : f32 to vector<128x8xf32>
    %33 = arith.mulf %31, %32 : vector<128x8xf32>
    %34 = vector.extract_strided_slice %6 {offsets = [0, 40], sizes = [128, 8], strides = [1, 1]} : vector<128x96xf32> to vector<128x8xf32>
    %35 = vector.extract_strided_slice %6 {offsets = [0, 72], sizes = [128, 8], strides = [1, 1]} : vector<128x96xf32> to vector<128x8xf32>
    %cst_14 = arith.constant dense<0.000000e+00> : vector<128x128xf32>
    %36 = tpu.matmul %33, %34, %cst_14 {dimension_numbers = #tpu.dot_dimension_numbers<[1], [1], [0], [0], [0, 0, 1, 0], [], []>} : vector<128x8xf32>, vector<128x8xf32>, vector<128x128xf32> -> vector<128x128xf32>
    %37 = arith.addf %36, %12 : vector<128x128xf32>
    %cst_15 = arith.constant dense<0xFF800000> : vector<128xf32>
    %38 = vector.multi_reduction <maximumf>, %37, %cst_15 [1] : vector<128x128xf32> to vector<128xf32>
    %39 = vector.shape_cast %38 : vector<128xf32> to vector<128x1xf32>
    %40 = vector.broadcast %39 : vector<128x1xf32> to vector<128x128xf32>
    %41 = arith.subf %37, %40 : vector<128x128xf32>
    %42 = math.exp %41 : vector<128x128xf32>
    %cst_16 = arith.constant dense<0.000000e+00> : vector<128xf32>
    %43 = vector.multi_reduction <add>, %42, %cst_16 [1] : vector<128x128xf32> to vector<128xf32>
    %44 = vector.shape_cast %43 : vector<128xf32> to vector<128x1xf32>
    %cst_17 = arith.constant dense<0.000000e+00> : vector<128x8xf32>
    %45 = tpu.matmul %42, %35, %cst_17 {dimension_numbers = #tpu.dot_dimension_numbers<[1], [0], [0], [1], [0, 0, 1, 1], [], []>} : vector<128x128xf32>, vector<128x8xf32>, vector<128x8xf32> -> vector<128x8xf32>
    %46 = tpu.reciprocal %44 {approx = true} : vector<128x1xf32> -> vector<128x1xf32>
    %47 = vector.broadcast %46 : vector<128x1xf32> to vector<128x8xf32>
    %48 = arith.mulf %45, %47 : vector<128x8xf32>
    %49 = vector.extract_strided_slice %6 {offsets = [0, 16], sizes = [128, 8], strides = [1, 1]} : vector<128x96xf32> to vector<128x8xf32>
    %cst_18 = arith.constant 0.353553385 : f32
    %50 = vector.broadcast %cst_18 : f32 to vector<128x8xf32>
    %51 = arith.mulf %49, %50 : vector<128x8xf32>
    %52 = vector.extract_strided_slice %6 {offsets = [0, 48], sizes = [128, 8], strides = [1, 1]} : vector<128x96xf32> to vector<128x8xf32>
    %53 = vector.extract_strided_slice %6 {offsets = [0, 80], sizes = [128, 8], strides = [1, 1]} : vector<128x96xf32> to vector<128x8xf32>
    %cst_19 = arith.constant dense<0.000000e+00> : vector<128x128xf32>
    %54 = tpu.matmul %51, %52, %cst_19 {dimension_numbers = #tpu.dot_dimension_numbers<[1], [1], [0], [0], [0, 0, 1, 0], [], []>} : vector<128x8xf32>, vector<128x8xf32>, vector<128x128xf32> -> vector<128x128xf32>
    %55 = arith.addf %54, %12 : vector<128x128xf32>
    %cst_20 = arith.constant dense<0xFF800000> : vector<128xf32>
    %56 = vector.multi_reduction <maximumf>, %55, %cst_20 [1] : vector<128x128xf32> to vector<128xf32>
    %57 = vector.shape_cast %56 : vector<128xf32> to vector<128x1xf32>
    %58 = vector.broadcast %57 : vector<128x1xf32> to vector<128x128xf32>
    %59 = arith.subf %55, %58 : vector<128x128xf32>
    %60 = math.exp %59 : vector<128x128xf32>
    %cst_21 = arith.constant dense<0.000000e+00> : vector<128xf32>
    %61 = vector.multi_reduction <add>, %60, %cst_21 [1] : vector<128x128xf32> to vector<128xf32>
    %62 = vector.shape_cast %61 : vector<128xf32> to vector<128x1xf32>
    %cst_22 = arith.constant dense<0.000000e+00> : vector<128x8xf32>
    %63 = tpu.matmul %60, %53, %cst_22 {dimension_numbers = #tpu.dot_dimension_numbers<[1], [0], [0], [1], [0, 0, 1, 1], [], []>} : vector<128x128xf32>, vector<128x8xf32>, vector<128x8xf32> -> vector<128x8xf32>
    %64 = tpu.reciprocal %62 {approx = true} : vector<128x1xf32> -> vector<128x1xf32>
    %65 = vector.broadcast %64 : vector<128x1xf32> to vector<128x8xf32>
    %66 = arith.mulf %63, %65 : vector<128x8xf32>
    %67 = vector.extract_strided_slice %6 {offsets = [0, 24], sizes = [128, 8], strides = [1, 1]} : vector<128x96xf32> to vector<128x8xf32>
    %cst_23 = arith.constant 0.353553385 : f32
    %68 = vector.broadcast %cst_23 : f32 to vector<128x8xf32>
    %69 = arith.mulf %67, %68 : vector<128x8xf32>
    %70 = vector.extract_strided_slice %6 {offsets = [0, 56], sizes = [128, 8], strides = [1, 1]} : vector<128x96xf32> to vector<128x8xf32>
    %71 = vector.extract_strided_slice %6 {offsets = [0, 88], sizes = [128, 8], strides = [1, 1]} : vector<128x96xf32> to vector<128x8xf32>
    %cst_24 = arith.constant dense<0.000000e+00> : vector<128x128xf32>
    %72 = tpu.matmul %69, %70, %cst_24 {dimension_numbers = #tpu.dot_dimension_numbers<[1], [1], [0], [0], [0, 0, 1, 0], [], []>} : vector<128x8xf32>, vector<128x8xf32>, vector<128x128xf32> -> vector<128x128xf32>
    %73 = arith.addf %72, %12 : vector<128x128xf32>
    %cst_25 = arith.constant dense<0xFF800000> : vector<128xf32>
    %74 = vector.multi_reduction <maximumf>, %73, %cst_25 [1] : vector<128x128xf32> to vector<128xf32>
    %75 = vector.shape_cast %74 : vector<128xf32> to vector<128x1xf32>
    %76 = vector.broadcast %75 : vector<128x1xf32> to vector<128x128xf32>
    %77 = arith.subf %73, %76 : vector<128x128xf32>
    %78 = math.exp %77 : vector<128x128xf32>
    %cst_26 = arith.constant dense<0.000000e+00> : vector<128xf32>
    %79 = vector.multi_reduction <add>, %78, %cst_26 [1] : vector<128x128xf32> to vector<128xf32>
    %80 = vector.shape_cast %79 : vector<128xf32> to vector<128x1xf32>
    %cst_27 = arith.constant dense<0.000000e+00> : vector<128x8xf32>
    %81 = tpu.matmul %78, %71, %cst_27 {dimension_numbers = #tpu.dot_dimension_numbers<[1], [0], [0], [1], [0, 0, 1, 1], [], []>} : vector<128x128xf32>, vector<128x8xf32>, vector<128x8xf32> -> vector<128x8xf32>
    %82 = tpu.reciprocal %80 {approx = true} : vector<128x1xf32> -> vector<128x1xf32>
    %83 = vector.broadcast %82 : vector<128x1xf32> to vector<128x8xf32>
    %84 = arith.mulf %81, %83 : vector<128x8xf32>
    %85 = tpu.concatenate %30, %48, %66, %84 in 1 : vector<128x8xf32>, vector<128x8xf32>, vector<128x8xf32>, vector<128x8xf32> -> vector<128x32xf32>
    %c0_28 = arith.constant 0 : index
    %c0_29 = arith.constant 0 : index
    %86 = vector.load %arg4[%c0_28, %c0_29] : memref<32x32xf32, #tpu.memory_space<vmem>>, vector<32x32xf32>
    %cst_30 = arith.constant dense<0.000000e+00> : vector<128x32xf32>
    %87 = tpu.matmul %85, %86, %cst_30 {dimension_numbers = #tpu.dot_dimension_numbers<[1], [0], [0], [1], [0, 0, 1, 1], [], []>} : vector<128x32xf32>, vector<32x32xf32>, vector<128x32xf32> -> vector<128x32xf32>
    %c0_31 = arith.constant 0 : index
    %c0_32 = arith.constant 0 : index
    %88 = vector.load %arg5[%c0_31, %c0_32] : memref<1x32xf32, #tpu.memory_space<vmem>>, vector<1x32xf32>
    %89 = vector.broadcast %88 : vector<1x32xf32> to vector<128x32xf32>
    %90 = arith.addf %87, %89 : vector<128x32xf32>
    %c0_33 = arith.constant 0 : index
    %c0_34 = arith.constant 0 : index
    %c0_35 = arith.constant 0 : index
    %91 = vector.load %arg6[%c0_33, %c0_34, %c0_35] : memref<1x128x32xf32, #tpu.memory_space<vmem>>, vector<1x128x32xf32>
    %92 = vector.shape_cast %91 : vector<1x128x32xf32> to vector<128x32xf32>
    %93 = vector.shape_cast %90 : vector<128x32xf32> to vector<1x128x32xf32>
    tpu.vector_store %arg6[%c0_33, %c0_34, %c0_35], %93 {strides = array<i32>} : memref<1x128x32xf32, #tpu.memory_space<vmem>>, vector<1x128x32xf32>,
    return
  }
  func.func @transform_0(%arg0: i32) -> (i32, i32, i32) {
    %c0_i32 = arith.constant 0 : i32
    %c0_i32_0 = arith.constant 0 : i32
    %c0_i32_1 = arith.constant 0 : i32
    return %arg0, %c0_i32, %c0_i32_0 : i32, i32, i32
  }
  func.func @transform_1(%arg0: i32) -> (i32, i32) {
    %c0_i32 = arith.constant 0 : i32
    %c0_i32_0 = arith.constant 0 : i32
    %c0_i32_1 = arith.constant 0 : i32
    return %c0_i32, %c0_i32_0 : i32, i32
  }
  func.func @transform_2(%arg0: i32) -> (i32, i32) {
    %c0_i32 = arith.constant 0 : i32
    %c0_i32_0 = arith.constant 0 : i32
    %c0_i32_1 = arith.constant 0 : i32
    return %c0_i32, %c0_i32_0 : i32, i32
  }
  func.func @transform_3(%arg0: i32) -> (i32, i32) {
    %c0_i32 = arith.constant 0 : i32
    %c0_i32_0 = arith.constant 0 : i32
    %c0_i32_1 = arith.constant 0 : i32
    return %c0_i32, %c0_i32_0 : i32, i32
  }
  func.func @transform_4(%arg0: i32) -> (i32, i32) {
    %c0_i32 = arith.constant 0 : i32
    %c0_i32_0 = arith.constant 0 : i32
    %c0_i32_1 = arith.constant 0 : i32
    return %c0_i32, %c0_i32_0 : i32, i32
  }
  func.func @transform_5(%arg0: i32) -> (i32, i32, i32) {
    %c0_i32 = arith.constant 0 : i32
    %c0_i32_0 = arith.constant 0 : i32
    %c0_i32_1 = arith.constant 0 : i32
    return %arg0, %c0_i32, %c0_i32_0 : i32, i32, i32
  }
}

</mosaic_0001>

<bundles_post_ra>
// kernel: tpu_custom_call.1
= control target key start
LH: loop header
LB: loop body
LE: loop exit
PB: predicated region body
PF: predicated region fallthrough
CT: control target
= control target key end

     0   :  { %s5458_s18 = smov 0   ;;  %s7151_s0 = inlined_call_operand.vmem [shape: f32[2,128,32], index: 0, kind: input, shape index: {}]   ;;  %s7152_s1 = inlined_call_operand.vmem [shape: f32[32,96], index: 1, kind: input, shape index: {}]   ;;  %s7153_s2 = inlined_call_operand.vmem [shape: f32[1,96], index: 2, kind: input, shape index: {}]   ;;  %s7154_s3 = inlined_call_operand.vmem [shape: f32[32,32], index: 3, kind: input, shape index: {}]   ;;  %s7155_s4 = inlined_call_operand.vmem [shape: f32[1,32], index: 4, kind: input, shape index: {}]   ;;  %s7156_s5 = inlined_call_operand.vmem [shape: f32[2,128,32], index: 5, kind: output, shape index: {}]  }
   0x1 LB: > { %s3471_s19 = sadd.s32 4294967295, %s5411_s18   ;;  %p3475_p0 = scmp.ge.s32.totalorder %s5411_s18, 1  ;;  %s5411_s18 = sphi %s5458_s18, %s15_s18  }
   0x2   : > { %p187_p1 = scmp.lt.s32.totalorder %s5411_s18, 3 }
   0x4   : > { %p188_p2 = pnand %p3475_p0, %p187_p1 }
   0x6   : > { %191 = sbr.rel (%p188_p2) target bundleno = 2849 (0xb21), region = 40 }
   0xd   : > { %v241_v0 = vld [vmem:[%s7152_s1] sm:$0xff]  ;;  %v242_v1 = vld [vmem:[%s7152_s1 + $0x8] sm:$0xff]  ;;  %v243_v2 = vld [vmem:[%s7152_s1 + $0x10] sm:$0xff]  ;;  %p215_p3 = scmp.lt.s32.totalorder %s3471_s19, 1  ;;  %vm252_vm0 = vcmask 261120   ;;  %vm561_vm1 = vcmask 64512  }
   0xe   : > { %v4454_v3 = vpack.c.bf16 %v242_v1, %v241_v0  ;;  %v244_v4 = vld [vmem:[%s7152_s1 + $0x18] sm:$0xff]  ;;  %v3480_v22 = vld [vmem:[%s7153_s2] ss:$0 sm:$0xff]  ;;  %s5413_s9 = smov 96   ;;  %s5414_s10 = smov 64   ;;  %vm5624_vm2 = vmpackc.low %vm561_vm1, %vm561_vm1 }
   0xf   : > { %v4458_v5 = vpack.c.bf16 %v244_v4, %v243_v2  ;;  %s7343_s19 = smov (!%p215_p3, %s3471_s19), 1  ;;  %s5415_s11 = smov 88  }
  0x10   : > { %4455 = vmatprep.subr.bf16.mxu0 %v4454_v3  ;;  %s3644_s28 = sshll.u32 %s7343_s19, 7  ;;  %s5417_s12 = smov 120  }
  0x11   : > { %4457 = vmatpush3.bf16.msra.mxu0 %v4454_v3  ;;  %s5486_s6 = scalar_lea.vmem %s7151_s0, %s3644_s28  ;;  %s5418_s13 = smov 56  }
  0x12   : > { %4459 = vmatprep.subr.bf16.mxu0 %v4458_v5  ;;  %v225_v6 = vld [vmem:[%s5486_s6] sm:$0xff]  ;;  %v226_v7 = vld [vmem:[%s5486_s6 + $0x8] sm:$0xff]  ;;  %v227_v8 = vld [vmem:[%s5486_s6 + $0x10] sm:$0xff]  ;;  %s5419_s14 = smov 80   ;;  %s5420_s15 = smov 112  }
  0x13   : > { %3950 = vmatprep.mubr.msk.f32.mxu0 %vm252_vm0, %v225_v6  ;;  %v228_v9 = vld [vmem:[%s5486_s6 + $0x18] sm:$0xff]  ;;  %v229_v10 = vld [vmem:[%s5486_s6 + $0x20] sm:$0xff]  ;;  %v230_v11 = vld [vmem:[%s5486_s6 + $0x28] sm:$0xff]  ;;  %s5421_s16 = smov 48   ;;  %s5422_s17 = smov 72  }
  0x14   : > { %v231_v12 = vld [vmem:[%s5486_s6 + $0x30] sm:$0xff]  ;;  %v232_v13 = vld [vmem:[%s5486_s6 + $0x38] sm:$0xff]  ;;  %v233_v14 = vld [vmem:[%s5486_s6 + $0x40] sm:$0xff]  ;;  %s5423_s20 = smov 104   ;;  %s5424_s21 = smov 40  }
  0x15   : > { %4461 = vmatpush3.bf16.msra.mxu0 %v4458_v5  ;;  %v234_v15 = vld [vmem:[%s5486_s6 + $0x48] sm:$0xff]  ;;  %v235_v16 = vld [vmem:[%s5486_s6 + $0x50] sm:$0xff]  ;;  %v236_v17 = vld [vmem:[%s5486_s6 + $0x58] sm:$0xff]  ;;  %s5425_s22 = smov 8   ;;  %s5426_s23 = smov 16  }
  0x16   : > { %v237_v18 = vld [vmem:[%s5486_s6 + $0x60] sm:$0xff]  ;;  %v238_v19 = vld [vmem:[%s5486_s6 + $0x68] sm:$0xff]  ;;  %v239_v20 = vld [vmem:[%s5486_s6 + $0x70] sm:$0xff]  ;;  %s5427_s8 = smov 24  }
  0x17   : > { %v240_v21 = vld [vmem:[%s5486_s6 + $0x78] sm:$0xff] }
  0x18   : > { %3951 = vmatmul.mubr.msk.f32.vlgmr.msra.gmra.mrb[0].mxu0 %vm252_vm0, %v226_v7 }
  0x19   : > { %3953 = vmatprep.mubr.msk.f32.mxu0 %vm252_vm0, %v227_v8 }
  0x1c   : > { %3954 = vmatmul.mubr.msk.f32.gmra.mrb[2].mxu0 %vm252_vm0, %v228_v9 }
  0x1d   : > { %3956 = vmatprep.mubr.msk.f32.mxu0 %vm252_vm0, %v229_v10 }
  0x20   : > { %3957 = vmatmul.mubr.msk.f32.gmra.mrb[4].mxu0 %vm252_vm0, %v230_v11 }
  0x21   : > { %3959 = vmatprep.mubr.msk.f32.mxu0 %vm252_vm0, %v231_v12 }
  0x24   : > { %3960 = vmatmul.mubr.msk.f32.gmra.mrb[6].mxu0 %vm252_vm0, %v232_v13 }
  0x25   : > { %3962 = vmatprep.mubr.msk.f32.mxu0 %vm252_vm0, %v233_v14 }
  0x28   : > { %3963 = vmatmul.mubr.msk.f32.gmra.mrb[8].mxu0 %vm252_vm0, %v234_v15 }
  0x29   : > { %3965 = vmatprep.mubr.msk.f32.mxu0 %vm252_vm0, %v235_v16 }
  0x2c   : > { %3966 = vmatmul.mubr.msk.f32.gmra.mrb[10].mxu0 %vm252_vm0, %v236_v17 }
  0x2d   : > { %3968 = vmatprep.mubr.msk.f32.mxu0 %vm252_vm0, %v237_v18 }
  0x30   : > { %3969 = vmatmul.mubr.msk.f32.gmra.mrb[12].mxu0 %vm252_vm0, %v238_v19 }
  0x31   : > { %3971 = vmatprep.mubr.msk.f32.mxu0 %vm252_vm0, %v239_v20 }
  0x34   : > { %3972 = vmatmul.mubr.msk.f32.gmra.mrb[14].mxu0 %vm252_vm0, %v240_v21 }
  0xeb   : > { %v3952_v23 = vpop.f32.mrb[0].mxu0 }
  0xec   : > { %v5523_v24 = vadd.f32 %v3952_v23, %v3480_v22  ;;  %v367_v25 = vpop.f32.mrb[1].mxu0 }
  0xed   : > { %v368_v26 = vadd.f32 %v3480_v22, %v367_v25 }
  0xef   : > { %v5526_v27 = vpack.i.bf16 %v5523_v24, %v368_v26  ;;  %v5528_v28 = vmul.f32 0.35355338, %v368_v26  ;;  %v3955_v29 = vpop.f32.mrb[2].mxu0 }
  0xf0   : > { %v5530_v30 = vadd.f32 %v3955_v29, %v3480_v22  ;;  %v377_v31 = vpop.f32.mrb[3].mxu0 }
  0xf1   : > { %4830 = vrot.lane.b32.xlu0 %v5526_v27, %s5413_s9  ;;  %4006 = vmatprep.mubr.msk.f32.mxu1 %vm561_vm1, %v5528_v28  ;;  %v5536_v32 = vadd.f32 %v3480_v22, %v377_v31 }
  0xf3   : > { %v5540_v33 = vpack.i.bf16 %v5530_v30, %v5536_v32  ;;  %v3958_v34 = vpop.f32.mrb[4].mxu0 }
  0xf4   : > { %v5542_v35 = vadd.f32 %v3958_v34, %v3480_v22  ;;  %v387_v36 = vpop.f32.mrb[5].mxu0 }
  0xf5   : > { %7196 = vst [vmem:[#allocation2_spill] sm:$0xff] %v5540_v33  ;;  %4835 = vrot.lane.b32.xlu0 %v5540_v33, %s5413_s9  ;;  %v5546_v37 = vadd.f32 %v3480_v22, %v387_v36 }
  0xf7   : > { %v3961_v38 = vpop.f32.mrb[6].mxu0  ;;  %v5550_v39 = vpack.i.bf16 %v5542_v35, %v5546_v37 }
  0xf8   : > { %v5552_v40 = vadd.f32 %v3961_v38, %v3480_v22  ;;  %v397_v41 = vpop.f32.mrb[7].mxu0 }
  0xf9   : > { %v5554_v42 = vadd.f32 %v3480_v22, %v397_v41  ;;  %4840 = vrot.lane.b32.xlu1 %v5550_v39, %s5413_s9 }
  0xfb   : > { %v3964_v43 = vpop.f32.mrb[8].mxu0  ;;  %v5560_v44 = vpack.i.bf16 %v5552_v40, %v5554_v42 }
  0xfc   : > { %v5562_v45 = vadd.f32 %v3964_v43, %v3480_v22  ;;  %v407_v46 = vpop.f32.mrb[9].mxu0 }
  0xfd   : > { %7197 = vst [vmem:[#allocation3_spill] sm:$0xff] %v5560_v44  ;;  %v5564_v47 = vadd.f32 %v3480_v22, %v407_v46  ;;  %4845 = vrot.lane.b32.xlu1 %v5560_v44, %s5413_s9 }
  0xff   : > { %v3967_v48 = vpop.f32.mrb[10].mxu0  ;;  %v5570_v49 = vpack.i.bf16 %v5562_v45, %v5564_v47 }
 0x100   : > { %v5572_v50 = vadd.f32 %v3967_v48, %v3480_v22  ;;  %v417_v51 = vpop.f32.mrb[11].mxu0 }
 0x101   : > { %7198 = vst [vmem:[#allocation4_spill] sm:$0xff] %v5570_v49  ;;  %v5574_v52 = vadd.f32 %v3480_v22, %v417_v51  ;;  %4850 = vrot.lane.b32.xlu0 %v5570_v49, %s5413_s9 }
 0x103   : > { %v3970_v53 = vpop.f32.mrb[12].mxu0  ;;  %v5580_v54 = vpack.i.bf16 %v5572_v50, %v5574_v52 }
 0x104   : > { %v5582_v55 = vadd.f32 %v3970_v53, %v3480_v22  ;;  %v427_v56 = vpop.f32.mrb[13].mxu0 }
 0x105   : > { %v5584_v57 = vadd.f32 %v3480_v22, %v427_v56  ;;  %4855 = vrot.lane.b32.xlu1 %v5580_v54, %s5413_s9 }
 0x107   : > { %v3973_v58 = vpop.f32.mrb[14].mxu0  ;;  %v5590_v59 = vpack.i.bf16 %v5582_v55, %v5584_v57 }
 0x108   : > { %v5592_v60 = vadd.f32 %v3973_v58, %v3480_v22  ;;  %v437_v61 = vpop.f32.mrb[15].mxu0 }
 0x109   : > { %v5594_v62 = vadd.f32 %v3480_v22, %v437_v61  ;;  %4860 = vrot.lane.b32.xlu0 %v5590_v59, %s5413_s9 }
 0x10b   : > { %v5600_v63 = vpack.i.bf16 %v5592_v60, %v5594_v62 }
 0x10d   : > { %4865 = vrot.lane.b32.xlu1 %v5600_v63, %s5413_s9  ;;  %4870 = vrot.lane.b32.xlu0 %v5526_v27, %s5414_s10 }
 0x111   : > { %4875 = vrot.lane.b32.xlu1 %v5540_v33, %s5414_s10  ;;  %4880 = vrot.lane.b32.xlu0 %v5550_v39, %s5414_s10 }
 0x115   : > { %4890 = vrot.lane.b32.xlu1 %v5570_v49, %s5414_s10  ;;  %4885 = vrot.lane.b32.xlu0 %v5560_v44, %s5414_s10 }
 0x119   : > { %4895 = vrot.lane.b32.xlu1 %v5580_v54, %s5414_s10  ;;  %4900 = vrot.lane.b32.xlu0 %v5590_v59, %s5414_s10 }
 0x11d   : > { %4920 = vrot.lane.b32.xlu1 %v5560_v44, %s5415_s11  ;;  %4905 = vrot.lane.b32.xlu0 %v5526_v27, %s5415_s11 }
 0x121   : > { %4910 = vrot.lane.b32.xlu0 %v5540_v33, %s5415_s11  ;;  %4930 = vrot.lane.b32.xlu1 %v5600_v63, %s5414_s10 }
 0x125   : > { %4915 = vrot.lane.b32.xlu0 %v5550_v39, %s5415_s11 }
 0x129   : > { %4925 = vrot.lane.b32.xlu0 %v5570_v49, %s5415_s11 }
 0x163   : > { %v4831_v0 = vpop.permute.xlu0 %4830 }
 0x164   : > { %v4833_v1 = vunpack.i.h.bf16 %v4831_v0  ;;  %v4832_v2 = vunpack.i.l.bf16 %v4831_v0 }
 0x166   : > { %v4462_v4 = vpack.c.bf16 %v4833_v1, %v4832_v2 }
 0x167   : > { %v4836_v5 = vpop.permute.xlu0 %4835 }
 0x168   : > { %4464 = vmatprep.subr.msk.bf16.mxu1 %vm5624_vm2, %v4462_v4  ;;  %v4838_v6 = vunpack.i.h.bf16 %v4836_v5  ;;  %v4837_v7 = vunpack.i.l.bf16 %v4836_v5 }
 0x169   : > { %4467 = vmatpush3.bf16.xpose.msk.msra.mxu1 %vm5624_vm2, %v4462_v4 }
 0x16a   : > { %v4468_v8 = vpack.c.bf16 %v4838_v6, %v4837_v7 }
 0x16b   : > { %v4841_v9 = vpop.permute.xlu1 %4840 }
 0x16c   : > { %4470 = vmatprep.subr.msk.bf16.mxu1 %vm5624_vm2, %v4468_v8  ;;  %v4843_v10 = vunpack.i.h.bf16 %v4841_v9  ;;  %v4842_v11 = vunpack.i.l.bf16 %v4841_v9 }
 0x16e   : > { %v4474_v12 = vpack.c.bf16 %v4843_v10, %v4842_v11 }
 0x16f   : > { %v4846_v13 = vpop.permute.xlu1 %4845 }
 0x170   : > { %v4848_v14 = vunpack.i.h.bf16 %v4846_v13  ;;  %v4847_v15 = vunpack.i.l.bf16 %v4846_v13 }
 0x171   : > { %4473 = vmatpush3.bf16.xpose.msk.msra.mxu1 %vm5624_vm2, %v4468_v8 }
 0x172   : > { %4476 = vmatprep.subr.msk.bf16.mxu1 %vm5624_vm2, %v4474_v12  ;;  %v4480_v17 = vpack.c.bf16 %v4848_v14, %v4847_v15 }
 0x173   : > { %v4851_v16 = vpop.permute.xlu0 %4850 }
 0x174   : > { %v4853_v19 = vunpack.i.h.bf16 %v4851_v16  ;;  %v4852_v20 = vunpack.i.l.bf16 %v4851_v16 }
 0x176   : > { %v4486_v22 = vpack.c.bf16 %v4853_v19, %v4852_v20 }
 0x177   : > { %v4856_v18 = vpop.permute.xlu1 %4855 }
 0x178   : > { %v4858_v31 = vunpack.i.h.bf16 %v4856_v18  ;;  %v4857_v34 = vunpack.i.l.bf16 %v4856_v18 }
 0x179   : > { %4479 = vmatpush3.bf16.xpose.msk.msra.mxu1 %vm5624_vm2, %v4474_v12 }
 0x17a   : > { %4482 = vmatprep.subr.msk.bf16.mxu1 %vm5624_vm2, %v4480_v17  ;;  %v4492_v53 = vpack.c.bf16 %v4858_v31, %v4857_v34 }
 0x17b   : > { %v4861_v21 = vpop.permute.xlu0 %4860 }
 0x17c   : > { %v4863_v4 = vunpack.i.h.bf16 %v4861_v21  ;;  %v4862_v5 = vunpack.i.l.bf16 %v4861_v21 }
 0x17e   : > { %v4498_v10 = vpack.c.bf16 %v4863_v4, %v4862_v5 }
 0x17f   : > { %v4866_v23 = vpop.permute.xlu1 %4865  ;;  %v4871_v25 = vpop.permute.xlu0 %4870 }
 0x180   : > { %v4873_v26 = vunpack.i.h.bf16 %v4871_v25  ;;  %v4872_v29 = vunpack.i.l.bf16 %v4871_v25  ;;  %v4868_v15 = vunpack.i.h.bf16 %v4866_v23  ;;  %v4867_v16 = vunpack.i.l.bf16 %v4866_v23 }
 0x181   : > { %4485 = vmatpush3.bf16.xpose.msk.msra.mxu1 %vm5624_vm2, %v4480_v17 }
 0x182   : > { %v4510_v36 = vpack.c.bf16 %v4873_v26, %v4872_v29  ;;  %4488 = vmatprep.subr.msk.bf16.mxu1 %vm5624_vm2, %v4486_v22 }
 0x183   : > { %v4876_v38 = vpop.permute.xlu1 %4875  ;;  %v4881_v41 = vpop.permute.xlu0 %4880 }
 0x184   : > { %v4878_v43 = vunpack.i.h.bf16 %v4876_v38  ;;  %v4877_v46 = vunpack.i.l.bf16 %v4876_v38  ;;  %v4883_v48 = vunpack.i.h.bf16 %v4881_v41  ;;  %v4882_v51 = vunpack.i.l.bf16 %v4881_v41  ;;  %4511 = vmatprep.subr.bf16.mxu0 %v4510_v36 }
 0x185   : > { %4513 = vmatpush3.bf16.msra.mxu0 %v4510_v36  ;;  %v5668_v41 = vmul.f32 0.35355338, %v5523_v24  ;;  %v5688_v24 = vmul.f32 0.35355338, %v5542_v35  ;;  %v5708_v35 = vmul.f32 0.35355338, %v5562_v45 }
 0x186   : > { %v4514_v56 = vpack.c.bf16 %v4878_v43, %v4877_v46  ;;  %v4518_v2 = vpack.c.bf16 %v4883_v48, %v4882_v51  ;;  %v5671_v43 = vmul.f32 0.35355338, %v5536_v32  ;;  %v5678_v46 = vmul.f32 0.35355338, %v5530_v30 }
 0x187   : > { %v4891_v58 = vpop.permute.xlu1 %4890  ;;  %v4886_v61 = vpop.permute.xlu0 %4885  ;;  %v5681_v48 = vmul.f32 0.35355338, %v5546_v37  ;;  %v5691_v32 = vmul.f32 0.35355338, %v5554_v42  ;;  %v5698_v30 = vmul.f32 0.35355338, %v5552_v40 }
 0x188   : > { %v4888_v0 = vunpack.i.h.bf16 %v4886_v61  ;;  %v4887_v1 = vunpack.i.l.bf16 %v4886_v61  ;;  %4515 = vmatprep.subr.bf16.mxu0 %v4514_v56  ;;  %v4893_v7 = vunpack.i.h.bf16 %v4891_v58  ;;  %v4892_v8 = vunpack.i.l.bf16 %v4891_v58 }
 0x189   : > { %4491 = vmatpush3.bf16.xpose.msk.msra.mxu1 %vm5624_vm2, %v4486_v22  ;;  %4517 = vmatpush3.bf16.msra.mxu0 %v4514_v56  ;;  %v4504_v22 = vpack.c.bf16 %v4868_v15, %v4867_v16  ;;  %v5701_v37 = vmul.f32 0.35355338, %v5564_v47  ;;  %v5711_v42 = vmul.f32 0.35355338, %v5574_v52  ;;  %v5718_v40 = vmul.f32 0.35355338, %v5572_v50 }
 0x18a   : > { %4519 = vmatprep.subr.bf16.mxu0 %v4518_v2  ;;  %4494 = vmatprep.subr.msk.bf16.mxu1 %vm5624_vm2, %v4492_v53  ;;  %v4522_v9 = vpack.c.bf16 %v4888_v0, %v4887_v1  ;;  %v4526_v14 = vpack.c.bf16 %v4893_v7, %v4892_v8  ;;  %v5721_v47 = vmul.f32 0.35355338, %v5584_v57  ;;  %v5728_v45 = vmul.f32 0.35355338, %v5582_v55 }
 0x18b   : > { %v4896_v6 = vpop.permute.xlu1 %4895  ;;  %v4901_v17 = vpop.permute.xlu0 %4900  ;;  %7201 = vst [vmem:[#allocation5_spill] sm:$0xff] %v5718_v40  ;;  %v5731_v52 = vmul.f32 0.35355338, %v5594_v62  ;;  %v5738_v50 = vmul.f32 0.35355338, %v5592_v60  ;;  %v446_v57 = vlaneseq }
 0x18c   : > { %v4898_v12 = vunpack.i.h.bf16 %v4896_v6  ;;  %v4897_v13 = vunpack.i.l.bf16 %v4896_v6  ;;  %v4903_v19 = vunpack.i.h.bf16 %v4901_v17  ;;  %v4902_v20 = vunpack.i.l.bf16 %v4901_v17  ;;  %7202 = vst [vmem:[#allocation6_spill] sm:$0xff] %v5728_v45 }
 0x18d   : > { %4521 = vmatpush3.bf16.msra.mxu0 %v4518_v2  ;;  %7203 = vst [vmem:[#allocation7_spill] sm:$0xff] %v5731_v52  ;;  %7204 = vst [vmem:[#allocation8_spill] sm:$0xff] %v5738_v50  ;;  %v5742_v51 = vshrl.u32 %v446_v57, 7  ;;  %v5416_v62 = vmov -1e+30  }
 0x18e   : > { %4523 = vmatprep.subr.bf16.mxu0 %v4522_v9  ;;  %v4530_v21 = vpack.c.bf16 %v4898_v12, %v4897_v13  ;;  %v4534_v29 = vpack.c.bf16 %v4903_v19, %v4902_v20 }
 0x18f   : > { %v5650_v11 = vpop.permute.xlu1 %4920  ;;  %v4906_v31 = vpop.permute.xlu0 %4905  ;;  %v448_v55 = vadd.s32 8, %v5742_v51  ;;  %v449_v19 = vadd.s32 16, %v5742_v51  ;;  %v452_v20 = vadd.s32 40, %v5742_v51 }
 0x190   : > { %v4908_v34 = vunpack.i.h.bf16 %v4906_v31  ;;  %v4907_v36 = vunpack.i.l.bf16 %v4906_v31 }
 0x191   : > { %4497 = vmatpush3.bf16.xpose.msk.msra.mxu1 %vm5624_vm2, %v4492_v53  ;;  %4525 = vmatpush3.bf16.msra.mxu0 %v4522_v9  ;;  %v5745_v53 = vand.u32 127, %v446_v57  ;;  %v460_v57 = vadd.s32 104, %v5742_v51 }
 0x192   : > { %4527 = vmatprep.subr.bf16.mxu0 %v4526_v14  ;;  %4500 = vmatprep.subr.msk.bf16.mxu1 %vm5624_vm2, %v4498_v10  ;;  %v5660_v38 = vpack.c.bf16 %v4908_v34, %v4907_v36 }
 0x193   : > { %v4931_v18 = vpop.permute.xlu1 %4930  ;;  %vm466_vm3 = vcmp.le.s32.totalorder %v5745_v53, %v448_v55  ;;  %vm465_vm4 = vcmp.le.s32.totalorder %v5745_v53, %v5742_v51  ;;  %vm467_vm6 = vcmp.le.s32.totalorder %v5745_v53, %v449_v19  ;;  %vm470_vm7 = vcmp.le.s32.totalorder %v5745_v53, %v452_v20 }
 0x194   : > { %v4933_v25 = vunpack.i.h.bf16 %v4931_v18  ;;  %v4932_v26 = vunpack.i.l.bf16 %v4931_v18  ;;  %v5751_v56 = vsel %vm466_vm3, 0.0, %v5416_v62  ;;  %v5754_v60 = vsel %vm465_vm4, 0.0, %v5416_v62 }
 0x195   : > { %4529 = vmatpush3.bf16.msra.mxu0 %v4526_v14  ;;  %v450_v18 = vadd.s32 24, %v5742_v51  ;;  %v5799_v34 = vsel %vm470_vm7, 0.0, %v5416_v62  ;;  %v453_v55 = vadd.s32 48, %v5742_v51  ;;  %vm478_vm11 = vcmp.le.s32.totalorder %v5745_v53, %v460_v57 }
 0x196   : > { %4531 = vmatprep.subr.bf16.mxu0 %v4530_v21  ;;  %v4538_v23 = vpack.c.bf16 %v4933_v25, %v4932_v26  ;;  %v5786_v25 = vsel %vm467_vm6, 0.0, %v5416_v62  ;;  %v458_v26 = vadd.s32 88, %v5742_v51  ;;  %v5835_v20 = vsel %vm478_vm11, 0.0, %v5416_v62 }
 0x197   : > { %vm468_vm5 = vcmp.le.s32.totalorder %v5745_v53, %v450_v18  ;;  %v461_v18 = vadd.s32 112, %v5742_v51  ;;  %vm471_vm12 = vcmp.le.s32.totalorder %v5745_v53, %v453_v55  ;;  %v457_v55 = vadd.s32 80, %v5742_v51 }
 0x198   : > { %vm476_vm9 = vcmp.le.s32.totalorder %v5745_v53, %v458_v26  ;;  %v455_v26 = vadd.s32 64, %v5742_v51  ;;  %vm3179_vm6 = vcmask 195584  }
 0x199   : > { %4503 = vmatpush3.bf16.xpose.msk.msra.mxu1 %vm5624_vm2, %v4498_v10  ;;  %4533 = vmatpush3.bf16.msra.mxu0 %v4530_v21  ;;  %v451_v21 = vadd.s32 32, %v5742_v51  ;;  %vm479_vm13 = vcmp.le.s32.totalorder %v5745_v53, %v461_v18  ;;  %vm475_vm3 = vcmp.le.s32.totalorder %v5745_v53, %v457_v55 }
 0x19a   : > { %4535 = vmatprep.subr.bf16.mxu0 %v4534_v29  ;;  %4506 = vmatprep.subr.msk.bf16.mxu1 %vm5624_vm2, %v4504_v22  ;;  %vm473_vm15 = vcmp.le.s32.totalorder %v5745_v53, %v455_v26 }
 0x19b   : > { %vm469_vm8 = vcmp.le.s32.totalorder %v5745_v53, %v451_v21  ;;  %v5838_v21 = vsel %vm471_vm12, 0.0, %v5416_v62  ;;  %v5868_v18 = vsel %vm473_vm15, 0.0, %v5416_v62 }
 0x19c   : > { %v5802_v36 = vsel %vm469_vm8, 0.0, %v5416_v62 }
 0x19d   : > { %4537 = vmatpush3.bf16.msra.mxu0 %v4534_v29  ;;  %v454_v29 = vadd.s32 56, %v5742_v51 }
 0x19e   : > { %4539 = vmatprep.subr.bf16.mxu0 %v4538_v23 }
 0x19f   : > { %vm472_vm10 = vcmp.le.s32.totalorder %v5745_v53, %v454_v29  ;;  %v5852_v29 = vsel %vm479_vm13, 0.0, %v5416_v62 }
 0x1a1   : > { %4509 = vmatpush3.bf16.xpose.msk.msra.mxu1 %vm5624_vm2, %v4504_v22  ;;  %4541 = vmatpush3.bf16.msra.mxu0 %v4538_v23  ;;  %v5783_v22 = vsel %vm468_vm5, 0.0, %v5416_v62 }
 0x1a2   : > { %4544 = vmatprep.subr.msk.bf16.mxu0 %vm5624_vm2, %v5660_v38 }
 0x1a8   : > { %4007 = vmatmul.mubr.msk.f32.vlgmr.msra.gmra.mrb[0].mxu1 %vm561_vm1, %v5668_v41 }
 0x1a9   : > { %4009 = vmatprep.mubr.msk.f32.mxu1 %vm561_vm1, %v5671_v43 }
 0x1ac   : > { %4010 = vmatmul.mubr.msk.f32.gmra.mrb[2].mxu1 %vm561_vm1, %v5678_v46 }
 0x1ad   : > { %4012 = vmatprep.mubr.msk.f32.mxu1 %vm561_vm1, %v5681_v48 }
 0x1b0   : > { %4013 = vmatmul.mubr.msk.f32.gmra.mrb[4].mxu1 %vm561_vm1, %v5688_v24 }
 0x1b1   : > { %4015 = vmatprep.mubr.msk.f32.mxu1 %vm561_vm1, %v5691_v32 }
 0x1b4   : > { %4016 = vmatmul.mubr.msk.f32.gmra.mrb[6].mxu1 %vm561_vm1, %v5698_v30 }
 0x1b5   : > { %4018 = vmatprep.mubr.msk.f32.mxu1 %vm561_vm1, %v5701_v37 }
 0x1b8   : > { %4019 = vmatmul.mubr.msk.f32.gmra.mrb[8].mxu1 %vm561_vm1, %v5708_v35 }
 0x1b9   : > { %4021 = vmatprep.mubr.msk.f32.mxu1 %vm561_vm1, %v5711_v42 }
 0x1bc   : > { %4022 = vmatmul.mubr.msk.f32.gmra.mrb[10].mxu1 %vm561_vm1, %v5718_v40 }
 0x1bd   : > { %4024 = vmatprep.mubr.msk.f32.mxu1 %vm561_vm1, %v5721_v47 }
 0x1c0   : > { %4025 = vmatmul.mubr.msk.f32.gmra.mrb[12].mxu1 %vm561_vm1, %v5728_v45 }
 0x1c1   : > { %4027 = vmatprep.mubr.msk.f32.mxu1 %vm561_vm1, %v5731_v52 }
 0x1c4   : > { %4028 = vmatmul.mubr.msk.f32.gmra.mrb[14].mxu1 %vm561_vm1, %v5738_v50 }
 0x27b   : > { %v4008_v58 = vpop.f32.mrb[0].mxu1 }
 0x27c   : > { %v5757_v61 = vadd.f32 %v4008_v58, %v5751_v56  ;;  %v708_v0 = vpop.f32.mrb[1].mxu1 }
 0x27d   : > { %v5760_v1 = vadd.f32 %v708_v0, %v5754_v60 }
 0x27e   : > { %789 = vmax.xlane.f32.xlu0 %v5757_v61 }
 0x27f   : > { %v4011_v2 = vpop.f32.mrb[2].mxu1  ;;  %787 = vmax.xlane.f32.xlu1 %v5760_v1 }
 0x280   : > { %v718_v4 = vpop.f32.mrb[3].mxu1  ;;  %v5793_v31 = vadd.f32 %v4011_v2, %v5783_v22  ;;  %v5817_v2 = vsel %vm476_vm9, 0.0, %v5416_v62 }
 0x281   : > { %v5796_v23 = vadd.f32 %v718_v4, %v5786_v25  ;;  %v5820_v4 = vsel %vm472_vm10, 0.0, %v5416_v62 }
 0x283   : > { %v4014_v5 = vpop.f32.mrb[4].mxu1 }
 0x284   : > { %v728_v6 = vpop.f32.mrb[5].mxu1  ;;  %v5811_v58 = vadd.f32 %v4014_v5, %v5799_v34  ;;  %v456_v5 = vadd.s32 72, %v5742_v51 }
 0x285   : > { %v5814_v0 = vadd.f32 %v728_v6, %v5802_v36 }
 0x286   : > { %vm474_vm14 = vcmp.le.s32.totalorder %v5745_v53, %v456_v5  ;;  %v459_v5 = vadd.s32 96, %v5742_v51 }
 0x287   : > { %v4017_v7 = vpop.f32.mrb[6].mxu1  ;;  %v5855_v57 = vsel %vm474_vm14, 0.0, %v5416_v62 }
 0x288   : > { %v738_v8 = vpop.f32.mrb[7].mxu1  ;;  %v5832_v19 = vadd.f32 %v4017_v7, %v5820_v4  ;;  %7205 = vst [vmem:[#allocation9_spill] sm:$0xff] %v5855_v57  ;;  %vm477_vm4 = vcmp.le.s32.totalorder %v5745_v53, %v459_v5 }
 0x289   : > { %v5849_v7 = vadd.f32 %v738_v8, %v5838_v21 }
 0x28b   : > { %v4020_v9 = vpop.f32.mrb[8].mxu1 }
 0x28c   : > { %v5764_v10 = vpop.f32.mrb[9].mxu1  ;;  %v5865_v8 = vadd.f32 %v4020_v9, %v5855_v57  ;;  %v462_v9 = vadd.s32 120, %v5742_v51  ;;  %v5889_v57 = vsel %vm477_vm4, 0.0, %v5416_v62 }
 0x28d   : > { %v5876_v26 = vadd.f32 %v5764_v10, %v5868_v18 }
 0x28e   : > { %vm480_vm5 = vcmp.le.s32.totalorder %v5745_v53, %v462_v9  ;;  %v4911_v53 = vpop.permute.xlu0 %4910 }
 0x28f   : > { %v4023_v12 = vpop.f32.mrb[10].mxu1  ;;  %v5898_v5 = vsel %vm480_vm5, 0.0, %v5416_v62 }
 0x290   : > { %v5766_v13 = vpop.f32.mrb[11].mxu1  ;;  %4935 = vrot.lane.b32.xlu1 %v5580_v54, %s5415_s11  ;;  %v5829_v6 = vadd.f32 %v4023_v12, %v5817_v2 }
 0x293   : > { %v4026_v14 = vpop.f32.mrb[12].mxu1 }
 0x294   : > { %4940 = vrot.lane.b32.xlu0 %v5590_v59, %s5415_s11  ;;  %v5772_v15 = vpop.f32.mrb[13].mxu1  ;;  %v5846_v12 = vadd.f32 %v4026_v14, %v5835_v20 }
 0x295   : > { %v5895_v10 = vadd.f32 %v5772_v15, %v5889_v57 }
 0x297   : > { %v5774_v16 = vpop.f32.mrb[14].mxu1 }
 0x298   : > { %v778_v17 = vpop.f32.mrb[15].mxu1  ;;  %v5903_v51 = vadd.f32 %v5774_v16, %v5898_v5 }
 0x299   : > { %v5862_v14 = vadd.f32 %v778_v17, %v5852_v29  ;;  %v5879_v17 = vsel %vm475_vm3, 0.0, %v5416_v62  ;;  %v4916_v62 = vpop.permute.xlu0 %4915 }
 0x29a   : > { %v5886_v55 = vadd.f32 %v5766_v13, %v5879_v17 }
 0x29d   : > { %v4926_v13 = vpop.permute.xlu0 %4925 }
 0x2b3   : > { %793 = vmax.xlane.f32.xlu0 %v5793_v31 }
 0x2b4   : > { %791 = vmax.xlane.f32.xlu1 %v5796_v23 }
 0x2b7   : > { %797 = vmax.xlane.f32.xlu0 %v5811_v58 }
 0x2b8   : > { %795 = vmax.xlane.f32.xlu1 %v5814_v0 }
 0x2bb   : > { %809 = vmax.xlane.f32.xlu0 %v5829_v6 }
 0x2bc   : > { %801 = vmax.xlane.f32.xlu1 %v5832_v19 }
 0x2bf   : > { %813 = vmax.xlane.f32.xlu0 %v5846_v12 }
 0x2c0   : > { %799 = vmax.xlane.f32.xlu1 %v5849_v7 }
 0x2c3   : > { %815 = vmax.xlane.f32.xlu0 %v5862_v14 }
 0x2c4   : > { %805 = vmax.xlane.f32.xlu1 %v5865_v8 }
 0x2c8   : > { %803 = vmax.xlane.f32.xlu1 %v5876_v26 }
 0x2cc   : > { %807 = vmax.xlane.f32.xlu1 %v5886_v55 }
 0x2d0   : > { %811 = vmax.xlane.f32.xlu1 %v5895_v10 }
 0x2d4   : > { %817 = vmax.xlane.f32.xlu1 %v5903_v51 }
 0x2d9   : > { %4945 = vrot.lane.b32.xlu0 %v5600_v63, %s5415_s11 }
 0x2dd   : > { %1124 = vrot.lane.b32.xlu0 %v5528_v28, %s5417_s12 }
 0x2e1   : > { %1128 = vrot.lane.b32.xlu0 %v5671_v43, %s5417_s12 }
 0x2e5   : > { %1132 = vrot.lane.b32.xlu0 %v5681_v48, %s5417_s12  ;;  %1126 = vrot.lane.b32.xlu1 %v5668_v41, %s5417_s12 }
 0x2e9   : > { %1136 = vrot.lane.b32.xlu0 %v5691_v32, %s5417_s12  ;;  %1130 = vrot.lane.b32.xlu1 %v5678_v46, %s5417_s12 }
 0x2ed   : > { %1140 = vrot.lane.b32.xlu0 %v5701_v37, %s5417_s12  ;;  %1134 = vrot.lane.b32.xlu1 %v5688_v24, %s5417_s12 }
 0x2f1   : > { %1144 = vrot.lane.b32.xlu0 %v5711_v42, %s5417_s12  ;;  %1138 = vrot.lane.b32.xlu1 %v5698_v30, %s5417_s12 }
 0x2f5   : > { %1148 = vrot.lane.b32.xlu0 %v5721_v47, %s5417_s12  ;;  %1142 = vrot.lane.b32.xlu1 %v5708_v35, %s5417_s12 }
 0x2f9   : > { %1152 = vrot.lane.b32.xlu0 %v5731_v52, %s5417_s12  ;;  %1146 = vrot.lane.b32.xlu1 %v5718_v40, %s5417_s12 }
 0x2fd   : > { %4950 = vrot.lane.b32.xlu0 %v5526_v27, %s5418_s13  ;;  %1150 = vrot.lane.b32.xlu1 %v5728_v45, %s5417_s12 }
 0x301   : > { %4960 = vrot.lane.b32.xlu0 %v5550_v39, %s5418_s13  ;;  %1154 = vrot.lane.b32.xlu1 %v5738_v50, %s5417_s12 }
 0x305   : > { %4965 = vrot.lane.b32.xlu0 %v5560_v44, %s5418_s13  ;;  %4955 = vrot.lane.b32.xlu1 %v5540_v33, %s5418_s13 }
 0x309   : > { %4980 = vrot.lane.b32.xlu0 %v5590_v59, %s5418_s13  ;;  %4970 = vrot.lane.b32.xlu1 %v5570_v49, %s5418_s13 }
 0x30b   : > { %v790_v15 = vpop.xlane.xlu0 %789 }
 0x30c   : > { %v820_v16 = vsub.f32 %v5757_v61, %v790_v15  ;;  %v788_v9 = vpop.xlane.xlu1 %787  ;;  %v4913_v61 = vunpack.i.h.bf16 %v4911_v53 }
 0x30d   : > { %v819_v45 = vsub.f32 %v5760_v1, %v788_v9  ;;  %4990 = vrot.lane.b32.xlu0 %v5526_v27, %s5419_s14  ;;  %4975 = vrot.lane.b32.xlu1 %v5580_v54, %s5418_s13  ;;  %v4912_v1 = vunpack.i.l.bf16 %v4911_v53  ;;  %v4917_v53 = vunpack.i.l.bf16 %v4916_v62  ;;  %v4923_v9 = vunpack.i.h.bf16 %v5650_v11 }
 0x30e   : > { %v837_v50 = vmul.f32 1.442695, %v820_v16 }
 0x30f   : > { %v835_v40 = vmul.f32 1.442695, %v819_v45  ;;  %v4548_v45 = vpack.c.bf16 %v4913_v61, %v4912_v1  ;;  %v4922_v61 = vunpack.i.l.bf16 %v5650_v11  ;;  %v4941_v11 = vpop.permute.xlu0 %4940 }
 0x311   : > { %5149 = vpow2.f32 %v835_v40  ;;  %4995 = vrot.lane.b32.xlu0 %v5540_v33, %s5419_s14  ;;  %4985 = vrot.lane.b32.xlu1 %v5600_v63, %s5418_s13  ;;  %v4560_v1 = vpack.c.bf16 %v4923_v9, %v4922_v61  ;;  %v4942_v61 = vunpack.i.l.bf16 %v4941_v11  ;;  %s7114_s13 = scalar_lea.vmem %s7156_s5, %s3644_s28 }
 0x312   : > { %5151 = vpow2.f32 %v837_v50  ;;  %v4918_v50 = vunpack.i.h.bf16 %v4916_v62  ;;  %v4927_v62 = vunpack.i.l.bf16 %v4926_v13 }
 0x314   : > { %v4554_v16 = vpack.c.bf16 %v4918_v50, %v4917_v53  ;;  %v4936_v53 = vpop.permute.xlu1 %4935 }
 0x315   : > { %5000 = vrot.lane.b32.xlu0 %v5550_v39, %s5419_s14  ;;  %5005 = vrot.lane.b32.xlu1 %v5560_v44, %s5419_s14 }
 0x319   : > { %5010 = vrot.lane.b32.xlu0 %v5570_v49, %s5419_s14 }
 0x31b   : > { %v5944_v15 = vpop.eup %5149 }
 0x31c   : > { %7206 = vst [vmem:[#allocation10_spill] sm:$0xff] %v5944_v15  ;;  %v5946_v40 = vpop.eup %5151  ;;  %4062 = vmatprep.mubr.f32.mxu0 %v5944_v15  ;;  %v4937_v15 = vunpack.i.l.bf16 %v4936_v53 }
 0x31d   : > { %7207 = vst [vmem:[#allocation11_spill] sm:$0xff] %v5946_v40  ;;  %4063 = vmatmul.mubr.f32.vlgmr.msra.gmra.mrb[16].mxu0 %v5946_v40 }
 0x31e   : > { %4547 = vmatpush3.bf16.xpose.msk.msra.mxu0 %vm5624_vm2, %v5660_v38  ;;  %v4928_v38 = vunpack.i.h.bf16 %v4926_v13  ;;  %v4943_v13 = vunpack.i.h.bf16 %v4941_v11 }
 0x31f   : > { %4550 = vmatprep.subr.msk.bf16.mxu0 %vm5624_vm2, %v4548_v45 }
 0x320   : > { %v4566_v50 = vpack.c.bf16 %v4928_v38, %v4927_v62 }
 0x326   : > { %4553 = vmatpush3.bf16.xpose.msk.msra.mxu0 %vm5624_vm2, %v4548_v45  ;;  %v4938_v45 = vunpack.i.h.bf16 %v4936_v53  ;;  %v4578_v53 = vpack.c.bf16 %v4943_v13, %v4942_v61 }
 0x327   : > { %4556 = vmatprep.subr.msk.bf16.mxu0 %vm5624_vm2, %v4554_v16 }
 0x328   : > { %v4572_v9 = vpack.c.bf16 %v4938_v45, %v4937_v15 }
 0x32e   : > { %4559 = vmatpush3.bf16.xpose.msk.msra.mxu0 %vm5624_vm2, %v4554_v16 }
 0x32f   : > { %4562 = vmatprep.subr.msk.bf16.mxu0 %vm5624_vm2, %v4560_v1 }
 0x336   : > { %4565 = vmatpush3.bf16.xpose.msk.msra.mxu0 %vm5624_vm2, %v4560_v1 }
 0x337   : > { %4568 = vmatprep.subr.msk.bf16.mxu0 %vm5624_vm2, %v4566_v50 }
 0x33e   : > { %4571 = vmatpush3.bf16.xpose.msk.msra.mxu0 %vm5624_vm2, %v4566_v50 }
 0x33f   : > { %4574 = vmatprep.subr.msk.bf16.mxu0 %vm5624_vm2, %v4572_v9 }
 0x340   : > { %v794_v16 = vpop.xlane.xlu0 %793 }
 0x341   : > { %v822_v38 = vsub.f32 %v5793_v31, %v794_v16  ;;  %v792_v62 = vpop.xlane.xlu1 %791 }
 0x342   : > { %v821_v1 = vsub.f32 %v5796_v23, %v792_v62 }
 0x343   : > { %v841_v40 = vmul.f32 1.442695, %v822_v38 }
 0x344   : > { %v839_v49 = vmul.f32 1.442695, %v821_v1  ;;  %v798_v33 = vpop.xlane.xlu0 %797 }
 0x345   : > { %v824_v15 = vsub.f32 %v5811_v58, %v798_v33  ;;  %v796_v45 = vpop.xlane.xlu1 %795 }
 0x346   : > { %5153 = vpow2.f32 %v839_v49  ;;  %v823_v50 = vsub.f32 %v5814_v0, %v796_v45  ;;  %4577 = vmatpush3.bf16.xpose.msk.msra.mxu0 %vm5624_vm2, %v4572_v9 }
 0x347   : > { %5155 = vpow2.f32 %v841_v40  ;;  %v845_v11 = vmul.f32 1.442695, %v824_v15  ;;  %4580 = vmatprep.subr.msk.bf16.mxu0 %vm5624_vm2, %v4578_v53 }
 0x348   : > { %v843_v31 = vmul.f32 1.442695, %v823_v50  ;;  %v810_v23 = vpop.xlane.xlu0 %809 }
 0x349   : > { %v802_v16 = vpop.xlane.xlu1 %801 }
 0x34a   : > { %5157 = vpow2.f32 %v843_v31  ;;  %v826_v13 = vsub.f32 %v5832_v19, %v802_v16  ;;  %v830_v31 = vsub.f32 %v5829_v6, %v810_v23 }
 0x34b   : > { %5159 = vpow2.f32 %v845_v11 }
 0x34c   : > { %v814_v33 = vpop.xlane.xlu0 %813  ;;  %v849_v0 = vmul.f32 1.442695, %v826_v13 }
 0x34d   : > { %v800_v58 = vpop.xlane.xlu1 %799 }
 0x34e   : > { %v825_v49 = vsub.f32 %v5849_v7, %v800_v58  ;;  %4583 = vmatpush3.bf16.xpose.msk.msra.mxu0 %vm5624_vm2, %v4578_v53 }
 0x350   : > { %v5985_v40 = vpop.eup %5153  ;;  %v847_v9 = vmul.f32 1.442695, %v825_v49  ;;  %v816_v61 = vpop.xlane.xlu0 %815 }
 0x351   : > { %7208 = vst [vmem:[#allocation12_spill] sm:$0xff] %v5985_v40  ;;  %v5987_v38 = vpop.eup %5155  ;;  %4065 = vmatprep.mubr.f32.mxu0 %v5985_v40  ;;  %v806_v62 = vpop.xlane.xlu1 %805  ;;  %v833_v6 = vsub.f32 %v5862_v14, %v816_v61  ;;  %v7243_v40 = vld [vmem:[#allocation4_spill] sm:$0xff] }
 0x352   : > { %7209 = vst [vmem:[#allocation13_spill] sm:$0xff] %v5987_v38  ;;  %5161 = vpow2.f32 %v847_v9  ;;  %4066 = vmatmul.mubr.f32.gmra.mrb[18].mxu0 %v5987_v38  ;;  %v828_v19 = vsub.f32 %v5865_v8, %v806_v62  ;;  %v857_v9 = vmul.f32 1.442695, %v830_v31 }
 0x353   : > { %5163 = vpow2.f32 %v849_v0 }
 0x354   : > { %v5992_v7 = vpop.eup %5157  ;;  %v4946_v1 = vpop.permute.xlu0 %4945  ;;  %v853_v16 = vmul.f32 1.442695, %v828_v19 }
 0x355   : > { %7210 = vst [vmem:[#allocation14_spill] sm:$0xff] %v5992_v7  ;;  %v5994_v53 = vpop.eup %5159  ;;  %v4948_v15 = vunpack.i.h.bf16 %v4946_v1  ;;  %v4947_v45 = vunpack.i.l.bf16 %v4946_v1  ;;  %4068 = vmatprep.mubr.f32.mxu0 %v5992_v7  ;;  %v804_v50 = vpop.xlane.xlu1 %803 }
 0x356   : > { %7211 = vst [vmem:[#allocation15_spill] sm:$0xff] %v5994_v53  ;;  %v827_v11 = vsub.f32 %v5876_v26, %v804_v50  ;;  %4069 = vmatmul.mubr.f32.gmra.mrb[20].mxu0 %v5994_v53  ;;  %v832_v26 = vsub.f32 %v5846_v12, %v814_v33  ;;  %v863_v12 = vmul.f32 1.442695, %v833_v6 }
 0x357   : > { %v4584_v13 = vpack.c.bf16 %v4948_v15, %v4947_v45 }
 0x358   : > { %v851_v58 = vmul.f32 1.442695, %v827_v11  ;;  %v1125_v8 = vpop.permute.xlu0 %1124  ;;  %v861_v45 = vmul.f32 1.442695, %v832_v26 }
 0x359   : > { %v808_v49 = vpop.xlane.xlu1 %807  ;;  %4586 = vmatprep.subr.msk.bf16.mxu0 %vm5624_vm2, %v4584_v13 }
 0x35a   : > { %5165 = vpow2.f32 %v851_v58  ;;  %v829_v0 = vsub.f32 %v5886_v55, %v808_v49  ;;  %4589 = vmatpush3.bf16.xpose.msk.msra.mxu0 %vm5624_vm2, %v4584_v13 }
 0x35b   : > { %5167 = vpow2.f32 %v853_v16 }
 0x35c   : > { %v6006_v62 = vpop.eup %5161  ;;  %v855_v23 = vmul.f32 1.442695, %v829_v0  ;;  %v1129_v19 = vpop.permute.xlu0 %1128 }
 0x35d   : > { %7212 = vst [vmem:[#allocation16_spill] sm:$0xff] %v6006_v62  ;;  %v6009_v1 = vpop.eup %5163  ;;  %4071 = vmatprep.mubr.f32.mxu0 %v6006_v62  ;;  %v812_v15 = vpop.xlane.xlu1 %811  ;;  %v7241_v62 = vld [vmem:[#allocation8_spill] sm:$0xff] }
 0x35e   : > { %7213 = vst [vmem:[#allocation17_spill] sm:$0xff] %v6009_v1  ;;  %5169 = vpow2.f32 %v855_v23  ;;  %v831_v55 = vsub.f32 %v5895_v10, %v812_v15  ;;  %4072 = vmatmul.mubr.f32.gmra.mrb[22].mxu0 %v6009_v1 }
 0x35f   : > { %5171 = vpow2.f32 %v857_v9 }
 0x360   : > { %v859_v33 = vmul.f32 1.442695, %v831_v55  ;;  %v1133_v50 = vpop.permute.xlu0 %1132 }
 0x361   : > { %v818_v11 = vpop.xlane.xlu1 %817 }
 0x362   : > { %5173 = vpow2.f32 %v859_v33  ;;  %v834_v14 = vsub.f32 %v5903_v51, %v818_v11 }
 0x363   : > { %5175 = vpow2.f32 %v861_v45 }
 0x364   : > { %v6015_v61 = vpop.eup %5165  ;;  %5177 = vpow2.f32 %v863_v12  ;;  %v865_v31 = vmul.f32 1.442695, %v834_v14  ;;  %v1137_v16 = vpop.permute.xlu0 %1136 }
 0x365   : > { %7214 = vst [vmem:[#allocation18_spill] sm:$0xff] %v6015_v61  ;;  %v6017_v13 = vpop.eup %5167  ;;  %4074 = vmatprep.mubr.f32.mxu0 %v6015_v61  ;;  %v1127_v10 = vpop.permute.xlu1 %1126 }
 0x366   : > { %7215 = vst [vmem:[#allocation19_spill] sm:$0xff] %v6017_v13  ;;  %5179 = vpow2.f32 %v865_v31  ;;  %4075 = vmatmul.mubr.f32.gmra.mrb[24].mxu0 %v6017_v13  ;;  %v7242_v13 = vld [vmem:[#allocation2_spill] sm:$0xff] }
 0x368   : > { %v6021_v58 = vpop.eup %5169  ;;  %v1141_v49 = vpop.permute.xlu0 %1140 }
 0x369   : > { %7216 = vst [vmem:[#allocation20_spill] sm:$0xff] %v6021_v58  ;;  %v6023_v0 = vpop.eup %5171  ;;  %4077 = vmatprep.mubr.f32.mxu0 %v6021_v58  ;;  %v1131_v51 = vpop.permute.xlu1 %1130 }
 0x36a   : > { %7217 = vst [vmem:[#allocation21_spill] sm:$0xff] %v6023_v0  ;;  %4078 = vmatmul.mubr.f32.gmra.mrb[26].mxu0 %v6023_v0  ;;  %v7238_v0 = vld [vmem:[#allocation9_spill] sm:$0xff] }
 0x36c   : > { %v6027_v9 = vpop.eup %5173  ;;  %v1145_v26 = vpop.permute.xlu0 %1144 }
 0x36d   : > { %7218 = vst [vmem:[#allocation22_spill] sm:$0xff] %v6027_v9  ;;  %v6029_v6 = vpop.eup %5175  ;;  %4080 = vmatprep.mubr.f32.mxu0 %v6027_v9  ;;  %v1135_v23 = vpop.permute.xlu1 %1134 }
 0x36e   : > { %7219 = vst [vmem:[#allocation23_spill] sm:$0xff] %v6029_v6  ;;  %v6032_v15 = vpop.eup %5177  ;;  %4081 = vmatmul.mubr.f32.gmra.mrb[28].mxu0 %v6029_v6 }
 0x36f   : > { %7220 = vst [vmem:[#allocation24_spill] sm:$0xff] %v6032_v15  ;;  %4083 = vmatprep.mubr.f32.mxu0 %v6032_v15 }
 0x370   : > { %v6036_v55 = vpop.eup %5179  ;;  %v1149_v45 = vpop.permute.xlu0 %1148 }
 0x371   : > { %7221 = vst [vmem:[#allocation25_spill] sm:$0xff] %v6036_v55  ;;  %v1139_v12 = vpop.permute.xlu1 %1138 }
 0x372   : > { %4084 = vmatmul.mubr.f32.gmra.mrb[30].mxu0 %v6036_v55 }
 0x373   : > { %4118 = vmatprep.mubr.msk.f32.mxu0 %vm561_vm1, %v1125_v8 }
 0x374   : > { %v1153_v33 = vpop.permute.xlu0 %1152 }
 0x375   : > { %v1143_v11 = vpop.permute.xlu1 %1142 }
 0x376   : > { %4119 = vmatmul.mubr.msk.f32.vlgmr.msra.gmra.mrb[32].mxu0 %vm561_vm1, %v1127_v10 }
 0x377   : > { %4121 = vmatprep.mubr.msk.f32.mxu0 %vm561_vm1, %v1129_v19 }
 0x378   : > { %v4951_v14 = vpop.permute.xlu0 %4950 }
 0x379   : > { %v4953_v31 = vunpack.i.h.bf16 %v4951_v14  ;;  %v4952_v9 = vunpack.i.l.bf16 %v4951_v14  ;;  %v1147_v58 = vpop.permute.xlu1 %1146 }
 0x37a   : > { %4122 = vmatmul.mubr.msk.f32.gmra.mrb[34].mxu0 %vm561_vm1, %v1131_v51 }
 0x37b   : > { %4124 = vmatprep.mubr.msk.f32.mxu0 %vm561_vm1, %v1133_v50  ;;  %v4590_v15 = vpack.c.bf16 %v4953_v31, %v4952_v9 }
 0x37c   : > { %v4961_v8 = vpop.permute.xlu0 %4960 }
 0x37d   : > { %4591 = vmatprep.subr.bf16.mxu1 %v4590_v15  ;;  %v1151_v6 = vpop.permute.xlu1 %1150  ;;  %v4963_v14 = vunpack.i.h.bf16 %v4961_v8  ;;  %v4962_v55 = vunpack.i.l.bf16 %v4961_v8 }
 0x37e   : > { %4125 = vmatmul.mubr.msk.f32.gmra.mrb[36].mxu0 %vm561_vm1, %v1135_v23  ;;  %4593 = vmatpush3.bf16.msra.mxu1 %v4590_v15 }
 0x37f   : > { %4127 = vmatprep.mubr.msk.f32.mxu0 %vm561_vm1, %v1137_v16 }
 0x380   : > { %v4966_v50 = vpop.permute.xlu0 %4965 }
 0x381   : > { %v1155_v10 = vpop.permute.xlu1 %1154  ;;  %v4968_v15 = vunpack.i.h.bf16 %v4966_v50  ;;  %v4967_v16 = vunpack.i.l.bf16 %v4966_v50 }
 0x382   : > { %4128 = vmatmul.mubr.msk.f32.gmra.mrb[38].mxu0 %vm561_vm1, %v1139_v12  ;;  %v4598_v12 = vpack.c.bf16 %v4963_v14, %v4962_v55 }
 0x383   : > { %4130 = vmatprep.mubr.msk.f32.mxu0 %vm561_vm1, %v1141_v49 }
 0x384   : > { %v4981_v55 = vpop.permute.xlu0 %4980 }
 0x385   : > { %v4956_v19 = vpop.permute.xlu1 %4955 }
 0x386   : > { %v4958_v51 = vunpack.i.h.bf16 %v4956_v19  ;;  %v4957_v61 = vunpack.i.l.bf16 %v4956_v19  ;;  %4131 = vmatmul.mubr.msk.f32.gmra.mrb[40].mxu0 %vm561_vm1, %v1143_v11  ;;  %v4602_v11 = vpack.c.bf16 %v4968_v15, %v4967_v16  ;;  %v4982_v19 = vunpack.i.l.bf16 %v4981_v55 }
 0x387   : > { %4133 = vmatprep.mubr.msk.f32.mxu0 %vm561_vm1, %v1145_v26 }
 0x388   : > { %v4594_v9 = vpack.c.bf16 %v4958_v51, %v4957_v61 }
 0x389   : > { %v4971_v23 = vpop.permute.xlu1 %4970 }
 0x38a   : > { %4134 = vmatmul.mubr.msk.f32.gmra.mrb[42].mxu0 %vm561_vm1, %v1147_v58  ;;  %4595 = vmatprep.subr.bf16.mxu1 %v4594_v9  ;;  %v4973_v49 = vunpack.i.h.bf16 %v4971_v23  ;;  %v4972_v31 = vunpack.i.l.bf16 %v4971_v23 }
 0x38b   : > { %4136 = vmatprep.mubr.msk.f32.mxu0 %vm561_vm1, %v1149_v45  ;;  %4597 = vmatpush3.bf16.msra.mxu1 %v4594_v9  ;;  %v4983_v45 = vunpack.i.h.bf16 %v4981_v55 }
 0x38c   : > { %4599 = vmatprep.subr.bf16.mxu1 %v4598_v12  ;;  %v4606_v58 = vpack.c.bf16 %v4973_v49, %v4972_v31 }
 0x38d   : > { %v4976_v8 = vpop.permute.xlu1 %4975  ;;  %v4614_v9 = vpack.c.bf16 %v4983_v45, %v4982_v19 }
 0x38e   : > { %4137 = vmatmul.mubr.msk.f32.gmra.mrb[44].mxu0 %vm561_vm1, %v1151_v6  ;;  %v4978_v61 = vunpack.i.h.bf16 %v4976_v8  ;;  %v4977_v26 = vunpack.i.l.bf16 %v4976_v8 }
 0x38f   : > { %4139 = vmatprep.mubr.msk.f32.mxu0 %vm561_vm1, %v1153_v33  ;;  %4601 = vmatpush3.bf16.msra.mxu1 %v4598_v12  ;;  %v4991_v33 = vpop.permute.xlu0 %4990 }
 0x390   : > { %4603 = vmatprep.subr.bf16.mxu1 %v4602_v11  ;;  %v4610_v14 = vpack.c.bf16 %v4978_v61, %v4977_v26  ;;  %v4993_v23 = vunpack.i.h.bf16 %v4991_v33  ;;  %v4992_v15 = vunpack.i.l.bf16 %v4991_v33 }
 0x391   : > { %v4986_v51 = vpop.permute.xlu1 %4985 }
 0x392   : > { %4140 = vmatmul.mubr.msk.f32.gmra.mrb[46].mxu0 %vm561_vm1, %v1155_v10  ;;  %v4988_v6 = vunpack.i.h.bf16 %v4986_v51  ;;  %v4987_v50 = vunpack.i.l.bf16 %v4986_v51  ;;  %v6055_v10 = vpack.c.bf16 %v4993_v23, %v4992_v15 }
 0x393   : > { %4605 = vmatpush3.bf16.msra.mxu1 %v4602_v11 }
 0x394   : > { %4607 = vmatprep.subr.bf16.mxu1 %v4606_v58  ;;  %v4618_v16 = vpack.c.bf16 %v4988_v6, %v4987_v50 }
 0x395   : > { %v5006_v1 = vpop.permute.xlu1 %5005 }
 0x397   : > { %4609 = vmatpush3.bf16.msra.mxu1 %v4606_v58 }
 0x398   : > { %4611 = vmatprep.subr.bf16.mxu1 %v4610_v14 }
 0x39b   : > { %4613 = vmatpush3.bf16.msra.mxu1 %v4610_v14 }
 0x39c   : > { %4615 = vmatprep.subr.bf16.mxu1 %v4614_v9 }
 0x39f   : > { %4617 = vmatpush3.bf16.msra.mxu1 %v4614_v9 }
 0x3a0   : > { %4619 = vmatprep.subr.bf16.mxu1 %v4618_v16 }
 0x3a3   : > { %4621 = vmatpush3.bf16.msra.mxu1 %v4618_v16 }
 0x3a4   : > { %4624 = vmatprep.subr.msk.bf16.mxu1 %vm5624_vm2, %v6055_v10 }
 0x3f0   : > { %v6060_v12 = vpop.f32.mrb[16].mxu0 }
 0x3f1   : > { %7222 = vst [vmem:[#allocation26_spill] sm:$0xff] %v6060_v12  ;;  %v6062_v49 = vpop.f32.mrb[17].mxu0 }
 0x3f2   : > { %7223 = vst [vmem:[#allocation27_spill] sm:$0xff] %v6062_v49 }
 0x425   : > { %v6064_v31 = vpop.f32.mrb[18].mxu0 }
 0x426   : > { %7224 = vst [vmem:[#allocation28_spill] sm:$0xff] %v6064_v31  ;;  %v6066_v11 = vpop.f32.mrb[19].mxu0 }
 0x427   : > { %7225 = vst [vmem:[#allocation29_spill] sm:$0xff] %v6066_v11 }
 0x429   : > { %v6068_v8 = vpop.f32.mrb[20].mxu0 }
 0x42a   : > { %7226 = vst [vmem:[#allocation30_spill] sm:$0xff] %v6068_v8  ;;  %v6070_v61 = vpop.f32.mrb[21].mxu0 }
 0x42b   : > { %7227 = vst [vmem:[#allocation31_spill] sm:$0xff] %v6070_v61 }
 0x431   : > { %v6072_v26 = vpop.f32.mrb[22].mxu0 }
 0x432   : > { %7228 = vst [vmem:[#allocation32_spill] sm:$0xff] %v6072_v26  ;;  %v6074_v58 = vpop.f32.mrb[23].mxu0 }
 0x433   : > { %7229 = vst [vmem:[#allocation33_spill] sm:$0xff] %v6074_v58 }
 0x439   : > { %v6076_v55 = vpop.f32.mrb[24].mxu0 }
 0x43a   : > { %7230 = vst [vmem:[#allocation34_spill] sm:$0xff] %v6076_v55  ;;  %v6078_v45 = vpop.f32.mrb[25].mxu0 }
 0x43b   : > { %7231 = vst [vmem:[#allocation35_spill] sm:$0xff] %v6078_v45 }
 0x43d   : > { %v6080_v19 = vpop.f32.mrb[26].mxu0 }
 0x43e   : > { %7232 = vst [vmem:[#allocation36_spill] sm:$0xff] %v6080_v19  ;;  %v6082_v14 = vpop.f32.mrb[27].mxu0 }
 0x43f   : > { %7233 = vst [vmem:[#allocation37_spill] sm:$0xff] %v6082_v14 }
 0x441   : > { %v6084_v51 = vpop.f32.mrb[28].mxu0 }
 0x442   : > { %7234 = vst [vmem:[#allocation38_spill] sm:$0xff] %v6084_v51  ;;  %v6086_v6 = vpop.f32.mrb[29].mxu0 }
 0x443   : > { %7235 = vst [vmem:[#allocation39_spill] sm:$0xff] %v6086_v6 }
 0x445   : > { %v6088_v50 = vpop.f32.mrb[30].mxu0 }
 0x446   : > { %7236 = vst [vmem:[#allocation40_spill] sm:$0xff] %v6088_v50  ;;  %v6090_v9 = vpop.f32.mrb[31].mxu0 }
 0x447   : > { %7237 = vst [vmem:[#allocation41_spill] sm:$0xff] %v6090_v9 }
 0x449   : > { %v4120_v33 = vpop.f32.mrb[32].mxu0 }
 0x44a   : > { %v6093_v23 = vadd.f32 %v4120_v33, %v5751_v56  ;;  %v1318_v15 = vpop.f32.mrb[33].mxu0 }
 0x44b   : > { %v6096_v16 = vadd.f32 %v1318_v15, %v5754_v60 }
 0x44c   : > { %1399 = vmax.xlane.f32.xlu0 %v6093_v23 }
 0x44d   : > { %v4123_v45 = vpop.f32.mrb[34].mxu0  ;;  %1397 = vmax.xlane.f32.xlu1 %v6096_v16 }
 0x44e   : > { %v1328_v14 = vpop.f32.mrb[35].mxu0  ;;  %v6105_v8 = vadd.f32 %v4123_v45, %v5783_v22 }
 0x44f   : > { %v6108_v49 = vadd.f32 %v1328_v14, %v5786_v25 }
 0x451   : > { %v4126_v51 = vpop.f32.mrb[36].mxu0 }
 0x452   : > { %v1338_v6 = vpop.f32.mrb[37].mxu0  ;;  %v6113_v31 = vadd.f32 %v4126_v51, %v5799_v34 }
 0x453   : > { %v6116_v12 = vadd.f32 %v1338_v6, %v5802_v36 }
 0x455   : > { %v4129_v19 = vpop.f32.mrb[38].mxu0 }
 0x456   : > { %v1348_v50 = vpop.f32.mrb[39].mxu0  ;;  %v6124_v14 = vadd.f32 %v4129_v19, %v5820_v4 }
 0x457   : > { %v6132_v6 = vadd.f32 %v1348_v50, %v5838_v21 }
 0x459   : > { %v4132_v58 = vpop.f32.mrb[40].mxu0 }
 0x45a   : > { %v1358_v9 = vpop.f32.mrb[41].mxu0  ;;  %v6140_v19 = vadd.f32 %v4132_v58, %v7238_v0 }
 0x45d   : > { %v4135_v55 = vpop.f32.mrb[42].mxu0 }
 0x45e   : > { %v1368_v61 = vpop.f32.mrb[43].mxu0  ;;  %5015 = vrot.lane.b32.xlu1 %v5580_v54, %s5419_s14  ;;  %v6121_v45 = vadd.f32 %v4135_v55, %v5817_v2 }
 0x45f   : > { %v6149_v50 = vadd.f32 %v1368_v61, %v5879_v17  ;;  %v7239_v61 = vld [vmem:[#allocation5_spill] sm:$0xff] }
 0x461   : > { %v4138_v33 = vpop.f32.mrb[44].mxu0 }
 0x462   : > { %5020 = vrot.lane.b32.xlu0 %v5590_v59, %s5419_s14  ;;  %v1378_v15 = vpop.f32.mrb[45].mxu0  ;;  %v6129_v51 = vadd.f32 %v4138_v33, %v5835_v20  ;;  %v6145_v33 = vadd.f32 %v1358_v9, %v5868_v18  ;;  %v7240_v9 = vld [vmem:[#allocation6_spill] sm:$0xff] }
 0x465   : > { %v4141_v26 = vpop.f32.mrb[46].mxu0 }
 0x466   : > { %v1388_v11 = vpop.f32.mrb[47].mxu0  ;;  %v6157_v58 = vadd.f32 %v4141_v26, %v5898_v5  ;;  %v4996_v26 = vpop.permute.xlu0 %4995 }
 0x467   : > { %v6137_v55 = vadd.f32 %v1388_v11, %v5852_v29  ;;  %v6153_v11 = vadd.f32 %v1378_v15, %v5889_v57 }
 0x46a   : > { %v5001_v15 = vpop.permute.xlu0 %5000 }
 0x46e   : > { %v5011_v7 = vpop.permute.xlu0 %5010 }
 0x481   : > { %1403 = vmax.xlane.f32.xlu0 %v6105_v8 }
 0x482   : > { %1401 = vmax.xlane.f32.xlu1 %v6108_v49 }
 0x485   : > { %1407 = vmax.xlane.f32.xlu0 %v6113_v31 }
 0x486   : > { %1405 = vmax.xlane.f32.xlu1 %v6116_v12 }
 0x489   : > { %1419 = vmax.xlane.f32.xlu0 %v6121_v45 }
 0x48a   : > { %1411 = vmax.xlane.f32.xlu1 %v6124_v14 }
 0x48d   : > { %1423 = vmax.xlane.f32.xlu0 %v6129_v51 }
 0x48e   : > { %1409 = vmax.xlane.f32.xlu1 %v6132_v6 }
 0x491   : > { %1425 = vmax.xlane.f32.xlu0 %v6137_v55 }
 0x492   : > { %1415 = vmax.xlane.f32.xlu1 %v6140_v19 }
 0x496   : > { %1413 = vmax.xlane.f32.xlu1 %v6145_v33 }
 0x49a   : > { %1417 = vmax.xlane.f32.xlu1 %v6149_v50 }
 0x49e   : > { %1421 = vmax.xlane.f32.xlu1 %v6153_v11 }
 0x4a2   : > { %1427 = vmax.xlane.f32.xlu1 %v6157_v58 }
 0x4a7   : > { %5025 = vrot.lane.b32.xlu0 %v5600_v63, %s5419_s14 }
 0x4ab   : > { %1734 = vrot.lane.b32.xlu0 %v5528_v28, %s5420_s15 }
 0x4af   : > { %1738 = vrot.lane.b32.xlu0 %v5671_v43, %s5420_s15 }
 0x4b3   : > { %1742 = vrot.lane.b32.xlu0 %v5681_v48, %s5420_s15  ;;  %1736 = vrot.lane.b32.xlu1 %v5668_v41, %s5420_s15 }
 0x4b7   : > { %1746 = vrot.lane.b32.xlu0 %v5691_v32, %s5420_s15  ;;  %1740 = vrot.lane.b32.xlu1 %v5678_v46, %s5420_s15 }
 0x4bb   : > { %1750 = vrot.lane.b32.xlu0 %v5701_v37, %s5420_s15  ;;  %1744 = vrot.lane.b32.xlu1 %v5688_v24, %s5420_s15 }
 0x4bf   : > { %1754 = vrot.lane.b32.xlu0 %v5711_v42, %s5420_s15  ;;  %1748 = vrot.lane.b32.xlu1 %v5698_v30, %s5420_s15 }
 0x4c3   : > { %1758 = vrot.lane.b32.xlu0 %v5721_v47, %s5420_s15  ;;  %1752 = vrot.lane.b32.xlu1 %v5708_v35, %s5420_s15 }
 0x4c7   : > { %1762 = vrot.lane.b32.xlu0 %v5731_v52, %s5420_s15  ;;  %1756 = vrot.lane.b32.xlu1 %v7239_v61, %s5420_s15 }
 0x4cb   : > { %5030 = vrot.lane.b32.xlu0 %v5526_v27, %s5421_s16  ;;  %1760 = vrot.lane.b32.xlu1 %v7240_v9, %s5420_s15 }
 0x4cf   : > { %5040 = vrot.lane.b32.xlu0 %v5550_v39, %s5421_s16  ;;  %1764 = vrot.lane.b32.xlu1 %v7241_v62, %s5420_s15 }
 0x4d3   : > { %5045 = vrot.lane.b32.xlu0 %v5560_v44, %s5421_s16  ;;  %5035 = vrot.lane.b32.xlu1 %v7242_v13, %s5421_s16 }
 0x4d7   : > { %5060 = vrot.lane.b32.xlu0 %v5590_v59, %s5421_s16  ;;  %5050 = vrot.lane.b32.xlu1 %v7243_v40, %s5421_s16 }
 0x4d9   : > { %v1400_v53 = vpop.xlane.xlu0 %1399 }
 0x4da   : > { %v1430_v38 = vsub.f32 %v6093_v23, %v1400_v53  ;;  %v1398_v61 = vpop.xlane.xlu1 %1397  ;;  %v4998_v53 = vunpack.i.h.bf16 %v4996_v26  ;;  %v4997_v23 = vunpack.i.l.bf16 %v4996_v26 }
 0x4db   : > { %v1429_v9 = vsub.f32 %v6096_v16, %v1398_v61  ;;  %5070 = vrot.lane.b32.xlu0 %v5526_v27, %s5422_s17  ;;  %5055 = vrot.lane.b32.xlu1 %v5580_v54, %s5421_s16  ;;  %v5002_v61 = vunpack.i.l.bf16 %v5001_v15 }
 0x4dc   : > { %v1447_v62 = vmul.f32 1.442695, %v1430_v38  ;;  %v4628_v16 = vpack.c.bf16 %v4998_v53, %v4997_v23  ;;  %v5007_v53 = vunpack.i.l.bf16 %v5006_v1 }
 0x4dd   : > { %v1445_v52 = vmul.f32 1.442695, %v1429_v9  ;;  %v5008_v9 = vunpack.i.h.bf16 %v5006_v1  ;;  %v5021_v1 = vpop.permute.xlu0 %5020 }
 0x4df   : > { %5181 = vpow2.f32 %v1445_v52  ;;  %5075 = vrot.lane.b32.xlu0 %v7242_v13, %s5422_s17  ;;  %5065 = vrot.lane.b32.xlu1 %v5600_v63, %s5421_s16  ;;  %v4640_v23 = vpack.c.bf16 %v5008_v9, %v5007_v53 }
 0x4e0   : > { %5183 = vpow2.f32 %v1447_v62  ;;  %v5003_v62 = vunpack.i.h.bf16 %v5001_v15  ;;  %v5016_v15 = vpop.permute.xlu1 %5015 }
 0x4e2   : > { %v4634_v26 = vpack.c.bf16 %v5003_v62, %v5002_v61  ;;  %v5017_v62 = vunpack.i.l.bf16 %v5016_v15 }
 0x4e3   : > { %5080 = vrot.lane.b32.xlu0 %v5550_v39, %s5422_s17  ;;  %5085 = vrot.lane.b32.xlu1 %v5560_v44, %s5422_s17 }
 0x4e7   : > { %5090 = vrot.lane.b32.xlu0 %v7243_v40, %s5422_s17 }
 0x4e9   : > { %v6198_v38 = vpop.eup %5181 }
 0x4ea   : > { %7244 = vst [vmem:[#allocation9_spill] sm:$0xff] %v6198_v38  ;;  %v6200_v52 = vpop.eup %5183  ;;  %4174 = vmatprep.mubr.f32.mxu1 %v6198_v38 }
 0x4eb   : > { %7245 = vst [vmem:[#allocation2_spill] sm:$0xff] %v6200_v52  ;;  %4175 = vmatmul.mubr.f32.vlgmr.msra.gmra.mrb[16].mxu1 %v6200_v52  ;;  %v5012_v52 = vunpack.i.l.bf16 %v5011_v7 }
 0x4ec   : > { %4627 = vmatpush3.bf16.xpose.msk.msra.mxu1 %vm5624_vm2, %v6055_v10  ;;  %v5013_v10 = vunpack.i.h.bf16 %v5011_v7  ;;  %v5023_v7 = vunpack.i.h.bf16 %v5021_v1 }
 0x4ed   : > { %4630 = vmatprep.subr.msk.bf16.mxu1 %vm5624_vm2, %v4628_v16 }
 0x4ee   : > { %v4646_v38 = vpack.c.bf16 %v5013_v10, %v5012_v52  ;;  %v5022_v52 = vunpack.i.l.bf16 %v5021_v1 }
 0x4f4   : > { %4633 = vmatpush3.bf16.xpose.msk.msra.mxu1 %vm5624_vm2, %v4628_v16  ;;  %v5018_v16 = vunpack.i.h.bf16 %v5016_v15  ;;  %v4658_v15 = vpack.c.bf16 %v5023_v7, %v5022_v52 }
 0x4f5   : > { %4636 = vmatprep.subr.msk.bf16.mxu1 %vm5624_vm2, %v4634_v26 }
 0x4f6   : > { %v4652_v61 = vpack.c.bf16 %v5018_v16, %v5017_v62 }
 0x4fc   : > { %4639 = vmatpush3.bf16.xpose.msk.msra.mxu1 %vm5624_vm2, %v4634_v26 }
 0x4fd   : > { %4642 = vmatprep.subr.msk.bf16.mxu1 %vm5624_vm2, %v4640_v23 }
 0x504   : > { %4645 = vmatpush3.bf16.xpose.msk.msra.mxu1 %vm5624_vm2, %v4640_v23 }
 0x505   : > { %4648 = vmatprep.subr.msk.bf16.mxu1 %vm5624_vm2, %v4646_v38 }
 0x50c   : > { %4651 = vmatpush3.bf16.xpose.msk.msra.mxu1 %vm5624_vm2, %v4646_v38 }
 0x50d   : > { %4654 = vmatprep.subr.msk.bf16.mxu1 %vm5624_vm2, %v4652_v61 }
 0x50e   : > { %v1404_v26 = vpop.xlane.xlu0 %1403 }
 0x50f   : > { %v1432_v9 = vsub.f32 %v6105_v8, %v1404_v26  ;;  %v1402_v53 = vpop.xlane.xlu1 %1401 }
 0x510   : > { %v1431_v23 = vsub.f32 %v6108_v49, %v1402_v53 }
 0x511   : > { %v1451_v10 = vmul.f32 1.442695, %v1432_v9 }
 0x512   : > { %v1449_v40 = vmul.f32 1.442695, %v1431_v23  ;;  %v1408_v44 = vpop.xlane.xlu0 %1407 }
 0x513   : > { %v1434_v16 = vsub.f32 %v6113_v31, %v1408_v44  ;;  %v1406_v62 = vpop.xlane.xlu1 %1405 }
 0x514   : > { %5185 = vpow2.f32 %v1449_v40  ;;  %v1433_v38 = vsub.f32 %v6116_v12, %v1406_v62  ;;  %4657 = vmatpush3.bf16.xpose.msk.msra.mxu1 %vm5624_vm2, %v4652_v61 }
 0x515   : > { %5187 = vpow2.f32 %v1451_v10  ;;  %v1455_v1 = vmul.f32 1.442695, %v1434_v16  ;;  %4660 = vmatprep.subr.msk.bf16.mxu1 %vm5624_vm2, %v4658_v15 }
 0x516   : > { %v1453_v8 = vmul.f32 1.442695, %v1433_v38  ;;  %v1420_v49 = vpop.xlane.xlu0 %1419 }
 0x517   : > { %v1412_v26 = vpop.xlane.xlu1 %1411 }
 0x518   : > { %5189 = vpow2.f32 %v1453_v8  ;;  %v1436_v7 = vsub.f32 %v6124_v14, %v1412_v26  ;;  %v1440_v8 = vsub.f32 %v6121_v45, %v1420_v49 }
 0x519   : > { %5191 = vpow2.f32 %v1455_v1 }
 0x51a   : > { %v1424_v44 = vpop.xlane.xlu0 %1423  ;;  %v1459_v12 = vmul.f32 1.442695, %v1436_v7 }
 0x51b   : > { %v1410_v31 = vpop.xlane.xlu1 %1409 }
 0x51c   : > { %v1435_v40 = vsub.f32 %v6132_v6, %v1410_v31  ;;  %4663 = vmatpush3.bf16.xpose.msk.msra.mxu1 %vm5624_vm2, %v4658_v15 }
 0x51e   : > { %v6237_v61 = vpop.eup %5185  ;;  %v1457_v52 = vmul.f32 1.442695, %v1435_v40  ;;  %v1426_v9 = vpop.xlane.xlu0 %1425 }
 0x51f   : > { %v6239_v53 = vpop.eup %5187  ;;  %4177 = vmatprep.mubr.f32.mxu1 %v6237_v61  ;;  %v1416_v23 = vpop.xlane.xlu1 %1415  ;;  %v1443_v45 = vsub.f32 %v6137_v55, %v1426_v9 }
 0x520   : > { %5193 = vpow2.f32 %v1457_v52  ;;  %4178 = vmatmul.mubr.f32.gmra.mrb[18].mxu1 %v6239_v53  ;;  %v1438_v14 = vsub.f32 %v6140_v19, %v1416_v23  ;;  %v1467_v52 = vmul.f32 1.442695, %v1440_v8 }
 0x521   : > { %5195 = vpow2.f32 %v1459_v12 }
 0x522   : > { %v6244_v6 = vpop.eup %5189  ;;  %v5026_v10 = vpop.permute.xlu0 %5025  ;;  %v1463_v26 = vmul.f32 1.442695, %v1438_v14 }
 0x523   : > { %v6246_v15 = vpop.eup %5191  ;;  %v5028_v16 = vunpack.i.h.bf16 %v5026_v10  ;;  %v5027_v62 = vunpack.i.l.bf16 %v5026_v10  ;;  %4180 = vmatprep.mubr.f32.mxu1 %v6244_v6  ;;  %v1414_v38 = vpop.xlane.xlu1 %1413 }
 0x524   : > { %v1437_v1 = vsub.f32 %v6145_v33, %v1414_v38  ;;  %4181 = vmatmul.mubr.f32.gmra.mrb[20].mxu1 %v6246_v15  ;;  %v1442_v33 = vsub.f32 %v6129_v51, %v1424_v44  ;;  %v1473_v51 = vmul.f32 1.442695, %v1443_v45 }
 0x525   : > { %v4664_v7 = vpack.c.bf16 %v5028_v16, %v5027_v62 }
 0x526   : > { %v1461_v31 = vmul.f32 1.442695, %v1437_v1  ;;  %v1735_v19 = vpop.permute.xlu0 %1734  ;;  %v1471_v62 = vmul.f32 1.442695, %v1442_v33 }
 0x527   : > { %v1418_v40 = vpop.xlane.xlu1 %1417  ;;  %4666 = vmatprep.subr.msk.bf16.mxu1 %vm5624_vm2, %v4664_v7 }
 0x528   : > { %5197 = vpow2.f32 %v1461_v31  ;;  %v1439_v12 = vsub.f32 %v6149_v50, %v1418_v40  ;;  %4669 = vmatpush3.bf16.xpose.msk.msra.mxu1 %vm5624_vm2, %v4664_v7 }
 0x529   : > { %5199 = vpow2.f32 %v1463_v26 }
 0x52a   : > { %v6258_v23 = vpop.eup %5193  ;;  %v1465_v49 = vmul.f32 1.442695, %v1439_v12  ;;  %v1739_v14 = vpop.permute.xlu0 %1738 }
 0x52b   : > { %v6261_v10 = vpop.eup %5195  ;;  %4183 = vmatprep.mubr.f32.mxu1 %v6258_v23  ;;  %v1422_v16 = vpop.xlane.xlu1 %1421 }
 0x52c   : > { %5201 = vpow2.f32 %v1465_v49  ;;  %v1441_v50 = vsub.f32 %v6153_v11, %v1422_v16  ;;  %4184 = vmatmul.mubr.f32.gmra.mrb[22].mxu1 %v6261_v10 }
 0x52d   : > { %5203 = vpow2.f32 %v1467_v52 }
 0x52e   : > { %v1469_v44 = vmul.f32 1.442695, %v1441_v50  ;;  %v1743_v38 = vpop.permute.xlu0 %1742 }
 0x52f   : > { %v1428_v1 = vpop.xlane.xlu1 %1427 }
 0x530   : > { %5205 = vpow2.f32 %v1469_v44  ;;  %v1444_v55 = vsub.f32 %v6157_v58, %v1428_v1 }
 0x531   : > { %5207 = vpow2.f32 %v1471_v62 }
 0x532   : > { %v6267_v9 = vpop.eup %5197  ;;  %5209 = vpow2.f32 %v1473_v51  ;;  %v1475_v8 = vmul.f32 1.442695, %v1444_v55  ;;  %v1747_v26 = vpop.permute.xlu0 %1746 }
 0x533   : > { %v6269_v7 = vpop.eup %5199  ;;  %4186 = vmatprep.mubr.f32.mxu1 %v6267_v9  ;;  %v1737_v11 = vpop.permute.xlu1 %1736 }
 0x534   : > { %5211 = vpow2.f32 %v1475_v8  ;;  %4187 = vmatmul.mubr.f32.gmra.mrb[24].mxu1 %v6269_v7 }
 0x536   : > { %v6273_v31 = vpop.eup %5201  ;;  %v1751_v40 = vpop.permute.xlu0 %1750 }
 0x537   : > { %7246 = vst [vmem:[#allocation42_spill] sm:$0xff] %v6273_v31  ;;  %v6275_v12 = vpop.eup %5203  ;;  %4189 = vmatprep.mubr.f32.mxu1 %v6273_v31  ;;  %v1741_v58 = vpop.permute.xlu1 %1740 }
 0x538   : > { %7247 = vst [vmem:[#allocation43_spill] sm:$0xff] %v6275_v12  ;;  %4190 = vmatmul.mubr.f32.gmra.mrb[26].mxu1 %v6275_v12 }
 0x53a   : > { %v6279_v52 = vpop.eup %5205  ;;  %v1755_v33 = vpop.permute.xlu0 %1754 }
 0x53b   : > { %7248 = vst [vmem:[#allocation44_spill] sm:$0xff] %v6279_v52  ;;  %v6281_v45 = vpop.eup %5207  ;;  %4192 = vmatprep.mubr.f32.mxu1 %v6279_v52  ;;  %v1745_v49 = vpop.permute.xlu1 %1744 }
 0x53c   : > { %7249 = vst [vmem:[#allocation45_spill] sm:$0xff] %v6281_v45  ;;  %v6284_v16 = vpop.eup %5209  ;;  %4193 = vmatmul.mubr.f32.gmra.mrb[28].mxu1 %v6281_v45 }
 0x53d   : > { %7250 = vst [vmem:[#allocation46_spill] sm:$0xff] %v6284_v16  ;;  %4195 = vmatprep.mubr.f32.mxu1 %v6284_v16 }
 0x53e   : > { %v6288_v50 = vpop.eup %5211  ;;  %v1759_v62 = vpop.permute.xlu0 %1758 }
 0x53f   : > { %7251 = vst [vmem:[#allocation47_spill] sm:$0xff] %v6288_v50  ;;  %v1749_v51 = vpop.permute.xlu1 %1748 }
 0x540   : > { %4196 = vmatmul.mubr.f32.gmra.mrb[30].mxu1 %v6288_v50 }
 0x541   : > { %4230 = vmatprep.mubr.msk.f32.mxu1 %vm561_vm1, %v1735_v19 }
 0x542   : > { %v1763_v44 = vpop.permute.xlu0 %1762 }
 0x543   : > { %v1753_v1 = vpop.permute.xlu1 %1752 }
 0x544   : > { %4231 = vmatmul.mubr.msk.f32.vlgmr.msra.gmra.mrb[32].mxu1 %vm561_vm1, %v1737_v11 }
 0x545   : > { %4233 = vmatprep.mubr.msk.f32.mxu1 %vm561_vm1, %v1739_v14 }
 0x546   : > { %v5031_v55 = vpop.permute.xlu0 %5030 }
 0x547   : > { %v5033_v8 = vunpack.i.h.bf16 %v5031_v55  ;;  %v5032_v52 = vunpack.i.l.bf16 %v5031_v55  ;;  %v1757_v45 = vpop.permute.xlu1 %1756 }
 0x548   : > { %4234 = vmatmul.mubr.msk.f32.gmra.mrb[34].mxu1 %vm561_vm1, %v1741_v58 }
 0x549   : > { %4236 = vmatprep.mubr.msk.f32.mxu1 %vm561_vm1, %v1743_v38  ;;  %v4670_v16 = vpack.c.bf16 %v5033_v8, %v5032_v52 }
 0x54a   : > { %v5041_v19 = vpop.permute.xlu0 %5040 }
 0x54b   : > { %4671 = vmatprep.subr.bf16.mxu0 %v4670_v16  ;;  %v1761_v31 = vpop.permute.xlu1 %1760  ;;  %v5043_v55 = vunpack.i.h.bf16 %v5041_v19  ;;  %v5042_v50 = vunpack.i.l.bf16 %v5041_v19 }
 0x54c   : > { %4237 = vmatmul.mubr.msk.f32.gmra.mrb[36].mxu1 %vm561_vm1, %v1745_v49  ;;  %4673 = vmatpush3.bf16.msra.mxu0 %v4670_v16 }
 0x54d   : > { %4239 = vmatprep.mubr.msk.f32.mxu1 %vm561_vm1, %v1747_v26 }
 0x54e   : > { %v5046_v38 = vpop.permute.xlu0 %5045 }
 0x54f   : > { %v1765_v11 = vpop.permute.xlu1 %1764  ;;  %v5048_v16 = vunpack.i.h.bf16 %v5046_v38  ;;  %v5047_v26 = vunpack.i.l.bf16 %v5046_v38 }
 0x550   : > { %4240 = vmatmul.mubr.msk.f32.gmra.mrb[38].mxu1 %vm561_vm1, %v1749_v51  ;;  %v4678_v51 = vpack.c.bf16 %v5043_v55, %v5042_v50 }
 0x551   : > { %4242 = vmatprep.mubr.msk.f32.mxu1 %vm561_vm1, %v1751_v40 }
 0x552   : > { %v5061_v50 = vpop.permute.xlu0 %5060 }
 0x553   : > { %v5036_v14 = vpop.permute.xlu1 %5035 }
 0x554   : > { %v5038_v58 = vunpack.i.h.bf16 %v5036_v14  ;;  %v5037_v12 = vunpack.i.l.bf16 %v5036_v14  ;;  %4243 = vmatmul.mubr.msk.f32.gmra.mrb[40].mxu1 %vm561_vm1, %v1753_v1  ;;  %v4682_v1 = vpack.c.bf16 %v5048_v16, %v5047_v26  ;;  %v5062_v14 = vunpack.i.l.bf16 %v5061_v50 }
 0x555   : > { %4245 = vmatprep.mubr.msk.f32.mxu1 %vm561_vm1, %v1755_v33 }
 0x556   : > { %v4674_v52 = vpack.c.bf16 %v5038_v58, %v5037_v12 }
 0x557   : > { %v5051_v49 = vpop.permute.xlu1 %5050 }
 0x558   : > { %4246 = vmatmul.mubr.msk.f32.gmra.mrb[42].mxu1 %vm561_vm1, %v1757_v45  ;;  %4675 = vmatprep.subr.bf16.mxu0 %v4674_v52  ;;  %v5053_v40 = vunpack.i.h.bf16 %v5051_v49  ;;  %v5052_v8 = vunpack.i.l.bf16 %v5051_v49 }
 0x559   : > { %4248 = vmatprep.mubr.msk.f32.mxu1 %vm561_vm1, %v1759_v62  ;;  %4677 = vmatpush3.bf16.msra.mxu0 %v4674_v52  ;;  %v5063_v62 = vunpack.i.h.bf16 %v5061_v50 }
 0x55a   : > { %4679 = vmatprep.subr.bf16.mxu0 %v4678_v51  ;;  %v4686_v45 = vpack.c.bf16 %v5053_v40, %v5052_v8 }
 0x55b   : > { %v5056_v19 = vpop.permute.xlu1 %5055  ;;  %v4694_v52 = vpack.c.bf16 %v5063_v62, %v5062_v14 }
 0x55c   : > { %4249 = vmatmul.mubr.msk.f32.gmra.mrb[44].mxu1 %vm561_vm1, %v1761_v31  ;;  %v5058_v12 = vunpack.i.h.bf16 %v5056_v19  ;;  %v5057_v33 = vunpack.i.l.bf16 %v5056_v19 }
 0x55d   : > { %4251 = vmatprep.mubr.msk.f32.mxu1 %vm561_vm1, %v1763_v44  ;;  %4681 = vmatpush3.bf16.msra.mxu0 %v4678_v51  ;;  %v5071_v44 = vpop.permute.xlu0 %5070 }
 0x55e   : > { %4683 = vmatprep.subr.bf16.mxu0 %v4682_v1  ;;  %v4690_v55 = vpack.c.bf16 %v5058_v12, %v5057_v33  ;;  %v5073_v49 = vunpack.i.h.bf16 %v5071_v44  ;;  %v5072_v16 = vunpack.i.l.bf16 %v5071_v44 }
 0x55f   : > { %v5066_v58 = vpop.permute.xlu1 %5065 }
 0x560   : > { %4252 = vmatmul.mubr.msk.f32.gmra.mrb[46].mxu1 %vm561_vm1, %v1765_v11  ;;  %v5068_v31 = vunpack.i.h.bf16 %v5066_v58  ;;  %v5067_v38 = vunpack.i.l.bf16 %v5066_v58  ;;  %v6307_v11 = vpack.c.bf16 %v5073_v49, %v5072_v16 }
 0x561   : > { %4685 = vmatpush3.bf16.msra.mxu0 %v4682_v1 }
 0x562   : > { %4687 = vmatprep.subr.bf16.mxu0 %v4686_v45  ;;  %v4698_v26 = vpack.c.bf16 %v5068_v31, %v5067_v38 }
 0x565   : > { %4689 = vmatpush3.bf16.msra.mxu0 %v4686_v45 }
 0x566   : > { %4691 = vmatprep.subr.bf16.mxu0 %v4690_v55 }
 0x569   : > { %4693 = vmatpush3.bf16.msra.mxu0 %v4690_v55 }
 0x56a   : > { %4695 = vmatprep.subr.bf16.mxu0 %v4694_v52 }
 0x56d   : > { %4697 = vmatpush3.bf16.msra.mxu0 %v4694_v52 }
 0x56e   : > { %4699 = vmatprep.subr.bf16.mxu0 %v4698_v26 }
 0x571   : > { %4701 = vmatpush3.bf16.msra.mxu0 %v4698_v26 }
 0x572   : > { %4704 = vmatprep.subr.msk.bf16.mxu0 %vm5624_vm2, %v6307_v11 }
 0x5be   : > { %v6312_v51 = vpop.f32.mrb[16].mxu1 }
 0x5bf   : > { %7252 = vst [vmem:[#allocation48_spill] sm:$0xff] %v6312_v51  ;;  %v6314_v40 = vpop.f32.mrb[17].mxu1 }
 0x5c0   : > { %7253 = vst [vmem:[#allocation49_spill] sm:$0xff] %v6314_v40 }
 0x5f3   : > { %v6316_v8 = vpop.f32.mrb[18].mxu1 }
 0x5f4   : > { %7254 = vst [vmem:[#allocation50_spill] sm:$0xff] %v6316_v8  ;;  %v6318_v1 = vpop.f32.mrb[19].mxu1 }
 0x5f5   : > { %7255 = vst [vmem:[#allocation51_spill] sm:$0xff] %v6318_v1 }
 0x5f7   : > { %v6320_v19 = vpop.f32.mrb[20].mxu1 }
 0x5f8   : > { %7256 = vst [vmem:[#allocation52_spill] sm:$0xff] %v6320_v19  ;;  %v6322_v12 = vpop.f32.mrb[21].mxu1 }
 0x5f9   : > { %7257 = vst [vmem:[#allocation53_spill] sm:$0xff] %v6322_v12 }
 0x5ff   : > { %v6324_v33 = vpop.f32.mrb[22].mxu1 }
 0x600   : > { %7258 = vst [vmem:[#allocation54_spill] sm:$0xff] %v6324_v33  ;;  %v6326_v45 = vpop.f32.mrb[23].mxu1 }
 0x601   : > { %7259 = vst [vmem:[#allocation55_spill] sm:$0xff] %v6326_v45 }
 0x607   : > { %v6328_v50 = vpop.f32.mrb[24].mxu1 }
 0x608   : > { %7260 = vst [vmem:[#allocation56_spill] sm:$0xff] %v6328_v50  ;;  %v6330_v62 = vpop.f32.mrb[25].mxu1 }
 0x609   : > { %7261 = vst [vmem:[#allocation57_spill] sm:$0xff] %v6330_v62 }
 0x60b   : > { %v6332_v14 = vpop.f32.mrb[26].mxu1 }
 0x60c   : > { %7262 = vst [vmem:[#allocation58_spill] sm:$0xff] %v6332_v14  ;;  %v6334_v55 = vpop.f32.mrb[27].mxu1 }
 0x60d   : > { %7263 = vst [vmem:[#allocation59_spill] sm:$0xff] %v6334_v55 }
 0x60f   : > { %v6336_v58 = vpop.f32.mrb[28].mxu1 }
 0x610   : > { %7264 = vst [vmem:[#allocation60_spill] sm:$0xff] %v6336_v58  ;;  %v6338_v31 = vpop.f32.mrb[29].mxu1 }
 0x611   : > { %7265 = vst [vmem:[#allocation61_spill] sm:$0xff] %v6338_v31 }
 0x613   : > { %v6340_v38 = vpop.f32.mrb[30].mxu1 }
 0x614   : > { %7266 = vst [vmem:[#allocation62_spill] sm:$0xff] %v6340_v38  ;;  %v6342_v52 = vpop.f32.mrb[31].mxu1 }
 0x615   : > { %7267 = vst [vmem:[#allocation63_spill] sm:$0xff] %v6342_v52 }
 0x617   : > { %v4232_v44 = vpop.f32.mrb[32].mxu1 }
 0x618   : > { %v6345_v49 = vadd.f32 %v4232_v44, %v5751_v56  ;;  %v1928_v16 = vpop.f32.mrb[33].mxu1 }
 0x619   : > { %v6348_v26 = vadd.f32 %v1928_v16, %v5754_v60 }
 0x61a   : > { %2009 = vmax.xlane.f32.xlu0 %v6345_v49 }
 0x61b   : > { %v4235_v14 = vpop.f32.mrb[34].mxu1  ;;  %2007 = vmax.xlane.f32.xlu1 %v6348_v26 }
 0x61c   : > { %v1938_v55 = vpop.f32.mrb[35].mxu1  ;;  %v6357_v8 = vadd.f32 %v4235_v14, %v5783_v22 }
 0x61d   : > { %v6360_v1 = vadd.f32 %v1938_v55, %v5786_v25 }
 0x61f   : > { %v4238_v58 = vpop.f32.mrb[36].mxu1 }
 0x620   : > { %v1948_v31 = vpop.f32.mrb[37].mxu1  ;;  %v6365_v51 = vadd.f32 %v4238_v58, %v5799_v34 }
 0x621   : > { %v6368_v40 = vadd.f32 %v1948_v31, %v5802_v36 }
 0x623   : > { %v4241_v50 = vpop.f32.mrb[38].mxu1 }
 0x624   : > { %v1958_v38 = vpop.f32.mrb[39].mxu1  ;;  %v6376_v55 = vadd.f32 %v4241_v50, %v5820_v4 }
 0x625   : > { %v6384_v31 = vadd.f32 %v1958_v38, %v5838_v21 }
 0x627   : > { %v4244_v62 = vpop.f32.mrb[40].mxu1 }
 0x628   : > { %v1968_v52 = vpop.f32.mrb[41].mxu1  ;;  %v6392_v50 = vadd.f32 %v4244_v62, %v7238_v0 }
 0x62b   : > { %v4247_v45 = vpop.f32.mrb[42].mxu1 }
 0x62c   : > { %v1978_v19 = vpop.f32.mrb[43].mxu1  ;;  %5095 = vrot.lane.b32.xlu1 %v5580_v54, %s5422_s17  ;;  %v6373_v14 = vadd.f32 %v4247_v45, %v5817_v2 }
 0x62d   : > { %v6401_v38 = vadd.f32 %v1978_v19, %v5879_v17 }
 0x62f   : > { %v4250_v44 = vpop.f32.mrb[44].mxu1 }
 0x630   : > { %5100 = vrot.lane.b32.xlu0 %v5590_v59, %s5422_s17  ;;  %v1988_v16 = vpop.f32.mrb[45].mxu1  ;;  %v6381_v58 = vadd.f32 %v4250_v44, %v5835_v20  ;;  %v6397_v44 = vadd.f32 %v1968_v52, %v5868_v18 }
 0x633   : > { %v4253_v12 = vpop.f32.mrb[46].mxu1 }
 0x634   : > { %v1998_v33 = vpop.f32.mrb[47].mxu1  ;;  %v6409_v62 = vadd.f32 %v4253_v12, %v5898_v5 }
 0x635   : > { %v6389_v45 = vadd.f32 %v1998_v33, %v5852_v29  ;;  %v6405_v33 = vadd.f32 %v1988_v16, %v5889_v57 }
 0x64f   : > { %2013 = vmax.xlane.f32.xlu0 %v6357_v8 }
 0x650   : > { %2011 = vmax.xlane.f32.xlu1 %v6360_v1 }
 0x653   : > { %2017 = vmax.xlane.f32.xlu0 %v6365_v51 }
 0x654   : > { %2015 = vmax.xlane.f32.xlu1 %v6368_v40 }
 0x657   : > { %2029 = vmax.xlane.f32.xlu0 %v6373_v14 }
 0x658   : > { %2021 = vmax.xlane.f32.xlu1 %v6376_v55 }
 0x65b   : > { %2033 = vmax.xlane.f32.xlu0 %v6381_v58 }
 0x65c   : > { %2019 = vmax.xlane.f32.xlu1 %v6384_v31 }
 0x65f   : > { %2035 = vmax.xlane.f32.xlu0 %v6389_v45 }
 0x660   : > { %2025 = vmax.xlane.f32.xlu1 %v6392_v50 }
 0x664   : > { %2023 = vmax.xlane.f32.xlu1 %v6397_v44 }
 0x668   : > { %2027 = vmax.xlane.f32.xlu1 %v6401_v38 }
 0x66c   : > { %2031 = vmax.xlane.f32.xlu1 %v6405_v33 }
 0x670   : > { %2037 = vmax.xlane.f32.xlu1 %v6409_v62 }
 0x675   : > { %5105 = vrot.lane.b32.xlu0 %v5600_v63, %s5422_s17 }
 0x679   : > { %2344 = vrot.lane.b32.xlu0 %v5528_v28, %s5423_s20  ;;  %v7268_v28 = vld [vmem:[#allocation7_spill] sm:$0xff] }
 0x67d   : > { %2348 = vrot.lane.b32.xlu0 %v5671_v43, %s5423_s20  ;;  %v7269_v43 = vld [vmem:[#allocation5_spill] sm:$0xff] }
 0x681   : > { %2352 = vrot.lane.b32.xlu0 %v5681_v48, %s5423_s20  ;;  %2346 = vrot.lane.b32.xlu1 %v5668_v41, %s5423_s20  ;;  %v5076_v41 = vpop.permute.xlu0 %5075 }
 0x682   : > { %v5078_v12 = vunpack.i.h.bf16 %v5076_v41  ;;  %v5077_v52 = vunpack.i.l.bf16 %v5076_v41 }
 0x685   : > { %2356 = vrot.lane.b32.xlu0 %v5691_v32, %s5423_s20  ;;  %2350 = vrot.lane.b32.xlu1 %v5678_v46, %s5423_s20  ;;  %v7270_v46 = vld [vmem:[#allocation6_spill] sm:$0xff]  ;;  %v5081_v48 = vpop.permute.xlu0 %5080  ;;  %v7272_v32 = vld [vmem:[#allocation3_spill] sm:$0xff] }
 0x689   : > { %2360 = vrot.lane.b32.xlu0 %v5701_v37, %s5423_s20  ;;  %2354 = vrot.lane.b32.xlu1 %v5688_v24, %s5423_s20  ;;  %v7271_v24 = vld [vmem:[#allocation8_spill] sm:$0xff]  ;;  %v5086_v37 = vpop.permute.xlu1 %5085 }
 0x68a   : > { %v5087_v41 = vunpack.i.l.bf16 %v5086_v37 }
 0x68d   : > { %2364 = vrot.lane.b32.xlu0 %v5711_v42, %s5423_s20  ;;  %2358 = vrot.lane.b32.xlu1 %v5698_v30, %s5423_s20  ;;  %v5091_v30 = vpop.permute.xlu0 %5090 }
 0x691   : > { %2368 = vrot.lane.b32.xlu0 %v5721_v47, %s5423_s20  ;;  %2362 = vrot.lane.b32.xlu1 %v5708_v35, %s5423_s20  ;;  %v7273_v35 = vld [vmem:[#allocation4_spill] sm:$0xff] }
 0x695   : > { %2372 = vrot.lane.b32.xlu0 %v7268_v28, %s5423_s20  ;;  %2366 = vrot.lane.b32.xlu1 %v7269_v43, %s5423_s20  ;;  %v5088_v43 = vunpack.i.h.bf16 %v5086_v37 }
 0x699   : > { %5110 = vrot.lane.b32.xlu0 %v5526_v27, %s5424_s21  ;;  %2370 = vrot.lane.b32.xlu1 %v7270_v46, %s5423_s20  ;;  %v4720_v46 = vpack.c.bf16 %v5088_v43, %v5087_v41 }
 0x69d   : > { %5115 = vrot.lane.b32.xlu0 %v7242_v13, %s5424_s21  ;;  %2374 = vrot.lane.b32.xlu1 %v7271_v24, %s5423_s20  ;;  %v5092_v24 = vunpack.i.l.bf16 %v5091_v30 }
 0x6a1   : > { %5120 = vrot.lane.b32.xlu0 %v5550_v39, %s5424_s21  ;;  %5125 = vrot.lane.b32.xlu1 %v7272_v32, %s5424_s21 }
 0x6a5   : > { %5130 = vrot.lane.b32.xlu0 %v7273_v35, %s5424_s21  ;;  %5135 = vrot.lane.b32.xlu1 %v5580_v54, %s5424_s21  ;;  %v4708_v54 = vpack.c.bf16 %v5078_v12, %v5077_v52 }
 0x6a7   : > { %v2010_v27 = vpop.xlane.xlu0 %2009 }
 0x6a8   : > { %v2040_v42 = vsub.f32 %v6345_v49, %v2010_v27  ;;  %v2008_v47 = vpop.xlane.xlu1 %2007  ;;  %v5082_v49 = vunpack.i.l.bf16 %v5081_v48 }
 0x6a9   : > { %v2039_v13 = vsub.f32 %v6348_v26, %v2008_v47  ;;  %5140 = vrot.lane.b32.xlu0 %v5590_v59, %s5424_s21  ;;  %v5083_v59 = vunpack.i.h.bf16 %v5081_v48 }
 0x6aa   : > { %v2057_v39 = vmul.f32 1.442695, %v2040_v42 }
 0x6ab   : > { %v2055_v19 = vmul.f32 1.442695, %v2039_v13  ;;  %v4714_v26 = vpack.c.bf16 %v5083_v59, %v5082_v49  ;;  %v5101_v37 = vpop.permute.xlu0 %5100 }
 0x6ac   : > { %v5096_v48 = vpop.permute.xlu1 %5095  ;;  %v5102_v13 = vunpack.i.l.bf16 %v5101_v37 }
 0x6ad   : > { %5213 = vpow2.f32 %v2055_v19  ;;  %v5098_v35 = vunpack.i.h.bf16 %v5096_v48  ;;  %v5097_v27 = vunpack.i.l.bf16 %v5096_v48 }
 0x6ae   : > { %5215 = vpow2.f32 %v2057_v39 }
 0x6af   : > { %v4732_v42 = vpack.c.bf16 %v5098_v35, %v5097_v27 }
 0x6b7   : > { %v6446_v16 = vpop.eup %5213 }
 0x6b8   : > { %v6448_v28 = vpop.eup %5215  ;;  %4286 = vmatprep.mubr.f32.mxu0 %v6446_v16 }
 0x6b9   : > { %4287 = vmatmul.mubr.f32.vlgmr.msra.gmra.mrb[48].mxu0 %v6448_v28 }
 0x6ba   : > { %4707 = vmatpush3.bf16.xpose.msk.msra.mxu0 %vm5624_vm2, %v6307_v11  ;;  %v5093_v11 = vunpack.i.h.bf16 %v5091_v30  ;;  %v5103_v30 = vunpack.i.h.bf16 %v5101_v37 }
 0x6bb   : > { %4710 = vmatprep.subr.msk.bf16.mxu0 %vm5624_vm2, %v4708_v54 }
 0x6bc   : > { %v4726_v32 = vpack.c.bf16 %v5093_v11, %v5092_v24  ;;  %v4738_v49 = vpack.c.bf16 %v5103_v30, %v5102_v13 }
 0x6c2   : > { %4713 = vmatpush3.bf16.xpose.msk.msra.mxu0 %vm5624_vm2, %v4708_v54 }
 0x6c3   : > { %4716 = vmatprep.subr.msk.bf16.mxu0 %vm5624_vm2, %v4714_v26 }
 0x6ca   : > { %4719 = vmatpush3.bf16.xpose.msk.msra.mxu0 %vm5624_vm2, %v4714_v26 }
 0x6cb   : > { %4722 = vmatprep.subr.msk.bf16.mxu0 %vm5624_vm2, %v4720_v46 }
 0x6d2   : > { %4725 = vmatpush3.bf16.xpose.msk.msra.mxu0 %vm5624_vm2, %v4720_v46 }
 0x6d3   : > { %4728 = vmatprep.subr.msk.bf16.mxu0 %vm5624_vm2, %v4726_v32 }
 0x6da   : > { %4731 = vmatpush3.bf16.xpose.msk.msra.mxu0 %vm5624_vm2, %v4726_v32 }
 0x6db   : > { %4734 = vmatprep.subr.msk.bf16.mxu0 %vm5624_vm2, %v4732_v42 }
 0x6dc   : > { %v2014_v47 = vpop.xlane.xlu0 %2013 }
 0x6dd   : > { %v2042_v39 = vsub.f32 %v6357_v8, %v2014_v47  ;;  %v2012_v19 = vpop.xlane.xlu1 %2011 }
 0x6de   : > { %v2041_v12 = vsub.f32 %v6360_v1, %v2012_v19 }
 0x6df   : > { %v2061_v52 = vmul.f32 1.442695, %v2042_v39 }
 0x6e0   : > { %v2059_v54 = vmul.f32 1.442695, %v2041_v12  ;;  %v2018_v59 = vpop.xlane.xlu0 %2017 }
 0x6e1   : > { %v2044_v26 = vsub.f32 %v6365_v51, %v2018_v59  ;;  %v2016_v43 = vpop.xlane.xlu1 %2015 }
 0x6e2   : > { %5217 = vpow2.f32 %v2059_v54  ;;  %v2043_v41 = vsub.f32 %v6368_v40, %v2016_v43  ;;  %4737 = vmatpush3.bf16.xpose.msk.msra.mxu0 %vm5624_vm2, %v4732_v42 }
 0x6e3   : > { %5219 = vpow2.f32 %v2061_v52  ;;  %v2065_v46 = vmul.f32 1.442695, %v2044_v26  ;;  %4740 = vmatprep.subr.msk.bf16.mxu0 %vm5624_vm2, %v4738_v49 }
 0x6e4   : > { %v2063_v8 = vmul.f32 1.442695, %v2043_v41  ;;  %v2030_v1 = vpop.xlane.xlu0 %2029 }
 0x6e5   : > { %v2022_v11 = vpop.xlane.xlu1 %2021  ;;  %v2050_v54 = vsub.f32 %v6373_v14, %v2030_v1 }
 0x6e6   : > { %5221 = vpow2.f32 %v2063_v8  ;;  %v2046_v24 = vsub.f32 %v6376_v55, %v2022_v11 }
 0x6e7   : > { %5223 = vpow2.f32 %v2065_v46  ;;  %v2077_v46 = vmul.f32 1.442695, %v2050_v54 }
 0x6e8   : > { %v2034_v51 = vpop.xlane.xlu0 %2033  ;;  %v2069_v40 = vmul.f32 1.442695, %v2046_v24 }
 0x6e9   : > { %v2020_v32 = vpop.xlane.xlu1 %2019 }
 0x6ea   : > { %v2045_v48 = vsub.f32 %v6384_v31, %v2020_v32  ;;  %4743 = vmatpush3.bf16.xpose.msk.msra.mxu0 %vm5624_vm2, %v4738_v49 }
 0x6ec   : > { %v6485_v35 = vpop.eup %5217  ;;  %v2067_v27 = vmul.f32 1.442695, %v2045_v48  ;;  %v2036_v37 = vpop.xlane.xlu0 %2035 }
 0x6ed   : > { %v6487_v42 = vpop.eup %5219  ;;  %4289 = vmatprep.mubr.f32.mxu0 %v6485_v35  ;;  %v2026_v47 = vpop.xlane.xlu1 %2025  ;;  %v2053_v14 = vsub.f32 %v6389_v45, %v2036_v37 }
 0x6ee   : > { %5225 = vpow2.f32 %v2067_v27  ;;  %4290 = vmatmul.mubr.f32.gmra.mrb[50].mxu0 %v6487_v42  ;;  %v2048_v55 = vsub.f32 %v6392_v50, %v2026_v47 }
 0x6ef   : > { %5227 = vpow2.f32 %v2069_v40 }
 0x6f0   : > { %v6492_v31 = vpop.eup %5221  ;;  %v5106_v30 = vpop.permute.xlu0 %5105  ;;  %v2073_v59 = vmul.f32 1.442695, %v2048_v55 }
 0x6f1   : > { %v6494_v13 = vpop.eup %5223  ;;  %v5108_v39 = vunpack.i.h.bf16 %v5106_v30  ;;  %v5107_v19 = vunpack.i.l.bf16 %v5106_v30  ;;  %4292 = vmatprep.mubr.f32.mxu0 %v6492_v31  ;;  %v2024_v12 = vpop.xlane.xlu1 %2023 }
 0x6f2   : > { %v2047_v52 = vsub.f32 %v6397_v44, %v2024_v12  ;;  %4293 = vmatmul.mubr.f32.gmra.mrb[52].mxu0 %v6494_v13  ;;  %v2052_v44 = vsub.f32 %v6381_v58, %v2034_v51  ;;  %v2083_v58 = vmul.f32 1.442695, %v2053_v14 }
 0x6f3   : > { %v4744_v49 = vpack.c.bf16 %v5108_v39, %v5107_v19 }
 0x6f4   : > { %v2071_v26 = vmul.f32 1.442695, %v2047_v52  ;;  %v2345_v50 = vpop.permute.xlu0 %2344  ;;  %v2081_v3 = vmul.f32 1.442695, %v2052_v44 }
 0x6f5   : > { %v2028_v43 = vpop.xlane.xlu1 %2027  ;;  %4746 = vmatprep.subr.msk.bf16.mxu0 %vm5624_vm2, %v4744_v49 }
 0x6f6   : > { %5229 = vpow2.f32 %v2071_v26  ;;  %v2049_v41 = vsub.f32 %v6401_v38, %v2028_v43  ;;  %4749 = vmatpush3.bf16.xpose.msk.msra.mxu0 %vm5624_vm2, %v4744_v49  ;;  %vm3162_vm2 = vcmask 130048  }
 0x6f7   : > { %5231 = vpow2.f32 %v2073_v59 }
 0x6f8   : > { %v6506_v8 = vpop.eup %5225  ;;  %v2075_v1 = vmul.f32 1.442695, %v2049_v41  ;;  %v2349_v11 = vpop.permute.xlu0 %2348 }
 0x6f9   : > { %v6509_v24 = vpop.eup %5227  ;;  %4295 = vmatprep.mubr.f32.mxu0 %v6506_v8  ;;  %v2032_v32 = vpop.xlane.xlu1 %2031 }
 0x6fa   : > { %5233 = vpow2.f32 %v2075_v1  ;;  %v2051_v38 = vsub.f32 %v6405_v33, %v2032_v32  ;;  %4296 = vmatmul.mubr.f32.gmra.mrb[54].mxu0 %v6509_v24 }
 0x6fb   : > { %5235 = vpow2.f32 %v2077_v46 }
 0x6fc   : > { %v2079_v51 = vmul.f32 1.442695, %v2051_v38  ;;  %v2353_v48 = vpop.permute.xlu0 %2352 }
 0x6fd   : > { %v2038_v40 = vpop.xlane.xlu1 %2037 }
 0x6fe   : > { %5237 = vpow2.f32 %v2079_v51  ;;  %v2054_v45 = vsub.f32 %v6409_v62, %v2038_v40 }
 0x6ff   : > { %5239 = vpow2.f32 %v2081_v3 }
 0x700   : > { %v6515_v27 = vpop.eup %5229  ;;  %5241 = vpow2.f32 %v2083_v58  ;;  %v2085_v37 = vmul.f32 1.442695, %v2054_v45  ;;  %v2357_v47 = vpop.permute.xlu0 %2356 }
 0x701   : > { %v6517_v55 = vpop.eup %5231  ;;  %4298 = vmatprep.mubr.f32.mxu0 %v6515_v27  ;;  %v2347_v33 = vpop.permute.xlu1 %2346 }
 0x702   : > { %5243 = vpow2.f32 %v2085_v37  ;;  %4299 = vmatmul.mubr.f32.gmra.mrb[56].mxu0 %v6517_v55 }
 0x704   : > { %v6521_v30 = vpop.eup %5233  ;;  %v2361_v39 = vpop.permute.xlu0 %2360 }
 0x705   : > { %v6523_v19 = vpop.eup %5235  ;;  %4301 = vmatprep.mubr.f32.mxu0 %v6521_v30  ;;  %v2351_v62 = vpop.permute.xlu1 %2350 }
 0x706   : > { %4302 = vmatmul.mubr.f32.gmra.mrb[58].mxu0 %v6523_v19 }
 0x708   : > { %v6527_v12 = vpop.eup %5237  ;;  %v2365_v52 = vpop.permute.xlu0 %2364 }
 0x709   : > { %v6529_v54 = vpop.eup %5239  ;;  %4304 = vmatprep.mubr.f32.mxu0 %v6527_v12  ;;  %v2355_v59 = vpop.permute.xlu1 %2354 }
 0x70a   : > { %v6532_v49 = vpop.eup %5241  ;;  %4305 = vmatmul.mubr.f32.gmra.mrb[60].mxu0 %v6529_v54 }
 0x70b   : > { %4307 = vmatprep.mubr.f32.mxu0 %v6532_v49 }
 0x70c   : > { %v6536_v26 = vpop.eup %5243  ;;  %v2369_v43 = vpop.permute.xlu0 %2368 }
 0x70d   : > { %v2359_v41 = vpop.permute.xlu1 %2358 }
 0x70e   : > { %4308 = vmatmul.mubr.f32.gmra.mrb[62].mxu0 %v6536_v26 }
 0x70f   : > { %4342 = vmatprep.mubr.msk.f32.mxu0 %vm561_vm1, %v2345_v50 }
 0x710   : > { %v6540_v46 = vpop.permute.xlu0 %2372 }
 0x711   : > { %v2363_v44 = vpop.permute.xlu1 %2362 }
 0x712   : > { %4343 = vmatmul.mubr.msk.f32.vlgmr.msra.gmra.mrb[64].mxu0 %vm561_vm1, %v2347_v33 }
 0x713   : > { %4345 = vmatprep.mubr.msk.f32.mxu0 %vm561_vm1, %v2349_v11 }
 0x714   : > { %v5111_v14 = vpop.permute.xlu0 %5110 }
 0x715   : > { %v5113_v1 = vunpack.i.h.bf16 %v5111_v14  ;;  %v5112_v32 = vunpack.i.l.bf16 %v5111_v14  ;;  %v2367_v38 = vpop.permute.xlu1 %2366 }
 0x716   : > { %4346 = vmatmul.mubr.msk.f32.gmra.mrb[66].mxu0 %vm561_vm1, %v2351_v62 }
 0x717   : > { %v4750_v3 = vpack.c.bf16 %v5113_v1, %v5112_v32  ;;  %4348 = vmatprep.mubr.msk.f32.mxu0 %vm561_vm1, %v2353_v48 }
 0x718   : > { %v5116_v58 = vpop.permute.xlu0 %5115 }
 0x719   : > { %v5118_v51 = vunpack.i.h.bf16 %v5116_v58  ;;  %v5117_v40 = vunpack.i.l.bf16 %v5116_v58  ;;  %4790 = vmatprep.subr.bf16.mxu1 %v4750_v3  ;;  %v2371_v50 = vpop.permute.xlu1 %2370  ;;  %4751 = vmatprep.subr.bf16.mxu0 %v4750_v3 }
 0x71a   : > { %4349 = vmatmul.mubr.msk.f32.gmra.mrb[68].mxu0 %vm561_vm1, %v2355_v59  ;;  %4798 = vmatpush3.bf16.msra.mxu1 %v4750_v3 }
 0x71b   : > { %v4754_v45 = vpack.c.bf16 %v5118_v51, %v5117_v40  ;;  %4753 = vmatpush3.bf16.msra.mxu0 %v4750_v3  ;;  %4351 = vmatprep.mubr.msk.f32.mxu0 %vm561_vm1, %v2357_v47 }
 0x71c   : > { %v5121_v11 = vpop.permute.xlu0 %5120 }
 0x71d   : > { %v5123_v37 = vunpack.i.h.bf16 %v5121_v11  ;;  %v5122_v33 = vunpack.i.l.bf16 %v5121_v11  ;;  %4791 = vmatprep.subr.bf16.mxu1 %v4754_v45  ;;  %v2375_v62 = vpop.permute.xlu1 %2374  ;;  %4755 = vmatprep.subr.bf16.mxu0 %v4754_v45 }
 0x71e   : > { %4352 = vmatmul.mubr.msk.f32.gmra.mrb[70].mxu0 %vm561_vm1, %v2359_v41  ;;  %4799 = vmatpush3.bf16.msra.mxu1 %v4754_v45 }
 0x71f   : > { %v4758_v48 = vpack.c.bf16 %v5123_v37, %v5122_v33  ;;  %4757 = vmatpush3.bf16.msra.mxu0 %v4754_v45  ;;  %4354 = vmatprep.mubr.msk.f32.mxu0 %vm561_vm1, %v2361_v39 }
 0x720   : > { %v5131_v14 = vpop.permute.xlu0 %5130 }
 0x721   : > { %4792 = vmatprep.subr.bf16.mxu1 %v4758_v48  ;;  %v5126_v59 = vpop.permute.xlu1 %5125  ;;  %4759 = vmatprep.subr.bf16.mxu0 %v4758_v48  ;;  %v5133_v47 = vunpack.i.h.bf16 %v5131_v14  ;;  %v5132_v3 = vunpack.i.l.bf16 %v5131_v14 }
 0x722   : > { %v5128_v1 = vunpack.i.h.bf16 %v5126_v59  ;;  %v5127_v32 = vunpack.i.l.bf16 %v5126_v59  ;;  %4355 = vmatmul.mubr.msk.f32.gmra.mrb[72].mxu0 %vm561_vm1, %v2363_v44  ;;  %4800 = vmatpush3.bf16.msra.mxu1 %v4758_v48 }
 0x723   : > { %4761 = vmatpush3.bf16.msra.mxu0 %v4758_v48  ;;  %4357 = vmatprep.mubr.msk.f32.mxu0 %vm561_vm1, %v2365_v52  ;;  %v4766_v39 = vpack.c.bf16 %v5133_v47, %v5132_v3 }
 0x724   : > { %v4762_v41 = vpack.c.bf16 %v5128_v1, %v5127_v32  ;;  %v5141_v45 = vpop.permute.xlu0 %5140 }
 0x725   : > { %v5136_v58 = vpop.permute.xlu1 %5135  ;;  %v5143_v44 = vunpack.i.h.bf16 %v5141_v45  ;;  %v5142_v52 = vunpack.i.l.bf16 %v5141_v45 }
 0x726   : > { %4358 = vmatmul.mubr.msk.f32.gmra.mrb[74].mxu0 %vm561_vm1, %v2367_v38  ;;  %4763 = vmatprep.subr.bf16.mxu0 %v4762_v41  ;;  %v5138_v51 = vunpack.i.h.bf16 %v5136_v58  ;;  %v5137_v40 = vunpack.i.l.bf16 %v5136_v58 }
 0x727   : > { %4793 = vmatprep.subr.bf16.mxu1 %v4762_v41  ;;  %4360 = vmatprep.mubr.msk.f32.mxu0 %vm561_vm1, %v2369_v43  ;;  %v4774_v43 = vpack.c.bf16 %v5143_v44, %v5142_v52 }
 0x728   : > { %4765 = vmatpush3.bf16.msra.mxu0 %v4762_v41  ;;  %4801 = vmatpush3.bf16.msra.mxu1 %v4762_v41  ;;  %v4770_v11 = vpack.c.bf16 %v5138_v51, %v5137_v40 }
 0x729   : > { %4767 = vmatprep.subr.bf16.mxu0 %v4766_v39  ;;  %4794 = vmatprep.subr.bf16.mxu1 %v4766_v39 }
 0x72a   : > { %4361 = vmatmul.mubr.msk.f32.gmra.mrb[76].mxu0 %vm561_vm1, %v2371_v50 }
 0x72b   : > { %4363 = vmatprep.mubr.msk.f32.mxu0 %vm561_vm1, %v6540_v46 }
 0x72c   : > { %4769 = vmatpush3.bf16.msra.mxu0 %v4766_v39  ;;  %4802 = vmatpush3.bf16.msra.mxu1 %v4766_v39 }
 0x72d   : > { %4771 = vmatprep.subr.bf16.mxu0 %v4770_v11  ;;  %4795 = vmatprep.subr.bf16.mxu1 %v4770_v11 }
 0x72e   : > { %4364 = vmatmul.mubr.msk.f32.gmra.mrb[78].mxu0 %vm561_vm1, %v2375_v62 }
 0x730   : > { %4773 = vmatpush3.bf16.msra.mxu0 %v4770_v11  ;;  %4803 = vmatpush3.bf16.msra.mxu1 %v4770_v11 }
 0x731   : > { %4775 = vmatprep.subr.bf16.mxu0 %v4774_v43  ;;  %4796 = vmatprep.subr.bf16.mxu1 %v4774_v43 }
 0x734   : > { %4777 = vmatpush3.bf16.msra.mxu0 %v4774_v43  ;;  %4804 = vmatpush3.bf16.msra.mxu1 %v4774_v43 }
 0x78c   : > { %v6558_v38 = vpop.f32.mrb[48].mxu0 }
 0x78d   : > { %v6560_v50 = vpop.f32.mrb[49].mxu0 }
 0x7c1   : > { %v6562_v37 = vpop.f32.mrb[50].mxu0 }
 0x7c2   : > { %v6564_v46 = vpop.f32.mrb[51].mxu0 }
 0x7c5   : > { %v6566_v33 = vpop.f32.mrb[52].mxu0 }
 0x7c6   : > { %v6568_v48 = vpop.f32.mrb[53].mxu0 }
 0x7cd   : > { %v6570_v62 = vpop.f32.mrb[54].mxu0 }
 0x7ce   : > { %v6572_v14 = vpop.f32.mrb[55].mxu0 }
 0x7d5   : > { %v6574_v59 = vpop.f32.mrb[56].mxu0 }
 0x7d6   : > { %v6576_v1 = vpop.f32.mrb[57].mxu0 }
 0x7d7   : > { %7274 = vst [vmem:[#allocation7_spill] sm:$0xff] %v6576_v1 }
 0x7d9   : > { %v6578_v32 = vpop.f32.mrb[58].mxu0 }
 0x7da   : > { %v6580_v47 = vpop.f32.mrb[59].mxu0 }
 0x7db   : > { %7275 = vst [vmem:[#allocation5_spill] sm:$0xff] %v6580_v47 }
 0x7dd   : > { %v6582_v3 = vpop.f32.mrb[60].mxu0 }
 0x7de   : > { %7276 = vst [vmem:[#allocation6_spill] sm:$0xff] %v6582_v3  ;;  %v6584_v41 = vpop.f32.mrb[61].mxu0  ;;  %v7281_v3 = vld [vmem:[#allocation2_spill] sm:$0xff] }
 0x7df   : > { %7277 = vst [vmem:[#allocation8_spill] sm:$0xff] %v6584_v41 }
 0x7e1   : > { %v6586_v58 = vpop.f32.mrb[62].mxu0 }
 0x7e2   : > { %7278 = vst [vmem:[#allocation3_spill] sm:$0xff] %v6586_v58  ;;  %v6588_v39 = vpop.f32.mrb[63].mxu0 }
 0x7e3   : > { %7279 = vst [vmem:[#allocation4_spill] sm:$0xff] %v6588_v39 }
 0x7e5   : > { %v4344_v51 = vpop.f32.mrb[64].mxu0 }
 0x7e6   : > { %v6591_v40 = vadd.f32 %v4344_v51, %v5751_v56  ;;  %v2538_v45 = vpop.f32.mrb[65].mxu0 }
 0x7e7   : > { %v6594_v44 = vadd.f32 %v2538_v45, %v5754_v60 }
 0x7e8   : > { %2619 = vmax.xlane.f32.xlu0 %v6591_v40 }
 0x7e9   : > { %v4347_v52 = vpop.f32.mrb[66].mxu0  ;;  %2617 = vmax.xlane.f32.xlu1 %v6594_v44 }
 0x7ea   : > { %v6599_v11 = vadd.f32 %v4347_v52, %v5783_v22  ;;  %v2548_v43 = vpop.f32.mrb[67].mxu0 }
 0x7eb   : > { %v6606_v51 = vadd.f32 %v2548_v43, %v5786_v25 }
 0x7ed   : > { %v4350_v58 = vpop.f32.mrb[68].mxu0  ;;  %2623 = vmax.xlane.f32.xlu1 %v6599_v11 }
 0x7ee   : > { %v6603_v39 = vadd.f32 %v4350_v58, %v5799_v34  ;;  %v2558_v56 = vpop.f32.mrb[69].mxu0 }
 0x7ef   : > { %v6611_v22 = vadd.f32 %v2558_v56, %v5802_v36 }
 0x7f0   : > { %2627 = vmax.xlane.f32.xlu0 %v6603_v39 }
 0x7f1   : > { %v4353_v60 = vpop.f32.mrb[70].mxu0  ;;  %2621 = vmax.xlane.f32.xlu1 %v6606_v51 }
 0x7f2   : > { %v2568_v45 = vpop.f32.mrb[71].mxu0  ;;  %v6618_v58 = vadd.f32 %v4353_v60, %v5820_v4 }
 0x7f3   : > { %v6623_v47 = vadd.f32 %v2568_v45, %v5838_v21 }
 0x7f5   : > { %v4356_v52 = vpop.f32.mrb[72].mxu0  ;;  %2625 = vmax.xlane.f32.xlu1 %v6611_v22 }
 0x7f6   : > { %v6615_v41 = vadd.f32 %v4356_v52, %v7238_v0  ;;  %v2578_v34 = vpop.f32.mrb[73].mxu0  ;;  %v7280_v0 = vld [vmem:[#allocation9_spill] sm:$0xff] }
 0x7f7   : > { %v6633_v4 = vadd.f32 %v2578_v34, %v5868_v18 }
 0x7f8   : > { %2635 = vmax.xlane.f32.xlu0 %v6615_v41 }
 0x7f9   : > { %v4359_v25 = vpop.f32.mrb[74].mxu0  ;;  %2631 = vmax.xlane.f32.xlu1 %v6618_v58 }
 0x7fa   : > { %v2588_v43 = vpop.f32.mrb[75].mxu0  ;;  %v6637_v21 = vadd.f32 %v4359_v25, %v5817_v2 }
 0x7fb   : > { %v6641_v60 = vadd.f32 %v2588_v43, %v5879_v17  ;;  %v7285_v17 = vld [vmem:[#allocation44_spill] sm:$0xff] }
 0x7fd   : > { %v4362_v36 = vpop.f32.mrb[76].mxu0  ;;  %2629 = vmax.xlane.f32.xlu1 %v6623_v47 }
 0x7fe   : > { %v2598_v56 = vpop.f32.mrb[77].mxu0 }
 0x801   : > { %v4365_v1 = vpop.f32.mrb[78].mxu0  ;;  %1477 = vadd.xlane.f32.xlu1 %v7280_v0 }
 0x802   : > { %v2608_v52 = vpop.f32.mrb[79].mxu0  ;;  %v6653_v2 = vadd.f32 %v4365_v1, %v5898_v5  ;;  %v7286_v5 = vld [vmem:[#allocation47_spill] sm:$0xff] }
 0x803   : > { %v6658_v18 = vadd.f32 %v2608_v52, %v5852_v29  ;;  %v7283_v29 = vld [vmem:[#allocation42_spill] sm:$0xff] }
 0x805   : > { %1479 = vadd.xlane.f32.xlu1 %v7281_v3  ;;  %v7302_v3 = vld [vmem:[#allocation22_spill] sm:$0xff] }
 0x809   : > { %2087 = vadd.xlane.f32.xlu1 %v6446_v16  ;;  %v6645_v16 = vadd.f32 %v4362_v36, %v5835_v20  ;;  %v7282_v20 = vld [vmem:[#allocation43_spill] sm:$0xff] }
 0x80d   : > { %2089 = vadd.xlane.f32.xlu1 %v6448_v28  ;;  %v7295_v28 = vld [vmem:[#allocation19_spill] sm:$0xff] }
 0x80e   : > { %5145 = vrot.lane.b32.xlu0 %v5600_v63, %s5424_s21  ;;  %v6649_v63 = vadd.f32 %v2598_v56, %v5889_v57  ;;  %v7284_v57 = vld [vmem:[#allocation45_spill] sm:$0xff] }
 0x811   : > { %2633 = vmax.xlane.f32.xlu1 %v6633_v4 }
 0x815   : > { %2639 = vmax.xlane.f32.xlu1 %v6637_v21 }
 0x819   : > { %2637 = vmax.xlane.f32.xlu1 %v6641_v60 }
 0x81d   : > { %2643 = vmax.xlane.f32.xlu1 %v6645_v16 }
 0x821   : > { %2641 = vmax.xlane.f32.xlu1 %v6649_v63 }
 0x825   : > { %2647 = vmax.xlane.f32.xlu1 %v6653_v2 }
 0x829   : > { %1483 = vadd.xlane.f32.xlu1 %v6239_v53  ;;  %v7288_v53 = vld [vmem:[#allocation11_spill] sm:$0xff] }
 0x82d   : > { %2645 = vmax.xlane.f32.xlu0 %v6658_v18  ;;  %2093 = vadd.xlane.f32.xlu1 %v6487_v42  ;;  %v7297_v42 = vld [vmem:[#allocation21_spill] sm:$0xff] }
 0x831   : > { %1481 = vadd.xlane.f32.xlu0 %v6237_v61  ;;  %1487 = vadd.xlane.f32.xlu1 %v6246_v15  ;;  %v7287_v61 = vld [vmem:[#allocation46_spill] sm:$0xff] }
 0x832   : > { %v7290_v15 = vld [vmem:[#allocation10_spill] sm:$0xff] }
 0x835   : > { %2091 = vadd.xlane.f32.xlu0 %v6485_v35  ;;  %2097 = vadd.xlane.f32.xlu1 %v6494_v13  ;;  %v7296_v35 = vld [vmem:[#allocation16_spill] sm:$0xff] }
 0x839   : > { %1485 = vadd.xlane.f32.xlu0 %v6244_v6  ;;  %1491 = vadd.xlane.f32.xlu1 %v6261_v10  ;;  %v7289_v6 = vld [vmem:[#allocation13_spill] sm:$0xff]  ;;  %v7292_v10 = vld [vmem:[#allocation12_spill] sm:$0xff] }
 0x83d   : > { %2095 = vadd.xlane.f32.xlu0 %v6492_v31  ;;  %2101 = vadd.xlane.f32.xlu1 %v6509_v24  ;;  %v7298_v24 = vld [vmem:[#allocation18_spill] sm:$0xff] }
 0x841   : > { %1489 = vadd.xlane.f32.xlu0 %v6258_v23  ;;  %1495 = vadd.xlane.f32.xlu1 %v6269_v7  ;;  %v7291_v23 = vld [vmem:[#allocation15_spill] sm:$0xff]  ;;  %v7294_v7 = vld [vmem:[#allocation14_spill] sm:$0xff] }
 0x845   : > { %2099 = vadd.xlane.f32.xlu0 %v6506_v8  ;;  %2105 = vadd.xlane.f32.xlu1 %v6517_v55 }
 0x849   : > { %1493 = vadd.xlane.f32.xlu0 %v6267_v9  ;;  %1499 = vadd.xlane.f32.xlu1 %v7282_v20  ;;  %v7293_v9 = vld [vmem:[#allocation17_spill] sm:$0xff] }
 0x84d   : > { %2103 = vadd.xlane.f32.xlu0 %v6515_v27  ;;  %2109 = vadd.xlane.f32.xlu1 %v6523_v19  ;;  %v7299_v27 = vld [vmem:[#allocation23_spill] sm:$0xff]  ;;  %v7300_v19 = vld [vmem:[#allocation20_spill] sm:$0xff] }
 0x851   : > { %1497 = vadd.xlane.f32.xlu0 %v7283_v29  ;;  %1503 = vadd.xlane.f32.xlu1 %v7284_v57 }
 0x855   : > { %2107 = vadd.xlane.f32.xlu0 %v6521_v30  ;;  %2113 = vadd.xlane.f32.xlu1 %v6529_v54 }
 0x859   : > { %1501 = vadd.xlane.f32.xlu0 %v7285_v17  ;;  %1507 = vadd.xlane.f32.xlu1 %v7286_v5 }
 0x85d   : > { %2111 = vadd.xlane.f32.xlu0 %v6527_v12  ;;  %2117 = vadd.xlane.f32.xlu1 %v6536_v26  ;;  %v7301_v12 = vld [vmem:[#allocation24_spill] sm:$0xff] }
 0x861   : > { %1505 = vadd.xlane.f32.xlu0 %v7287_v61  ;;  %869 = vadd.xlane.f32.xlu1 %v7288_v53 }
 0x865   : > { %2115 = vadd.xlane.f32.xlu0 %v6532_v49  ;;  %873 = vadd.xlane.f32.xlu1 %v7289_v6 }
 0x869   : > { %867 = vadd.xlane.f32.xlu0 %v7290_v15  ;;  %877 = vadd.xlane.f32.xlu1 %v7291_v23 }
 0x86d   : > { %871 = vadd.xlane.f32.xlu0 %v7292_v10  ;;  %881 = vadd.xlane.f32.xlu1 %v7293_v9 }
 0x871   : > { %875 = vadd.xlane.f32.xlu0 %v7294_v7  ;;  %885 = vadd.xlane.f32.xlu1 %v7295_v28 }
 0x875   : > { %879 = vadd.xlane.f32.xlu0 %v7296_v35  ;;  %889 = vadd.xlane.f32.xlu1 %v7297_v42  ;;  %v2620_v30 = vpop.xlane.xlu0 %2619 }
 0x876   : > { %v2618_v31 = vpop.xlane.xlu1 %2617  ;;  %v2650_v49 = vsub.f32 %v6591_v40, %v2620_v30  ;;  %v7304_v30 = vld [vmem:[#allocation48_spill] sm:$0xff] }
 0x877   : > { %v2649_v13 = vsub.f32 %v6594_v44, %v2618_v31 }
 0x878   : > { %v2667_v45 = vmul.f32 1.442695, %v2650_v49 }
 0x879   : > { %v2665_v8 = vmul.f32 1.442695, %v2649_v13  ;;  %883 = vadd.xlane.f32.xlu0 %v7298_v24  ;;  %893 = vadd.xlane.f32.xlu1 %v7299_v27  ;;  %v7303_v13 = vld [vmem:[#allocation49_spill] sm:$0xff] }
 0x87a   : > { %v2624_v55 = vpop.xlane.xlu1 %2623 }
 0x87b   : > { %5245 = vpow2.f32 %v2665_v8  ;;  %v2652_v34 = vsub.f32 %v6599_v11, %v2624_v55 }
 0x87c   : > { %5247 = vpow2.f32 %v2667_v45 }
 0x87d   : > { %887 = vadd.xlane.f32.xlu0 %v7300_v19  ;;  %895 = vadd.xlane.f32.xlu1 %v7301_v12  ;;  %v2628_v1 = vpop.xlane.xlu0 %2627 }
 0x87e   : > { %v2622_v54 = vpop.xlane.xlu1 %2621  ;;  %v2654_v56 = vsub.f32 %v6603_v39, %v2628_v1 }
 0x87f   : > { %v2651_v26 = vsub.f32 %v6606_v51, %v2622_v54  ;;  %v2671_v51 = vmul.f32 1.442695, %v2652_v34 }
 0x880   : > { %v2675_v29 = vmul.f32 1.442695, %v2654_v56 }
 0x881   : > { %891 = vadd.xlane.f32.xlu0 %v7302_v3  ;;  %v2669_v25 = vmul.f32 1.442695, %v2651_v26 }
 0x882   : > { %v2626_v44 = vpop.xlane.xlu1 %2625 }
 0x883   : > { %v2653_v43 = vsub.f32 %v6611_v22, %v2626_v44  ;;  %5249 = vpow2.f32 %v2669_v25 }
 0x884   : > { %5251 = vpow2.f32 %v2671_v51 }
 0x885   : > { %v6708_v36 = vpop.eup %5245  ;;  %v2636_v0 = vpop.xlane.xlu0 %2635  ;;  %v2673_v20 = vmul.f32 1.442695, %v2653_v43 }
 0x886   : > { %4398 = vmatprep.mubr.f32.mxu0 %v6708_v36  ;;  %v2632_v40 = vpop.xlane.xlu1 %2631  ;;  %v2658_v24 = vsub.f32 %v6615_v41, %v2636_v0 }
 0x887   : > { %v2656_v52 = vsub.f32 %v6618_v58, %v2632_v40  ;;  %5253 = vpow2.f32 %v2673_v20  ;;  %v6714_v58 = vpop.eup %5247 }
 0x888   : > { %5255 = vpow2.f32 %v2675_v29  ;;  %v2683_v54 = vmul.f32 1.442695, %v2658_v24 }
 0x889   : > { %v5146_v57 = vpop.permute.xlu0 %5145  ;;  %v2679_v11 = vmul.f32 1.442695, %v2656_v52 }
 0x88a   : > { %v5148_v17 = vunpack.i.h.bf16 %v5146_v57  ;;  %v5147_v5 = vunpack.i.l.bf16 %v5146_v57  ;;  %v2630_v22 = vpop.xlane.xlu1 %2629 }
 0x88b   : > { %v2655_v61 = vsub.f32 %v6623_v47, %v2630_v22  ;;  %5257 = vpow2.f32 %v2679_v11  ;;  %v7305_v22 = vld [vmem:[#allocation25_spill] sm:$0xff] }
 0x88c   : > { %v4778_v39 = vpack.c.bf16 %v5148_v17, %v5147_v5 }
 0x88d   : > { %v2677_v53 = vmul.f32 1.442695, %v2655_v61  ;;  %v6716_v15 = vpop.eup %5249 }
 0x88e   : > { %4779 = vmatprep.subr.bf16.mxu0 %v4778_v39  ;;  %4797 = vmatprep.subr.bf16.mxu1 %v4778_v39  ;;  %v1478_v6 = vpop.xlane.xlu1 %1477  ;;  %v6720_v47 = vpop.eup %5251 }
 0x88f   : > { %5259 = vpow2.f32 %v2677_v53  ;;  %4781 = vmatpush3.bf16.msra.mxu0 %v4778_v39  ;;  %4805 = vmatpush3.bf16.msra.mxu1 %v4778_v39 }
 0x890   : > { %5261 = vrcp.f32 %v1478_v6 }
 0x891   : > { %v6722_v10 = vpop.eup %5253 }
 0x892   : > { %4399 = vmatmul.mubr.f32.vlgmr.msra.gmra.mrb[80].mxu0 %v6714_v58  ;;  %v1480_v23 = vpop.xlane.xlu1 %1479  ;;  %v6725_v7 = vpop.eup %5255 }
 0x893   : > { %5263 = vrcp.f32 %v1480_v23  ;;  %4401 = vmatprep.mubr.f32.mxu0 %v6716_v15 }
 0x895   : > { %v6728_v28 = vpop.eup %5257 }
 0x896   : > { %4402 = vmatmul.mubr.f32.gmra.mrb[82].mxu0 %v6720_v47  ;;  %v2088_v9 = vpop.xlane.xlu1 %2087 }
 0x897   : > { %5265 = vrcp.f32 %v2088_v9  ;;  %4404 = vmatprep.mubr.f32.mxu0 %v6722_v10 }
 0x899   : > { %v6730_v35 = vpop.eup %5259 }
 0x89a   : > { %v5262_v42 = vpop.eup %5261  ;;  %4405 = vmatmul.mubr.f32.gmra.mrb[84].mxu0 %v6725_v7  ;;  %4407 = vmatprep.mubr.f32.mxu1 %v6730_v35  ;;  %v2090_v31 = vpop.xlane.xlu1 %2089 }
 0x89b   : > { %5267 = vrcp.f32 %v2090_v31  ;;  %4408 = vmatmul.mubr.f32.vlgmr.msra.gmra.mrb[48].mxu1 %v6728_v28  ;;  %v1718_v8 = vmul.f32 %v5262_v42, %v7303_v13 }
 0x89d   : > { %v5264_v27 = vpop.eup %5263  ;;  %2970 = vrot.lane.b32.xlu0 %v1718_v8, %s5425_s22 }
 0x89e   : > { %v2634_v55 = vpop.xlane.xlu1 %2633  ;;  %v1719_v19 = vmul.f32 %v5264_v27, %v7304_v30 }
 0x89f   : > { %v2657_v12 = vsub.f32 %v6633_v4, %v2634_v55  ;;  %v7306_v55 = vld [vmem:[#allocation51_spill] sm:$0xff] }
 0x8a0   : > { %2972 = vrot.lane.b32.xlu1 %v1719_v19, %s5425_s22 }
 0x8a1   : > { %v5266_v49 = vpop.eup %5265  ;;  %v2681_v26 = vmul.f32 1.442695, %v2657_v12 }
 0x8a2   : > { %v2640_v1 = vpop.xlane.xlu1 %2639  ;;  %v2328_v3 = vmul.f32 %v5266_v49, %v6560_v50  ;;  %v7307_v49 = vld [vmem:[#allocation50_spill] sm:$0xff] }
 0x8a3   : > { %5269 = vpow2.f32 %v2681_v26  ;;  %v2660_v41 = vsub.f32 %v6637_v21, %v2640_v1 }
 0x8a4   : > { %5271 = vpow2.f32 %v2683_v54  ;;  %3034 = vrot.lane.b32.xlu1 %v2328_v3, %s5426_s23 }
 0x8a5   : > { %v5268_v44 = vpop.eup %5267  ;;  %v2687_v25 = vmul.f32 1.442695, %v2660_v41 }
 0x8a6   : > { %v2638_v45 = vpop.xlane.xlu1 %2637  ;;  %v2329_v34 = vmul.f32 %v5268_v44, %v6558_v38 }
 0x8a7   : > { %v2659_v4 = vsub.f32 %v6641_v60, %v2638_v45 }
 0x8a8   : > { %3036 = vrot.lane.b32.xlu1 %v2329_v34, %s5426_s23  ;;  %v7308_v34 = vld [vmem:[#allocation54_spill] sm:$0xff] }
 0x8a9   : > { %v2685_v43 = vmul.f32 1.442695, %v2659_v4 }
 0x8aa   : > { %v2644_v56 = vpop.xlane.xlu1 %2643 }
 0x8ab   : > { %5273 = vpow2.f32 %v2685_v43  ;;  %v2662_v50 = vsub.f32 %v6645_v16, %v2644_v56 }
 0x8ac   : > { %5275 = vpow2.f32 %v2687_v25 }
 0x8ad   : > { %v6748_v0 = vpop.eup %5269  ;;  %v2691_v60 = vmul.f32 1.442695, %v2662_v50 }
 0x8ae   : > { %v6750_v21 = vpop.eup %5271  ;;  %4410 = vmatprep.mubr.f32.mxu1 %v6748_v0  ;;  %v2642_v40 = vpop.xlane.xlu1 %2641 }
 0x8af   : > { %v2661_v38 = vsub.f32 %v6649_v63, %v2642_v40  ;;  %4411 = vmatmul.mubr.f32.gmra.mrb[50].mxu1 %v6750_v21 }
 0x8b1   : > { %v2689_v51 = vmul.f32 1.442695, %v2661_v38 }
 0x8b2   : > { %v2648_v52 = vpop.xlane.xlu1 %2647 }
 0x8b3   : > { %5277 = vpow2.f32 %v2689_v51  ;;  %v2664_v16 = vsub.f32 %v6653_v2, %v2648_v52  ;;  %v7309_v52 = vld [vmem:[#allocation53_spill] sm:$0xff] }
 0x8b4   : > { %5279 = vpow2.f32 %v2691_v60 }
 0x8b5   : > { %v6755_v20 = vpop.eup %5273  ;;  %v2695_v11 = vmul.f32 1.442695, %v2664_v16 }
 0x8b6   : > { %v6757_v29 = vpop.eup %5275  ;;  %4413 = vmatprep.mubr.f32.mxu1 %v6755_v20  ;;  %v1484_v57 = vpop.xlane.xlu1 %1483 }
 0x8b7   : > { %4414 = vmatmul.mubr.f32.gmra.mrb[52].mxu1 %v6757_v29  ;;  %5281 = vpow2.f32 %v2695_v11 }
 0x8ba   : > { %v2646_v63 = vpop.xlane.xlu0 %2645  ;;  %v2094_v17 = vpop.xlane.xlu1 %2093 }
 0x8bb   : > { %v2663_v5 = vsub.f32 %v6658_v18, %v2646_v63 }
 0x8bc   : > { %897 = vadd.xlane.f32.xlu0 %v7305_v22 }
 0x8bd   : > { %v6764_v61 = vpop.eup %5277  ;;  %v2693_v39 = vmul.f32 1.442695, %v2663_v5 }
 0x8be   : > { %v6766_v53 = vpop.eup %5279  ;;  %v1482_v6 = vpop.xlane.xlu0 %1481  ;;  %4416 = vmatprep.mubr.f32.mxu1 %v6764_v61 }
 0x8bf   : > { %v1488_v2 = vpop.xlane.xlu1 %1487  ;;  %5283 = vpow2.f32 %v2693_v39  ;;  %4417 = vmatmul.mubr.f32.gmra.mrb[54].mxu1 %v6766_v53 }
 0x8c0   : > { %5285 = vrcp.f32 %v1482_v6 }
 0x8c1   : > { %5287 = vrcp.f32 %v1484_v57  ;;  %v6770_v31 = vpop.eup %5281 }
 0x8c2   : > { %v2092_v23 = vpop.xlane.xlu0 %2091 }
 0x8c3   : > { %v2098_v9 = vpop.xlane.xlu1 %2097  ;;  %5289 = vrcp.f32 %v2092_v23 }
 0x8c6   : > { %v1486_v18 = vpop.xlane.xlu0 %1485 }
 0x8c7   : > { %v1492_v42 = vpop.xlane.xlu1 %1491 }
 0x8c8   : > { %5291 = vrcp.f32 %v1492_v42 }
 0x8c9   : > { %v6772_v13 = vpop.eup %5283  ;;  %5293 = vrcp.f32 %v2094_v17 }
 0x8ca   : > { %v5286_v8 = vpop.eup %5285  ;;  %v2096_v24 = vpop.xlane.xlu0 %2095  ;;  %4419 = vmatprep.mubr.f32.mxu1 %v6772_v13 }
 0x8cb   : > { %v2102_v27 = vpop.xlane.xlu1 %2101  ;;  %4420 = vmatmul.mubr.f32.gmra.mrb[56].mxu1 %v6770_v31  ;;  %v1720_v30 = vmul.f32 %v5286_v8, %v7306_v55  ;;  %v5288_v19 = vpop.eup %5287 }
 0x8cc   : > { %5295 = vrcp.f32 %v2102_v27  ;;  %v1721_v26 = vmul.f32 %v5288_v19, %v7307_v49 }
 0x8cd   : > { %2974 = vrot.lane.b32.xlu1 %v1720_v30, %s5425_s22  ;;  %5297 = vrcp.f32 %v1486_v18  ;;  %v5290_v1 = vpop.eup %5289 }
 0x8ce   : > { %v1490_v12 = vpop.xlane.xlu0 %1489  ;;  %5299 = vrcp.f32 %v1488_v2  ;;  %v2330_v45 = vmul.f32 %v5290_v1, %v6564_v46 }
 0x8cf   : > { %v6778_v54 = vpop.xlane.xlu1 %1495  ;;  %5301 = vrcp.f32 %v2096_v24  ;;  %v7311_v24 = vld [vmem:[#allocation55_spill] sm:$0xff] }
 0x8d0   : > { %5303 = vrcp.f32 %v2098_v9 }
 0x8d1   : > { %2976 = vrot.lane.b32.xlu1 %v1721_v26, %s5425_s22  ;;  %5305 = vrcp.f32 %v1490_v12  ;;  %v7312_v26 = vld [vmem:[#allocation57_spill] sm:$0xff] }
 0x8d2   : > { %v5292_v3 = vpop.eup %5291  ;;  %v2100_v41 = vpop.xlane.xlu0 %2099 }
 0x8d3   : > { %v6782_v44 = vpop.xlane.xlu1 %2105  ;;  %v1725_v4 = vmul.f32 %v5292_v3, %v7308_v34  ;;  %v5294_v25 = vpop.eup %5293  ;;  %5307 = vrcp.f32 %v2100_v41 }
 0x8d4   : > { %v2331_v40 = vmul.f32 %v5294_v25, %v6562_v37 }
 0x8d5   : > { %3038 = vrot.lane.b32.xlu1 %v2330_v45, %s5426_s23  ;;  %2984 = vrot.lane.b32.xlu0 %v1725_v4, %s5425_s22  ;;  %v7313_v4 = vld [vmem:[#allocation26_spill] sm:$0xff] }
 0x8d6   : > { %v5296_v43 = vpop.eup %5295  ;;  %v1494_v56 = vpop.xlane.xlu0 %1493 }
 0x8d7   : > { %v6788_v50 = vpop.xlane.xlu1 %1499  ;;  %v2335_v38 = vmul.f32 %v5296_v43, %v6570_v62  ;;  %v5298_v60 = vpop.eup %5297  ;;  %v7310_v62 = vld [vmem:[#allocation52_spill] sm:$0xff]  ;;  %5309 = vrcp.f32 %v1494_v56 }
 0x8d8   : > { %v1722_v16 = vmul.f32 %v5298_v60, %v7309_v52  ;;  %v5300_v57 = vpop.eup %5299 }
 0x8d9   : > { %3040 = vrot.lane.b32.xlu1 %v2331_v40, %s5426_s23  ;;  %3048 = vrot.lane.b32.xlu0 %v2335_v38, %s5426_s23  ;;  %v1723_v63 = vmul.f32 %v5300_v57, %v7310_v62  ;;  %v5302_v17 = vpop.eup %5301  ;;  %v7314_v38 = vld [vmem:[#allocation28_spill] sm:$0xff]  ;;  %v7315_v62 = vld [vmem:[#allocation27_spill] sm:$0xff] }
 0x8da   : > { %v6794_v46 = vpop.xlane.xlu0 %2103  ;;  %v2332_v39 = vmul.f32 %v5302_v17, %v6568_v48  ;;  %v5304_v6 = vpop.eup %5303  ;;  %v7316_v17 = vld [vmem:[#allocation30_spill] sm:$0xff] }
 0x8db   : > { %v6796_v51 = vpop.xlane.xlu1 %2109  ;;  %v2333_v9 = vmul.f32 %v5304_v6, %v6566_v33  ;;  %v5306_v18 = vpop.eup %5305 }
 0x8dc   : > { %v1724_v27 = vmul.f32 %v5306_v18, %v7311_v24  ;;  %v7317_v24 = vld [vmem:[#allocation29_spill] sm:$0xff] }
 0x8dd   : > { %2978 = vrot.lane.b32.xlu1 %v1722_v16, %s5425_s22  ;;  %v5308_v48 = vpop.eup %5307 }
 0x8de   : > { %v6800_v11 = vpop.xlane.xlu0 %1497  ;;  %v2334_v19 = vmul.f32 %v5308_v48, %v6572_v14 }
 0x8df   : > { %v6802_v37 = vpop.xlane.xlu1 %1503 }
 0x8e1   : > { %2980 = vrot.lane.b32.xlu1 %v1723_v63, %s5425_s22  ;;  %v5310_v12 = vpop.eup %5309 }
 0x8e2   : > { %v6806_v5 = vpop.xlane.xlu0 %2107  ;;  %v1726_v1 = vmul.f32 %v5310_v12, %v7312_v26  ;;  %v7319_v26 = vld [vmem:[#allocation31_spill] sm:$0xff] }
 0x8e3   : > { %v6808_v22 = vpop.xlane.xlu1 %2113 }
 0x8e5   : > { %3042 = vrot.lane.b32.xlu1 %v2332_v39, %s5426_s23 }
 0x8e6   : > { %v6812_v2 = vpop.xlane.xlu0 %1501 }
 0x8e7   : > { %v6814_v23 = vpop.xlane.xlu1 %1507 }
 0x8e9   : > { %3044 = vrot.lane.b32.xlu1 %v2333_v9, %s5426_s23 }
 0x8ea   : > { %v6818_v42 = vpop.xlane.xlu0 %2111 }
 0x8eb   : > { %v6820_v8 = vpop.xlane.xlu1 %2117 }
 0x8ed   : > { %2982 = vrot.lane.b32.xlu1 %v1724_v27, %s5425_s22 }
 0x8ee   : > { %v6824_v55 = vpop.xlane.xlu0 %1505 }
 0x8ef   : > { %v870_v30 = vpop.xlane.xlu1 %869 }
 0x8f0   : > { %5311 = vrcp.f32 %v870_v30 }
 0x8f1   : > { %3046 = vrot.lane.b32.xlu1 %v2334_v19, %s5426_s23 }
 0x8f2   : > { %v6828_v33 = vpop.xlane.xlu0 %2115 }
 0x8f3   : > { %v874_v49 = vpop.xlane.xlu1 %873 }
 0x8f4   : > { %5313 = vrcp.f32 %v874_v49 }
 0x8f5   : > { %2986 = vrot.lane.b32.xlu1 %v1726_v1, %s5425_s22  ;;  %v7320_v1 = vld [vmem:[#allocation34_spill] sm:$0xff] }
 0x8f6   : > { %v868_v3 = vpop.xlane.xlu0 %867 }
 0x8f7   : > { %v878_v41 = vpop.xlane.xlu1 %877  ;;  %5315 = vrcp.f32 %v868_v3 }
 0x8f8   : > { %5317 = vrcp.f32 %v878_v41  ;;  %2701 = vadd.xlane.f32.xlu0 %v6716_v15 }
 0x8fa   : > { %v5312_v45 = vpop.eup %5311  ;;  %v872_v14 = vpop.xlane.xlu0 %871 }
 0x8fb   : > { %v882_v34 = vpop.xlane.xlu1 %881  ;;  %5319 = vrcp.f32 %v872_v14  ;;  %v1109_v25 = vmul.f32 %v5312_v45, %v7313_v4 }
 0x8fc   : > { %5321 = vrcp.f32 %v882_v34  ;;  %2705 = vadd.xlane.f32.xlu0 %v6722_v10  ;;  %v7321_v34 = vld [vmem:[#allocation33_spill] sm:$0xff] }
 0x8fe   : > { %v5314_v43 = vpop.eup %5313  ;;  %v876_v56 = vpop.xlane.xlu0 %875 }
 0x8ff   : > { %v886_v40 = vpop.xlane.xlu1 %885  ;;  %5323 = vrcp.f32 %v876_v56  ;;  %v6836_v60 = vmul.f32 %v5314_v43, %v7314_v38 }
 0x900   : > { %5325 = vrcp.f32 %v886_v40  ;;  %2709 = vadd.xlane.f32.xlu0 %v6730_v35  ;;  %v7318_v35 = vld [vmem:[#allocation32_spill] sm:$0xff] }
 0x901   : > { %v5316_v15 = vpop.eup %5315 }
 0x902   : > { %v5318_v52 = vpop.eup %5317  ;;  %v880_v16 = vpop.xlane.xlu0 %879  ;;  %v1108_v63 = vmul.f32 %v5316_v15, %v7315_v62  ;;  %v7324_v62 = vld [vmem:[#allocation38_spill] sm:$0xff] }
 0x903   : > { %v890_v57 = vpop.xlane.xlu1 %889  ;;  %5327 = vrcp.f32 %v880_v16  ;;  %v6841_v39 = vmul.f32 %v5318_v52, %v7316_v17  ;;  %v7323_v52 = vld [vmem:[#allocation35_spill] sm:$0xff] }
 0x904   : > { %5329 = vrcp.f32 %v890_v57  ;;  %2713 = vadd.xlane.f32.xlu0 %v6748_v0 }
 0x905   : > { %v5320_v10 = vpop.eup %5319 }
 0x906   : > { %v5322_v6 = vpop.eup %5321  ;;  %v884_v9 = vpop.xlane.xlu0 %883  ;;  %v6845_v27 = vmul.f32 %v5320_v10, %v7317_v24 }
 0x907   : > { %v894_v18 = vpop.xlane.xlu1 %893  ;;  %5331 = vrcp.f32 %v884_v9  ;;  %v6848_v48 = vmul.f32 %v5322_v6, %v7318_v35  ;;  %v7326_v35 = vld [vmem:[#allocation41_spill] sm:$0xff] }
 0x908   : > { %5333 = vrcp.f32 %v894_v18  ;;  %2717 = vadd.xlane.f32.xlu0 %v6755_v20  ;;  %v7322_v20 = vld [vmem:[#allocation36_spill] sm:$0xff]  ;;  %v7325_v18 = vld [vmem:[#allocation37_spill] sm:$0xff] }
 0x909   : > { %v5324_v30 = vpop.eup %5323 }
 0x90a   : > { %v5326_v19 = vpop.eup %5325  ;;  %v888_v12 = vpop.xlane.xlu0 %887  ;;  %v6852_v0 = vmul.f32 %v5324_v30, %v7319_v26  ;;  %v7328_v26 = vld [vmem:[#allocation56_spill] sm:$0xff] }
 0x90b   : > { %v896_v49 = vpop.xlane.xlu1 %895  ;;  %5335 = vrcp.f32 %v888_v12  ;;  %v6855_v3 = vmul.f32 %v5326_v19, %v7320_v1  ;;  %v7327_v19 = vld [vmem:[#allocation39_spill] sm:$0xff] }
 0x90c   : > { %5337 = vrcp.f32 %v896_v49  ;;  %2721 = vadd.xlane.f32.xlu0 %v6764_v61 }
 0x90d   : > { %v5328_v41 = vpop.eup %5327 }
 0x90e   : > { %v5330_v45 = vpop.eup %5329  ;;  %v892_v14 = vpop.xlane.xlu0 %891  ;;  %v6859_v4 = vmul.f32 %v5328_v41, %v7321_v34 }
 0x90f   : > { %5339 = vrcp.f32 %v892_v14  ;;  %v6862_v43 = vmul.f32 %v5330_v45, %v7322_v20 }
 0x910   : > { %2725 = vadd.xlane.f32.xlu0 %v6772_v13  ;;  %5341 = vrcp.f32 %v6778_v54 }
 0x911   : > { %v5332_v56 = vpop.eup %5331  ;;  %5343 = vrcp.f32 %v6782_v44 }
 0x912   : > { %v5334_v40 = vpop.eup %5333  ;;  %v2971_v38 = vpop.permute.xlu0 %2970  ;;  %v6866_v16 = vmul.f32 %v5332_v56, %v7323_v52  ;;  %5345 = vrcp.f32 %v6788_v50  ;;  %v7333_v56 = vld [vmem:[#allocation7_spill] sm:$0xff] }
 0x913   : > { %v2973_v15 = vpop.permute.xlu1 %2972  ;;  %v3146_v61 = vsel %vm561_vm1, %v1108_v63, %v2971_v38  ;;  %v6871_v17 = vmul.f32 %v5334_v40, %v7324_v62  ;;  %5347 = vrcp.f32 %v6796_v51 }
 0x914   : > { %v3147_v57 = vsel %vm561_vm1, %v1109_v25, %v2973_v15  ;;  %5349 = vrcp.f32 %v6802_v37 }
 0x915   : > { %v5336_v10 = vpop.eup %5335  ;;  %5351 = vrcp.f32 %v6808_v22  ;;  %v7331_v22 = vld [vmem:[#allocation6_spill] sm:$0xff] }
 0x916   : > { %v5338_v6 = vpop.eup %5337  ;;  %v6874_v13 = vmul.f32 %v5336_v10, %v7325_v18  ;;  %5353 = vrcp.f32 %v6814_v23 }
 0x917   : > { %v3035_v9 = vpop.permute.xlu1 %3034  ;;  %v6881_v30 = vmul.f32 %v5338_v6, %v7326_v35  ;;  %5355 = vrcp.f32 %v6794_v46 }
 0x918   : > { %v6878_v24 = vsel %vm3162_vm2, %v3146_v61, %v3035_v9  ;;  %5357 = vrcp.f32 %v6800_v11 }
 0x919   : > { %v5340_v63 = vpop.eup %5339  ;;  %2699 = vadd.xlane.f32.xlu1 %v6714_v58  ;;  %5359 = vrcp.f32 %v6806_v5 }
 0x91a   : > { %v6885_v12 = vmul.f32 %v5340_v63, %v7327_v19  ;;  %v5342_v54 = vpop.eup %5341  ;;  %5361 = vrcp.f32 %v6812_v2  ;;  %v7336_v63 = vld [vmem:[#allocation61_spill] sm:$0xff] }
 0x91b   : > { %v3037_v25 = vpop.permute.xlu1 %3036  ;;  %v1727_v58 = vmul.f32 %v5342_v54, %v7328_v26  ;;  %v5344_v1 = vpop.eup %5343 }
 0x91c   : > { %v6889_v49 = vsel %vm3162_vm2, %v3147_v57, %v3037_v25  ;;  %v2337_v44 = vmul.f32 %v5344_v1, %v6574_v59  ;;  %v5346_v41 = vpop.eup %5345  ;;  %v7330_v59 = vld [vmem:[#allocation60_spill] sm:$0xff] }
 0x91d   : > { %2697 = vadd.xlane.f32.xlu1 %v6708_v36  ;;  %v7329_v36 = vld [vmem:[#allocation58_spill] sm:$0xff]  ;;  %v5348_v50 = vpop.eup %5347  ;;  %v7338_v1 = vld [vmem:[#allocation8_spill] sm:$0xff] }
 0x91e   : > { %v5350_v51 = vpop.eup %5349 }
 0x91f   : > { %v5352_v37 = vpop.eup %5351 }
 0x920   : > { %v5354_v45 = vpop.eup %5353 }
 0x921   : > { %2703 = vadd.xlane.f32.xlu1 %v6720_v47  ;;  %v1729_v47 = vmul.f32 %v5346_v41, %v7329_v36  ;;  %v5356_v34 = vpop.eup %5355  ;;  %v7339_v36 = vld [vmem:[#allocation63_spill] sm:$0xff] }
 0x922   : > { %v2336_v40 = vmul.f32 %v5356_v34, %v7333_v56  ;;  %v5358_v11 = vpop.eup %5357 }
 0x923   : > { %v5360_v2 = vpop.eup %5359 }
 0x924   : > { %v5362_v6 = vpop.eup %5361 }
 0x925   : > { %2707 = vadd.xlane.f32.xlu1 %v6725_v7  ;;  %v2339_v7 = vmul.f32 %v5348_v50, %v6578_v32  ;;  %v7332_v32 = vld [vmem:[#allocation62_spill] sm:$0xff]  ;;  %v1730_v25 = vmul.f32 %v5362_v6, %v7336_v63 }
 0x926   : > { %2988 = vrot.lane.b32.xlu0 %v1727_v58, %s5425_s22 }
 0x929   : > { %2711 = vadd.xlane.f32.xlu1 %v6728_v28  ;;  %v1731_v28 = vmul.f32 %v5350_v51, %v7330_v59  ;;  %v7340_v59 = vld [vmem:[#allocation4_spill] sm:$0xff] }
 0x92a   : > { %3052 = vrot.lane.b32.xlu0 %v2337_v44, %s5426_s23 }
 0x92d   : > { %2715 = vadd.xlane.f32.xlu1 %v6750_v21  ;;  %v2341_v21 = vmul.f32 %v5352_v37, %v7331_v22 }
 0x92e   : > { %2992 = vrot.lane.b32.xlu0 %v1729_v47, %s5425_s22 }
 0x931   : > { %2719 = vadd.xlane.f32.xlu1 %v6757_v29  ;;  %v1733_v29 = vmul.f32 %v5354_v45, %v7332_v32 }
 0x932   : > { %3056 = vrot.lane.b32.xlu0 %v2339_v7, %s5426_s23 }
 0x935   : > { %2723 = vadd.xlane.f32.xlu1 %v6766_v53 }
 0x936   : > { %2996 = vrot.lane.b32.xlu0 %v1731_v28, %s5425_s22 }
 0x939   : > { %2727 = vadd.xlane.f32.xlu1 %v6770_v31 }
 0x93a   : > { %3060 = vrot.lane.b32.xlu0 %v2341_v21, %s5426_s23 }
 0x93e   : > { %3000 = vrot.lane.b32.xlu0 %v1733_v29, %s5425_s22 }
 0x93f   : > { %v2975_v23 = vpop.permute.xlu1 %2974 }
 0x940   : > { %v3148_v53 = vsel %vm561_vm1, %v6845_v27, %v2975_v23 }
 0x943   : > { %v2977_v14 = vpop.permute.xlu1 %2976 }
 0x944   : > { %v3149_v31 = vsel %vm561_vm1, %v6836_v60, %v2977_v14  ;;  %v7334_v60 = vld [vmem:[#allocation59_spill] sm:$0xff] }
 0x945   : > { %v1728_v15 = vmul.f32 %v5358_v11, %v7334_v60  ;;  %v3196_v11 = vld [vmem:[%s7154_s3] sm:$0xff] }
 0x947   : > { %v3039_v46 = vpop.permute.xlu1 %3038 }
 0x948   : > { %v6927_v20 = vsel %vm3162_vm2, %v3148_v53, %v3039_v46 }
 0x949   : > { %v898_v38 = vpop.xlane.xlu0 %897 }
 0x94a   : > { %5363 = vrcp.f32 %v898_v38  ;;  %3050 = vrot.lane.b32.xlu1 %v2336_v40, %s5426_s23  ;;  %v3197_v38 = vld [vmem:[%s7154_s3 + $0x8] sm:$0xff] }
 0x94b   : > { %5365 = vrcp.f32 %v6818_v42  ;;  %v3041_v5 = vpop.permute.xlu1 %3040  ;;  %v7335_v42 = vld [vmem:[#allocation5_spill] sm:$0xff] }
 0x94c   : > { %v6933_v27 = vsel %vm3162_vm2, %v3149_v31, %v3041_v5  ;;  %5367 = vrcp.f32 %v6824_v55  ;;  %v2338_v10 = vmul.f32 %v5360_v2, %v7335_v42  ;;  %v3198_v5 = vld [vmem:[%s7154_s3 + $0x10] sm:$0xff] }
 0x94d   : > { %v2985_v52 = vpop.permute.xlu0 %2984  ;;  %5369 = vrcp.f32 %v6828_v33 }
 0x94e   : > { %v3153_v61 = vsel %vm561_vm1, %v6848_v48, %v2985_v52  ;;  %2990 = vrot.lane.b32.xlu1 %v1728_v15, %s5425_s22  ;;  %v4782_v15 = vpack.c.bf16 %v3197_v38, %v3196_v11 }
 0x94f   : > { %v2979_v57 = vpop.permute.xlu1 %2978 }
 0x950   : > { %v3150_v62 = vsel %vm561_vm1, %v6852_v0, %v2979_v57  ;;  %v7337_v0 = vld [vmem:[#allocation40_spill] sm:$0xff]  ;;  %4783 = vmatprep.subr.bf16.mxu1 %v4782_v15 }
 0x951   : > { %v3049_v9 = vpop.permute.xlu0 %3048  ;;  %4785 = vmatpush3.bf16.msra.mxu1 %v4782_v15 }
 0x952   : > { %v6944_v18 = vsel %vm3162_vm2, %v3153_v61, %v3049_v9  ;;  %3054 = vrot.lane.b32.xlu1 %v2338_v10, %s5426_s23  ;;  %v7341_v10 = vld [vmem:[#allocation3_spill] sm:$0xff] }
 0x953   : > { %v2981_v48 = vpop.permute.xlu1 %2980 }
 0x954   : > { %v5364_v35 = vpop.eup %5363  ;;  %v3151_v55 = vsel %vm561_vm1, %v6841_v39, %v2981_v48 }
 0x955   : > { %v5366_v19 = vpop.eup %5365  ;;  %v6952_v54 = vmul.f32 %v5364_v35, %v7337_v0 }
 0x956   : > { %2994 = vrot.lane.b32.xlu1 %v1730_v25, %s5425_s22  ;;  %v2340_v44 = vmul.f32 %v5366_v19, %v7338_v1  ;;  %v5368_v33 = vpop.eup %5367 }
 0x957   : > { %v3043_v26 = vpop.permute.xlu1 %3042  ;;  %v1732_v47 = vmul.f32 %v5368_v33, %v7339_v36  ;;  %v5370_v50 = vpop.eup %5369 }
 0x958   : > { %v6956_v58 = vsel %vm3162_vm2, %v3150_v62, %v3043_v26  ;;  %v2342_v28 = vmul.f32 %v5370_v50, %v7340_v59 }
 0x95a   : > { %3058 = vrot.lane.b32.xlu1 %v2340_v44, %s5426_s23 }
 0x95b   : > { %v3045_v41 = vpop.permute.xlu1 %3044 }
 0x95c   : > { %v6961_v39 = vsel %vm3162_vm2, %v3151_v55, %v3045_v41 }
 0x95e   : > { %2998 = vrot.lane.b32.xlu1 %v1732_v47, %s5425_s22 }
 0x95f   : > { %v2983_v7 = vpop.permute.xlu1 %2982 }
 0x960   : > { %v3152_v51 = vsel %vm561_vm1, %v6859_v4, %v2983_v7 }
 0x962   : > { %3062 = vrot.lane.b32.xlu1 %v2342_v28, %s5426_s23 }
 0x963   : > { %v3047_v37 = vpop.permute.xlu1 %3046 }
 0x964   : > { %v6970_v22 = vsel %vm3162_vm2, %v3152_v51, %v3047_v37 }
 0x965   : > { %v4400_v21 = vpop.f32.mrb[80].mxu0 }
 0x966   : > { %v2843_v45 = vpop.f32.mrb[81].mxu0 }
 0x967   : > { %v2987_v32 = vpop.permute.xlu1 %2986 }
 0x968   : > { %v6974_v29 = vsel %vm561_vm1, %v6866_v16, %v2987_v32 }
 0x969   : > { %v4403_v23 = vpop.f32.mrb[82].mxu0 }
 0x96a   : > { %v2853_v53 = vpop.f32.mrb[83].mxu0 }
 0x96d   : > { %v6976_v14 = vpop.f32.mrb[84].mxu0 }
 0x96e   : > { %v6978_v4 = vpop.f32.mrb[85].mxu0  ;;  %v6980_v31 = vpop.f32.mrb[48].mxu1 }
 0x96f   : > { %v6982_v34 = vpop.f32.mrb[49].mxu1 }
 0x982   : > { %v6984_v46 = vpop.f32.mrb[50].mxu1 }
 0x983   : > { %v6986_v56 = vpop.f32.mrb[51].mxu1 }
 0x985   : > { %v2702_v40 = vpop.xlane.xlu0 %2701 }
 0x986   : > { %5371 = vrcp.f32 %v2702_v40 }
 0x987   : > { %5373 = vrcp.f32 %v6820_v8  ;;  %v3199_v8 = vld [vmem:[%s7154_s3 + $0x18] sm:$0xff] }
 0x988   : > { %v4786_v2 = vpack.c.bf16 %v3199_v8, %v3198_v5 }
 0x989   : > { %v2706_v35 = vpop.xlane.xlu0 %2705 }
 0x98a   : > { %v6989_v16 = vpop.f32.mrb[52].mxu1  ;;  %4787 = vmatprep.subr.bf16.mxu1 %v4786_v2 }
 0x98b   : > { %v7000_v60 = vpop.f32.mrb[53].mxu1  ;;  %4789 = vmatpush3.bf16.msra.mxu1 %v4786_v2 }
 0x98d   : > { %v2710_v63 = vpop.xlane.xlu0 %2709 }
 0x990   : > { %v5372_v52 = vpop.eup %5371 }
 0x991   : > { %v2940_v61 = vmul.f32 %v5372_v52, %v2853_v53  ;;  %v5374_v57 = vpop.eup %5373  ;;  %v2714_v0 = vpop.xlane.xlu0 %2713 }
 0x992   : > { %v7005_v62 = vpop.f32.mrb[54].mxu1  ;;  %v2343_v6 = vmul.f32 %v5374_v57, %v7341_v10 }
 0x993   : > { %3102 = vrot.lane.b32.xlu0 %v2940_v61, %s5427_s8  ;;  %v7008_v42 = vpop.f32.mrb[55].mxu1 }
 0x995   : > { %v2718_v41 = vpop.xlane.xlu0 %2717 }
 0x997   : > { %3064 = vrot.lane.b32.xlu0 %v2343_v6, %s5426_s23 }
 0x999   : > { %v2722_v28 = vpop.xlane.xlu0 %2721 }
 0x99e   : > { %v7012_v9 = vpop.f32.mrb[56].mxu1 }
 0x99f   : > { %v7014_v48 = vpop.f32.mrb[57].mxu1 }
 0x9a6   : > { %v2700_v55 = vpop.xlane.xlu1 %2699 }
 0x9a7   : > { %5375 = vrcp.f32 %v2700_v55 }
 0x9aa   : > { %v2698_v25 = vpop.xlane.xlu1 %2697 }
 0x9ab   : > { %5377 = vrcp.f32 %v2698_v25 }
 0x9ae   : > { %v2704_v19 = vpop.xlane.xlu1 %2703 }
 0x9af   : > { %5379 = vrcp.f32 %v2704_v19 }
 0x9b0   : > { %5381 = vrcp.f32 %v2706_v35 }
 0x9b1   : > { %v5376_v26 = vpop.eup %5375 }
 0x9b2   : > { %v2708_v1 = vpop.xlane.xlu1 %2707  ;;  %v2939_v44 = vmul.f32 %v5376_v26, %v4400_v21 }
 0x9b3   : > { %5383 = vrcp.f32 %v2708_v1 }
 0x9b4   : > { %3100 = vrot.lane.b32.xlu1 %v2939_v44, %s5427_s8  ;;  %5385 = vrcp.f32 %v2710_v63 }
 0x9b5   : > { %v5378_v33 = vpop.eup %5377 }
 0x9b6   : > { %v2712_v36 = vpop.xlane.xlu1 %2711  ;;  %v2938_v47 = vmul.f32 %v5378_v33, %v2843_v45 }
 0x9b7   : > { %5387 = vrcp.f32 %v2712_v36 }
 0x9b8   : > { %3098 = vrot.lane.b32.xlu1 %v2938_v47, %s5427_s8  ;;  %5389 = vrcp.f32 %v2714_v0 }
 0x9b9   : > { %v5380_v50 = vpop.eup %5379 }
 0x9ba   : > { %v2716_v7 = vpop.xlane.xlu1 %2715  ;;  %v2941_v51 = vmul.f32 %v5380_v50, %v4403_v23  ;;  %v5382_v59 = vpop.eup %5381 }
 0x9bb   : > { %5391 = vrcp.f32 %v2716_v7  ;;  %v2942_v32 = vmul.f32 %v5382_v59, %v6978_v4  ;;  %v2726_v23 = vpop.xlane.xlu0 %2725 }
 0x9bc   : > { %3104 = vrot.lane.b32.xlu1 %v2941_v51, %s5427_s8  ;;  %5393 = vrcp.f32 %v2718_v41 }
 0x9bd   : > { %v5384_v37 = vpop.eup %5383 }
 0x9be   : > { %v2720_v21 = vpop.xlane.xlu1 %2719  ;;  %v2943_v53 = vmul.f32 %v5384_v37, %v6976_v14  ;;  %v5386_v45 = vpop.eup %5385 }
 0x9bf   : > { %5395 = vrcp.f32 %v2720_v21  ;;  %v2944_v38 = vmul.f32 %v5386_v45, %v6982_v34  ;;  %v2989_v63 = vpop.permute.xlu0 %2988 }
 0x9c0   : > { %3106 = vrot.lane.b32.xlu1 %v2942_v32, %s5427_s8  ;;  %3108 = vrot.lane.b32.xlu0 %v2943_v53, %s5427_s8  ;;  %5397 = vrcp.f32 %v2722_v28 }
 0x9c1   : > { %v5388_v40 = vpop.eup %5387 }
 0x9c2   : > { %v2724_v11 = vpop.xlane.xlu1 %2723  ;;  %v2945_v5 = vmul.f32 %v5388_v40, %v6980_v31  ;;  %v5390_v15 = vpop.eup %5389 }
 0x9c3   : > { %5399 = vrcp.f32 %v2724_v11  ;;  %v2946_v8 = vmul.f32 %v5390_v15, %v6986_v56 }
 0x9c4   : > { %3110 = vrot.lane.b32.xlu1 %v2944_v38, %s5427_s8  ;;  %3112 = vrot.lane.b32.xlu0 %v2945_v5, %s5427_s8  ;;  %5401 = vrcp.f32 %v2726_v23 }
 0x9c5   : > { %v5392_v14 = vpop.eup %5391 }
 0x9c6   : > { %v2728_v4 = vpop.xlane.xlu1 %2727  ;;  %v2947_v2 = vmul.f32 %v5392_v14, %v6984_v46  ;;  %v5394_v52 = vpop.eup %5393 }
 0x9c7   : > { %5403 = vrcp.f32 %v2728_v4  ;;  %v2948_v34 = vmul.f32 %v5394_v52, %v7000_v60 }
 0x9c8   : > { %3114 = vrot.lane.b32.xlu1 %v2946_v8, %s5427_s8  ;;  %3116 = vrot.lane.b32.xlu0 %v2947_v2, %s5427_s8 }
 0x9c9   : > { %v5396_v31 = vpop.eup %5395 }
 0x9ca   : > { %v2949_v61 = vmul.f32 %v5396_v31, %v6989_v16  ;;  %v5398_v57 = vpop.eup %5397  ;;  %v3051_v55 = vpop.permute.xlu1 %3050 }
 0x9cb   : > { %v2950_v56 = vmul.f32 %v5398_v57, %v7008_v42  ;;  %v3053_v42 = vpop.permute.xlu0 %3052  ;;  %v3171_v23 = vsel %vm3162_vm2, %v6974_v29, %v3051_v55 }
 0x9cc   : > { %3118 = vrot.lane.b32.xlu1 %v2948_v34, %s5427_s8  ;;  %3120 = vrot.lane.b32.xlu0 %v2949_v61, %s5427_s8 }
 0x9cd   : > { %v5400_v10 = vpop.eup %5399 }
 0x9ce   : > { %v2951_v46 = vmul.f32 %v5400_v10, %v7005_v62  ;;  %v5402_v6 = vpop.eup %5401  ;;  %v2991_v25 = vpop.permute.xlu1 %2990 }
 0x9cf   : > { %v2952_v60 = vmul.f32 %v5402_v6, %v7014_v48  ;;  %v2993_v62 = vpop.permute.xlu0 %2992 }
 0x9d0   : > { %3122 = vrot.lane.b32.xlu1 %v2950_v56, %s5427_s8  ;;  %3124 = vrot.lane.b32.xlu0 %v2951_v46, %s5427_s8 }
 0x9d1   : > { %v5404_v35 = vpop.eup %5403 }
 0x9d2   : > { %v2953_v16 = vmul.f32 %v5404_v35, %v7012_v9  ;;  %v3055_v19 = vpop.permute.xlu1 %3054 }
 0x9d3   : > { %v3057_v26 = vpop.permute.xlu0 %3056 }
 0x9d4   : > { %3126 = vrot.lane.b32.xlu1 %v2952_v60, %s5427_s8  ;;  %3128 = vrot.lane.b32.xlu0 %v2953_v16, %s5427_s8 }
 0x9d6   : > { %v2995_v0 = vpop.permute.xlu1 %2994 }
 0x9d7   : > { %v2997_v44 = vpop.permute.xlu0 %2996 }
 0x9da   : > { %v3059_v1 = vpop.permute.xlu1 %3058 }
 0x9db   : > { %v3061_v41 = vpop.permute.xlu0 %3060 }
 0x9de   : > { %v2999_v33 = vpop.permute.xlu1 %2998 }
 0x9df   : > { %v3001_v48 = vpop.permute.xlu0 %3000 }
 0x9e2   : > { %v3063_v36 = vpop.permute.xlu1 %3062 }
 0xa05   : > { %v3103_v9 = vpop.permute.xlu0 %3102 }
 0xa06   : > { %v3182_v59 = vsel %vm3179_vm6, %v6927_v20, %v3103_v9 }
 0xa09   : > { %v3065_v28 = vpop.permute.xlu0 %3064 }
 0xa26   : > { %v3101_v47 = vpop.permute.xlu1 %3100 }
 0xa27   : > { %v3181_v51 = vsel %vm3179_vm6, %v6889_v49, %v3101_v47 }
 0xa2a   : > { %v3099_v50 = vpop.permute.xlu1 %3098 }
 0xa2b   : > { %v3180_v7 = vsel %vm3179_vm6, %v6878_v24, %v3099_v50 }
 0xa2c   : > { %4430 = vmatprep.mubr.msk.f32.mxu1 %vm252_vm0, %v3180_v7 }
 0xa2d   : > { %4431 = vmatmul.mubr.msk.f32.vlgmr.msra.gmra.mrb[58].mxu1 %vm252_vm0, %v3181_v51 }
 0xa2e   : > { %4433 = vmatprep.mubr.msk.f32.mxu1 %vm252_vm0, %v3182_v59  ;;  %v3105_v37 = vpop.permute.xlu1 %3104 }
 0xa2f   : > { %v3183_v21 = vsel %vm3179_vm6, %v6933_v27, %v3105_v37 }
 0xa31   : > { %4434 = vmatmul.mubr.msk.f32.gmra.mrb[60].mxu1 %vm252_vm0, %v3183_v21 }
 0xa32   : > { %v3109_v24 = vpop.permute.xlu0 %3108  ;;  %v3107_v32 = vpop.permute.xlu1 %3106 }
 0xa33   : > { %v3185_v49 = vsel %vm3179_vm6, %v6961_v39, %v3109_v24  ;;  %v3184_v53 = vsel %vm3179_vm6, %v6956_v58, %v3107_v32  ;;  %v3155_v39 = vsel %vm561_vm1, %v6855_v3, %v2989_v63  ;;  %v3156_v3 = vsel %vm561_vm1, %v6874_v13, %v2991_v25 }
 0xa34   : > { %4436 = vmatprep.mubr.msk.f32.mxu1 %vm252_vm0, %v3184_v53  ;;  %v3172_v58 = vsel %vm3162_vm2, %v3155_v39, %v3053_v42  ;;  %v3173_v29 = vsel %vm3162_vm2, %v3156_v3, %v3055_v19  ;;  %v3158_v13 = vsel %vm561_vm1, %v6885_v12, %v2995_v0  ;;  %v3160_v12 = vsel %vm561_vm1, %v6881_v30, %v2999_v33  ;;  %v3625_v30 = vld [vmem:[%s7155_s4] ss:$0 sm:$0xff] }
 0xa35   : > { %4437 = vmatmul.mubr.msk.f32.gmra.mrb[62].mxu1 %vm252_vm0, %v3185_v49  ;;  %v3175_v31 = vsel %vm3162_vm2, %v3158_v13, %v3059_v1  ;;  %v3177_v56 = vsel %vm3162_vm2, %v3160_v12, %v3063_v36 }
 0xa36   : > { %v3113_v20 = vpop.permute.xlu0 %3112  ;;  %v3111_v45 = vpop.permute.xlu1 %3110 }
 0xa37   : > { %v3187_v40 = vsel %vm3179_vm6, %v6944_v18, %v3113_v20  ;;  %v3186_v27 = vsel %vm3179_vm6, %v6970_v22, %v3111_v45  ;;  %v3157_v22 = vsel %vm561_vm1, %v6862_v43, %v2993_v62  ;;  %v3159_v43 = vsel %vm561_vm1, %v6871_v17, %v2997_v44 }
 0xa38   : > { %4439 = vmatprep.mubr.msk.f32.mxu1 %vm252_vm0, %v3186_v27  ;;  %v3174_v15 = vsel %vm3162_vm2, %v3157_v22, %v3057_v26  ;;  %v3176_v52 = vsel %vm3162_vm2, %v3159_v43, %v3061_v41  ;;  %v3161_v17 = vsel %vm561_vm1, %v6952_v54, %v3001_v48 }
 0xa39   : > { %4440 = vmatmul.mubr.msk.f32.gmra.mrb[64].mxu1 %vm252_vm0, %v3187_v40  ;;  %v3178_v46 = vsel %vm3162_vm2, %v3161_v17, %v3065_v28 }
 0xa3a   : > { %v3117_v11 = vpop.permute.xlu0 %3116  ;;  %v3115_v38 = vpop.permute.xlu1 %3114 }
 0xa3b   : > { %v3189_v5 = vsel %vm3179_vm6, %v3172_v58, %v3117_v11  ;;  %v3188_v18 = vsel %vm3179_vm6, %v3171_v23, %v3115_v38 }
 0xa3c   : > { %4442 = vmatprep.mubr.msk.f32.mxu1 %vm252_vm0, %v3188_v18 }
 0xa3d   : > { %4443 = vmatmul.mubr.msk.f32.gmra.mrb[66].mxu1 %vm252_vm0, %v3189_v5 }
 0xa3e   : > { %v3121_v14 = vpop.permute.xlu0 %3120  ;;  %v3119_v4 = vpop.permute.xlu1 %3118 }
 0xa3f   : > { %v3191_v8 = vsel %vm3179_vm6, %v3174_v15, %v3121_v14  ;;  %v3190_v2 = vsel %vm3179_vm6, %v3173_v29, %v3119_v4 }
 0xa40   : > { %4445 = vmatprep.mubr.msk.f32.mxu1 %vm252_vm0, %v3190_v2 }
 0xa41   : > { %4446 = vmatmul.mubr.msk.f32.gmra.mrb[68].mxu1 %vm252_vm0, %v3191_v8 }
 0xa42   : > { %v3125_v34 = vpop.permute.xlu0 %3124  ;;  %v3123_v61 = vpop.permute.xlu1 %3122 }
 0xa43   : > { %v3193_v57 = vsel %vm3179_vm6, %v3176_v52, %v3125_v34  ;;  %v3192_v10 = vsel %vm3179_vm6, %v3175_v31, %v3123_v61 }
 0xa44   : > { %4448 = vmatprep.mubr.msk.f32.mxu1 %vm252_vm0, %v3192_v10 }
 0xa45   : > { %4449 = vmatmul.mubr.msk.f32.gmra.mrb[70].mxu1 %vm252_vm0, %v3193_v57 }
 0xa46   : > { %v3129_v6 = vpop.permute.xlu0 %3128  ;;  %v3127_v35 = vpop.permute.xlu1 %3126 }
 0xa47   : > { %v3195_v60 = vsel %vm3179_vm6, %v3178_v46, %v3129_v6  ;;  %v3194_v16 = vsel %vm3179_vm6, %v3177_v56, %v3127_v35 }
 0xa48   : > { %4451 = vmatprep.mubr.msk.f32.mxu1 %vm252_vm0, %v3194_v16 }
 0xa49   : > { %4452 = vmatmul.mubr.msk.f32.gmra.mrb[72].mxu1 %vm252_vm0, %v3195_v60 }
 0xb00   : > { %v4432_v54 = vpop.f32.mrb[58].mxu1 }
 0xb01   : > { %v3327_v55 = vadd.f32 %v4432_v54, %v3625_v30  ;;  %v3321_v63 = vpop.f32.mrb[59].mxu1 }
 0xb02   : > { %v3322_v25 = vadd.f32 %v3625_v30, %v3321_v63 }
 0xb03   : > { %3401 = vst.msk [vmem:[%s7114_s13 + $0x8] sm:$0xff] %vm252_vm0, %v3327_v55 }
 0xb04   : > { %3400 = vst.msk [vmem:[%s7114_s13] sm:$0xff] %vm252_vm0, %v3322_v25  ;;  %v4435_v42 = vpop.f32.mrb[60].mxu1 }
 0xb05   : > { %v3337_v19 = vadd.f32 %v4435_v42, %v3625_v30  ;;  %v3331_v62 = vpop.f32.mrb[61].mxu1 }
 0xb06   : > { %v3332_v0 = vadd.f32 %v3625_v30, %v3331_v62 }
 0xb07   : > { %3403 = vst.msk [vmem:[%s7114_s13 + $0x18] sm:$0xff] %vm252_vm0, %v3337_v19 }
 0xb08   : > { %3402 = vst.msk [vmem:[%s7114_s13 + $0x10] sm:$0xff] %vm252_vm0, %v3332_v0  ;;  %v4438_v26 = vpop.f32.mrb[62].mxu1 }
 0xb09   : > { %v3347_v1 = vadd.f32 %v4438_v26, %v3625_v30  ;;  %v3341_v44 = vpop.f32.mrb[63].mxu1 }
 0xb0a   : > { %v3342_v33 = vadd.f32 %v3625_v30, %v3341_v44 }
 0xb0b   : > { %3405 = vst.msk [vmem:[%s7114_s13 + $0x28] sm:$0xff] %vm252_vm0, %v3347_v1 }
 0xb0c   : > { %3404 = vst.msk [vmem:[%s7114_s13 + $0x20] sm:$0xff] %vm252_vm0, %v3342_v33  ;;  %v4441_v41 = vpop.f32.mrb[64].mxu1 }
 0xb0d   : > { %v3357_v36 = vadd.f32 %v4441_v41, %v3625_v30  ;;  %v3351_v48 = vpop.f32.mrb[65].mxu1 }
 0xb0e   : > { %v3352_v47 = vadd.f32 %v3625_v30, %v3351_v48 }
 0xb0f   : > { %3407 = vst.msk [vmem:[%s7114_s13 + $0x38] sm:$0xff] %vm252_vm0, %v3357_v36 }
 0xb10   : > { %3406 = vst.msk [vmem:[%s7114_s13 + $0x30] sm:$0xff] %vm252_vm0, %v3352_v47  ;;  %v4444_v9 = vpop.f32.mrb[66].mxu1 }
 0xb11   : > { %v3367_v50 = vadd.f32 %v4444_v9, %v3625_v30  ;;  %v3361_v7 = vpop.f32.mrb[67].mxu1 }
 0xb12   : > { %v3362_v51 = vadd.f32 %v3625_v30, %v3361_v7 }
 0xb13   : > { %3409 = vst.msk [vmem:[%s7114_s13 + $0x48] sm:$0xff] %vm252_vm0, %v3367_v50 }
 0xb14   : > { %3408 = vst.msk [vmem:[%s7114_s13 + $0x40] sm:$0xff] %vm252_vm0, %v3362_v51  ;;  %v4447_v59 = vpop.f32.mrb[68].mxu1 }
 0xb15   : > { %v3377_v28 = vadd.f32 %v4447_v59, %v3625_v30  ;;  %v3371_v37 = vpop.f32.mrb[69].mxu1 }
 0xb16   : > { %v3372_v21 = vadd.f32 %v3625_v30, %v3371_v37 }
 0xb17   : > { %3411 = vst.msk [vmem:[%s7114_s13 + $0x58] sm:$0xff] %vm252_vm0, %v3377_v28 }
 0xb18   : > { %3410 = vst.msk [vmem:[%s7114_s13 + $0x50] sm:$0xff] %vm252_vm0, %v3372_v21  ;;  %v4450_v24 = vpop.f32.mrb[70].mxu1 }
 0xb19   : > { %v3387_v32 = vadd.f32 %v4450_v24, %v3625_v30  ;;  %v3381_v49 = vpop.f32.mrb[71].mxu1 }
 0xb1a   : > { %v3382_v53 = vadd.f32 %v3625_v30, %v3381_v49 }
 0xb1b   : > { %3413 = vst.msk [vmem:[%s7114_s13 + $0x68] sm:$0xff] %vm252_vm0, %v3387_v32 }
 0xb1c   : > { %3412 = vst.msk [vmem:[%s7114_s13 + $0x60] sm:$0xff] %vm252_vm0, %v3382_v53  ;;  %v4453_v20 = vpop.f32.mrb[72].mxu1 }
 0xb1d   : > { %v3397_v45 = vadd.f32 %v4453_v20, %v3625_v30  ;;  %v3391_v40 = vpop.f32.mrb[73].mxu1 }
 0xb1e   : > { %v3392_v27 = vadd.f32 %v3625_v30, %v3391_v40 }
 0xb1f   : > { %3415 = vst.msk [vmem:[%s7114_s13 + $0x78] sm:$0xff] %vm252_vm0, %v3397_v45 }
 0xb20   : > { %3414 = vst.msk [vmem:[%s7114_s13 + $0x70] sm:$0xff] %vm252_vm0, %v3392_v27 }
 0xb21 PF: > { %s15_s18 = sadd.s32 1, %s5411_s18  }
 0xb22   : > { %p12_p4 = scmp.ge.s32.totalorder %s15_s18, 4  }
 0xb24   :  { %14 = sbr.rel (!%p12_p4) target bundleno = 1 (0x1), region = 70 }

</bundles_post_ra>
